<compile_context>
chip_gen: v5e
topology: v5e:2x2
jax: 0.10.0
libtpu: 0.0.40
codegen_flags: <defaults>
</compile_context>

<pallas_src>
import functools

import jax
import jax.numpy as jnp
from jax import lax
from jax.experimental import pallas as pl
from jax.experimental.pallas import tpu as pltpu

LEAKY_SLOPE = 0.05
BN_EPS = 1e-5


# ---------------------------------------------------------------------------
# helpers
# ---------------------------------------------------------------------------
def _round_up(x, m):
    return ((x + m - 1) // m) * m


def _full_spec(shape):
    # whole-array block (single grid step) -> satisfies TPU tiling rules.
    return pl.BlockSpec(shape, lambda i: (0,) * len(shape))


_COMPILER_PARAMS = pltpu.CompilerParams(
    dimension_semantics=("arbitrary",),
    vmem_limit_bytes=32 * 1024 * 1024,
)


# ---------------------------------------------------------------------------
# Pallas kernels (fused GEMM + epilogue)
# ---------------------------------------------------------------------------
def _gemm_bn_leaky_kernel(a_ref, w_ref, g_ref, b_ref, o_ref, *, phases, cpad):
    """GEMM -> BatchNorm(training batch stats) -> LeakyReLU(0.05).

    a: (M, K) bf16, w: (K, phases*cpad) bf16, g/b: (1, cpad) f32.
    Columns are `phases` blocks of width cpad; a channel c lives at column
    p*cpad + c of every block, so its batch stats pool all blocks and rows.
    """
    acc = jnp.dot(a_ref[...], w_ref[...], preferred_element_type=jnp.float32)
    m = acc.shape[0]
    inv_count = 1.0 / (m * phases)

    # per-channel batch mean (combine the phase column blocks).
    s1 = jnp.sum(acc, axis=0, keepdims=True)                  # (1, phases*cpad)
    mean_c = s1[:, 0:cpad]
    for p in range(1, phases):
        mean_c = mean_c + s1[:, p * cpad:(p + 1) * cpad]
    mean_c = mean_c * inv_count                               # (1, cpad)
    mean_t = jnp.concatenate([mean_c] * phases, axis=1)       # (1, phases*cpad)

    d = acc - mean_t
    s2 = jnp.sum(d * d, axis=0, keepdims=True)
    var_c = s2[:, 0:cpad]
    for p in range(1, phases):
        var_c = var_c + s2[:, p * cpad:(p + 1) * cpad]
    var_c = var_c * inv_count                                 # biased variance

    scale_c = lax.rsqrt(var_c + BN_EPS) * g_ref[...]          # (1, cpad)
    scale_t = jnp.concatenate([scale_c] * phases, axis=1)
    beta_t = jnp.concatenate([b_ref[...]] * phases, axis=1)

    y = d * scale_t + beta_t
    o_ref[...] = jnp.where(y >= 0.0, y, LEAKY_SLOPE * y)


def _gemm_bias_tanh_kernel(a_ref, w_ref, b_ref, o_ref):
    acc = jnp.dot(a_ref[...], w_ref[...], preferred_element_type=jnp.float32)
    o_ref[...] = jnp.tanh(acc + b_ref[...])


# ---------------------------------------------------------------------------
# Pallas wrappers (one call per layer, whole-array blocks, bf16 GEMM inputs)
# ---------------------------------------------------------------------------
def fused_gemm_bn_leaky(a, w, gamma, beta, *, phases, cpad):
    m, k = a.shape
    cols = w.shape[1]
    assert cols == phases * cpad
    kernel = functools.partial(_gemm_bn_leaky_kernel, phases=phases, cpad=cpad)
    return pl.pallas_call(
        kernel,
        out_shape=jax.ShapeDtypeStruct((m, cols), jnp.float32),
        grid=(1,),
        in_specs=[_full_spec((m, k)), _full_spec((k, cols)),
                  _full_spec((1, cpad)), _full_spec((1, cpad))],
        out_specs=_full_spec((m, cols)),
        compiler_params=_COMPILER_PARAMS,
    )(a.astype(jnp.bfloat16), w.astype(jnp.bfloat16),
      gamma.reshape(1, cpad), beta.reshape(1, cpad))


def fused_gemm_bias_tanh(a, w, bias_cols):
    m, k = a.shape
    cols = w.shape[1]
    return pl.pallas_call(
        _gemm_bias_tanh_kernel,
        out_shape=jax.ShapeDtypeStruct((m, cols), jnp.float32),
        grid=(1,),
        in_specs=[_full_spec((m, k)), _full_spec((k, cols)),
                  _full_spec((1, cols))],
        out_specs=_full_spec((m, cols)),
        compiler_params=_COMPILER_PARAMS,
    )(a.astype(jnp.bfloat16), w.astype(jnp.bfloat16),
      bias_cols.reshape(1, cols))


# ---------------------------------------------------------------------------
# im2col / weight plumbing (plain-JAX glue: pad, slice, reshape)
# TODO(synk): build patches inside the kernel from a VMEM-resident activation
# tile instead of materializing the im2col matrix via XLA (saves ~k^2 HBM
# bytes); kept as XLA glue here because the activations are tiny.
# ---------------------------------------------------------------------------
def im2col(x_nhwc, kh, kw, stride, pad):
    x = jnp.pad(x_nhwc, ((0, 0), (pad, pad), (pad, pad), (0, 0)))
    n, h, w, c = x.shape
    ho = (h - kh) // stride + 1
    wo = (w - kw) // stride + 1
    patches = []
    for i in range(kh):
        for j in range(kw):
            patches.append(
                x[:, i:i + stride * ho:stride, j:j + stride * wo:stride, :])
    p = jnp.stack(patches, axis=3)                 # (N, Ho, Wo, kh*kw, C)
    return p.reshape(n * ho * wo, kh * kw * c), (n, ho, wo)


def conv_weight_matrix(w, cpad):
    """PyTorch Conv2d weight (Cout, Cin, kh, kw) -> (kh*kw*Cin, cpad)."""
    cout, cin, kh, kw = w.shape
    wm = jnp.transpose(w, (2, 3, 1, 0)).reshape(kh * kw * cin, cout)
    return jnp.pad(wm, ((0, 0), (0, cpad - cout)))


# window offset u in {0,1,2} (input row i-1, i, i+1) -> kernel tap (or -1).
# Derived from ConvTranspose2d(k=4, s=2, p=1):
#   out[2i]   = w[1]*x[i] + w[3]*x[i-1]
#   out[2i+1] = w[2]*x[i] + w[0]*x[i+1]
_PHASE_TAP = {0: (3, 1, -1), 1: (-1, 2, 0)}


def deconv_phase_weight_matrix(w_t, cpad):
    """ConvTranspose2d(k=4,s=2,p=1) weights -> 4-phase sub-pixel conv GEMM.

    w_t: (Cin, Cout, 4, 4).  Returns (9*Cin, 4*cpad); column block p = 2*r + c
    is the 3x3 stride-1 conv kernel producing output pixels (2i+r, 2j+c).
    K ordering (u, v, ci) matches im2col(kh=3, kw=3, stride=1, pad=1).
    """
    cin, cout, kh, kw = w_t.shape
    assert kh == 4 and kw == 4
    zero = jnp.zeros((cin, cout), w_t.dtype)
    blocks = []
    for r in (0, 1):
        for c in (0, 1):
            taps = []
            for u in range(3):
                ku = _PHASE_TAP[r][u]
                for v in range(3):
                    kv = _PHASE_TAP[c][v]
                    taps.append(zero if (ku < 0 or kv < 0)
                                else w_t[:, :, ku, kv])
            wk = jnp.stack(taps, axis=0)            # (9, Cin, Cout)
            wm = wk.reshape(9 * cin, cout)
            blocks.append(jnp.pad(wm, ((0, 0), (0, cpad - cout))))
    return jnp.concatenate(blocks, axis=1)          # (9*Cin, 4*cpad)


def phase_to_space(y, n, h, w, cpad, cout):
    """(N*H*W, 4*cpad) phase-major GEMM output -> (N, 2H, 2W, cout)."""
    y = y.reshape(n, h, w, 2, 2, cpad)
    y = jnp.transpose(y, (0, 1, 3, 2, 4, 5))        # (N, H, r, W, c, C)
    return y.reshape(n, 2 * h, 2 * w, cpad)[:, :, :, :cout]


# ---------------------------------------------------------------------------
# Gxy model
# ---------------------------------------------------------------------------
def init_gxy_params(key, conv_dim=64):
    layers = [
        ("conv", 1, conv_dim, 4),                 # cnn1
        ("conv", conv_dim, conv_dim * 2, 3),      # cnn2
        ("conv", conv_dim * 2, conv_dim * 2, 3),  # cnn3
        ("conv", conv_dim * 2, conv_dim * 2, 3),  # cnn4
        ("deconv", conv_dim * 2, conv_dim, 4),    # cnn5
        ("deconv", conv_dim, 3, 4),               # cnn6 (no BN)
    ]
    params = []
    for kind, cin, cout, k in layers:
        key, kw_, kb_ = jax.random.split(key, 3)
        scale = 1.0 / float(cin * k * k) ** 0.5
        shape = (cout, cin, k, k) if kind == "conv" else (cin, cout, k, k)
        w = jax.random.uniform(kw_, shape, jnp.float32, -scale, scale)
        b = jax.random.uniform(kb_, (cout,), jnp.float32, -scale, scale)
        params.append(dict(w=w, b=b,
                           gamma=jnp.ones((cout,), jnp.float32),
                           beta=jnp.zeros((cout,), jnp.float32)))
    return params                                  # array-only pytree


_CONV_CFG = ((4, 2, 1), (3, 2, 1), (3, 1, 1), (3, 1, 1))   # (k, stride, pad)


@jax.jit
def gxy_forward(x_nchw, params):
    out = jnp.transpose(x_nchw, (0, 2, 3, 1)).astype(jnp.float32)   # NHWC

    # cnn1..cnn4: Conv + BN(batch stats) + LeakyReLU, one fused kernel each.
    for li, (k, s, pad) in enumerate(_CONV_CFG):
        p = params[li]
        cout = p["w"].shape[0]
        cpad = _round_up(cout, 128)
        a, (n, ho, wo) = im2col(out, k, k, s, pad)
        wm = conv_weight_matrix(p["w"], cpad)
        gamma = jnp.pad(p["gamma"], (0, cpad - cout))
        beta = jnp.pad(p["beta"], (0, cpad - cout))
        # conv bias intentionally dropped: BN batch-mean subtraction cancels it.
        y = fused_gemm_bn_leaky(a, wm, gamma, beta, phases=1, cpad=cpad)
        out = y.reshape(n, ho, wo, cpad)[:, :, :, :cout]

    # cnn5: ConvTranspose2d(4,2,1) + BN + LeakyReLU as 4-phase sub-pixel conv.
    p = params[4]
    cout = p["w"].shape[1]
    cpad = _round_up(cout, 128)
    n, h, w, _ = out.shape
    a, _ = im2col(out, 3, 3, 1, 1)
    wm = deconv_phase_weight_matrix(p["w"], cpad)
    gamma = jnp.pad(p["gamma"], (0, cpad - cout))
    beta = jnp.pad(p["beta"], (0, cpad - cout))
    y = fused_gemm_bn_leaky(a, wm, gamma, beta, phases=4, cpad=cpad)
    out = phase_to_space(y, n, h, w, cpad, cout)

    # cnn6: ConvTranspose2d(4,2,1) + bias + tanh (no BN).
    p = params[5]
    cout = p["w"].shape[1]
    cpad = 32                                      # 4 phases * 32 = 128 lanes
    n, h, w, _ = out.shape
    a, _ = im2col(out, 3, 3, 1, 1)
    wm = deconv_phase_weight_matrix(p["w"], cpad)
    bias = jnp.pad(p["b"], (0, cpad - cout))
    bias_cols = jnp.tile(bias.reshape(1, cpad), (1, 4))
    y = fused_gemm_bias_tanh(a, wm, bias_cols)
    out = phase_to_space(y, n, h, w, cpad, cout)

    return jnp.transpose(out, (0, 3, 1, 2))        # NHWC -> NCHW


# ---------------------------------------------------------------------------
# plain-JAX f32 reference (dilate+flip deconv, explicit training-mode BN)
# ---------------------------------------------------------------------------
def dilate_spatial(x_nhwc, s):
    if s == 1:
        return x_nhwc
    n, h, w, c = x_nhwc.shape
    out = jnp.zeros((n, h * s - (s - 1), w * s - (s - 1), c), x_nhwc.dtype)
    return out.at[:, ::s, ::s, :].set(x_nhwc)


def _ref_conv(x_nhwc, w, b, stride, pad):
    a, (n, ho, wo) = im2col(x_nhwc, w.shape[2], w.shape[3], stride, pad)
    wm = jnp.transpose(w, (2, 3, 1, 0)).reshape(-1, w.shape[0])
    return (a @ wm + b).reshape(n, ho, wo, -1)


def _ref_deconv(x_nhwc, w_t, b, stride, pad):
    xd = dilate_spatial(x_nhwc, stride)
    w_conv = jnp.flip(jnp.transpose(w_t, (1, 0, 2, 3)), axis=(2, 3))
    return _ref_conv(xd, w_conv, b, 1, w_t.shape[2] - 1 - pad)


def _ref_bn_leaky(x, gamma, beta):
    mean = jnp.mean(x, axis=(0, 1, 2), keepdims=True)
    var = jnp.mean((x - mean) ** 2, axis=(0, 1, 2), keepdims=True)
    y = (x - mean) * lax.rsqrt(var + BN_EPS) * gamma + beta
    return jnp.where(y >= 0.0, y, LEAKY_SLOPE * y)


@jax.jit
def ref_forward(x_nchw, params):
    out = jnp.transpose(x_nchw, (0, 2, 3, 1)).astype(jnp.float32)
    for li, (k, s, pad) in enumerate(_CONV_CFG):
        p = params[li]
        out = _ref_bn_leaky(_ref_conv(out, p["w"], p["b"], s, pad),
                            p["gamma"], p["beta"])
    p = params[4]
    out = _ref_bn_leaky(_ref_deconv(out, p["w"], p["b"], 2, 1),
                        p["gamma"], p["beta"])
    p = params[5]
    out = jnp.tanh(_ref_deconv(out, p["w"], p["b"], 2, 1))
    return jnp.transpose(out, (0, 3, 1, 2))


if __name__ == "__main__":
    key = jax.random.PRNGKey(0)
    k_x, k_p = jax.random.split(key)
    x = jax.random.normal(k_x, (2, 1, 16, 16), jnp.float32)   # NCHW, Cin=1
    params = init_gxy_params(k_p, conv_dim=64)

    out = jax.block_until_ready(gxy_forward(x, params))
    assert out.shape == (2, 3, 16, 16), out.shape
    assert bool(jnp.all(jnp.isfinite(out)))
    assert bool(jnp.all(jnp.abs(out) <= 1.0 + 1e-6))          # tanh range

    # cross-check against the f32 plain-JAX reference (Pallas path uses bf16
    # matmul inputs with f32 accumulation -> loose tolerance).
    ref = jax.block_until_ready(ref_forward(x, params))
    max_diff = float(jnp.max(jnp.abs(out - ref)))
    mean_diff = float(jnp.mean(jnp.abs(out - ref)))
    assert max_diff < 0.35 and mean_diff < 0.05, (max_diff, mean_diff)

    print("KERNEL_OK")
</pallas_src>

<mosaic_0001>
module attributes {stable_mosaic.version = 11 : i64} {
  func.func @_gemm_bn_leaky_kernel(%arg0: i32, %arg1: memref<128x16xbf16, #tpu.memory_space<vmem>>, %arg2: memref<16x128xbf16, #tpu.memory_space<vmem>>, %arg3: memref<1x128xf32, #tpu.memory_space<vmem>>, %arg4: memref<1x128xf32, #tpu.memory_space<vmem>>, %arg5: memref<128x128xf32, #tpu.memory_space<vmem>>) attributes {dimension_semantics = [#tpu.dimension_semantics<arbitrary>], iteration_bounds = array<i64: 1>, scalar_prefetch = 0 : i64, scratch_operands = 0 : i64, tpu.core_type = #tpu.core_type<tc>, window_params = [{pipeline_mode = #tpu.pipeline_mode<synchronous>, transform_indices = @transform_0, window_bounds = array<i64: 128, 16>}, {pipeline_mode = #tpu.pipeline_mode<synchronous>, transform_indices = @transform_1, window_bounds = array<i64: 16, 128>}, {pipeline_mode = #tpu.pipeline_mode<synchronous>, transform_indices = @transform_2, window_bounds = array<i64: 1, 128>}, {pipeline_mode = #tpu.pipeline_mode<synchronous>, transform_indices = @transform_3, window_bounds = array<i64: 1, 128>}, {pipeline_mode = #tpu.pipeline_mode<synchronous>, transform_indices = @transform_4, window_bounds = array<i64: 128, 128>}]} {
    %c0 = arith.constant 0 : index
    %c0_0 = arith.constant 0 : index
    %0 = vector.load %arg1[%c0, %c0_0] : memref<128x16xbf16, #tpu.memory_space<vmem>>, vector<128x16xbf16>
    %c0_1 = arith.constant 0 : index
    %c0_2 = arith.constant 0 : index
    %1 = vector.load %arg2[%c0_1, %c0_2] : memref<16x128xbf16, #tpu.memory_space<vmem>>, vector<16x128xbf16>
    %cst = arith.constant dense<0.000000e+00> : vector<128x128xf32>
    %2 = tpu.matmul %0, %1, %cst {dimension_numbers = #tpu.dot_dimension_numbers<[1], [0], [0], [1], [0, 0, 1, 1], [], []>} : vector<128x16xbf16>, vector<16x128xbf16>, vector<128x128xf32> -> vector<128x128xf32>
    %cst_3 = arith.constant dense<0.000000e+00> : vector<128xf32>
    %3 = vector.multi_reduction <add>, %2, %cst_3 [0] : vector<128x128xf32> to vector<128xf32>
    %4 = vector.shape_cast %3 : vector<128xf32> to vector<1x128xf32>
    %cst_4 = arith.constant 7.812500e-03 : f32
    %5 = vector.broadcast %cst_4 : f32 to vector<1x128xf32>
    %6 = arith.mulf %4, %5 : vector<1x128xf32>
    %7 = vector.broadcast %6 : vector<1x128xf32> to vector<128x128xf32>
    %8 = arith.subf %2, %7 : vector<128x128xf32>
    %9 = arith.mulf %8, %8 : vector<128x128xf32>
    %cst_5 = arith.constant dense<0.000000e+00> : vector<128xf32>
    %10 = vector.multi_reduction <add>, %9, %cst_5 [0] : vector<128x128xf32> to vector<128xf32>
    %11 = vector.shape_cast %10 : vector<128xf32> to vector<1x128xf32>
    %cst_6 = arith.constant 7.812500e-03 : f32
    %12 = vector.broadcast %cst_6 : f32 to vector<1x128xf32>
    %13 = arith.mulf %11, %12 : vector<1x128xf32>
    %cst_7 = arith.constant 9.99999974E-6 : f32
    %14 = vector.broadcast %cst_7 : f32 to vector<1x128xf32>
    %15 = arith.addf %13, %14 : vector<1x128xf32>
    %16 = math.rsqrt %15 : vector<1x128xf32>
    %c0_8 = arith.constant 0 : index
    %c0_9 = arith.constant 0 : index
    %17 = vector.load %arg3[%c0_8, %c0_9] : memref<1x128xf32, #tpu.memory_space<vmem>>, vector<1x128xf32>
    %18 = arith.mulf %16, %17 : vector<1x128xf32>
    %c0_10 = arith.constant 0 : index
    %c0_11 = arith.constant 0 : index
    %19 = vector.load %arg4[%c0_10, %c0_11] : memref<1x128xf32, #tpu.memory_space<vmem>>, vector<1x128xf32>
    %20 = vector.broadcast %18 : vector<1x128xf32> to vector<128x128xf32>
    %21 = arith.mulf %8, %20 : vector<128x128xf32>
    %22 = vector.broadcast %19 : vector<1x128xf32> to vector<128x128xf32>
    %23 = arith.addf %21, %22 : vector<128x128xf32>
    %cst_12 = arith.constant 0.000000e+00 : f32
    %24 = vector.broadcast %cst_12 : f32 to vector<128x128xf32>
    %25 = arith.cmpf oge, %23, %24 : vector<128x128xf32>
    %cst_13 = arith.constant 5.000000e-02 : f32
    %26 = vector.broadcast %cst_13 : f32 to vector<128x128xf32>
    %27 = arith.mulf %26, %23 : vector<128x128xf32>
    %28 = arith.select %25, %23, %27 : vector<128x128xi1>, vector<128x128xf32>
    %c0_14 = arith.constant 0 : index
    %c0_15 = arith.constant 0 : index
    %29 = vector.load %arg5[%c0_14, %c0_15] : memref<128x128xf32, #tpu.memory_space<vmem>>, vector<128x128xf32>
    tpu.vector_store %arg5[%c0_14, %c0_15], %28 {strides = array<i32>} : memref<128x128xf32, #tpu.memory_space<vmem>>, vector<128x128xf32>,
    return
  }
  func.func @transform_0(%arg0: i32) -> (i32, i32) {
    %c0_i32 = arith.constant 0 : i32
    %c0_i32_0 = arith.constant 0 : i32
    %c0_i32_1 = arith.constant 0 : i32
    return %c0_i32, %c0_i32_0 : i32, i32
  }
  func.func @transform_1(%arg0: i32) -> (i32, i32) {
    %c0_i32 = arith.constant 0 : i32
    %c0_i32_0 = arith.constant 0 : i32
    %c0_i32_1 = arith.constant 0 : i32
    return %c0_i32, %c0_i32_0 : i32, i32
  }
  func.func @transform_2(%arg0: i32) -> (i32, i32) {
    %c0_i32 = arith.constant 0 : i32
    %c0_i32_0 = arith.constant 0 : i32
    %c0_i32_1 = arith.constant 0 : i32
    return %c0_i32, %c0_i32_0 : i32, i32
  }
  func.func @transform_3(%arg0: i32) -> (i32, i32) {
    %c0_i32 = arith.constant 0 : i32
    %c0_i32_0 = arith.constant 0 : i32
    %c0_i32_1 = arith.constant 0 : i32
    return %c0_i32, %c0_i32_0 : i32, i32
  }
  func.func @transform_4(%arg0: i32) -> (i32, i32) {
    %c0_i32 = arith.constant 0 : i32
    %c0_i32_0 = arith.constant 0 : i32
    %c0_i32_1 = arith.constant 0 : i32
    return %c0_i32, %c0_i32_0 : i32, i32
  }
}

module attributes {stable_mosaic.version = 11 : i64} {
  func.func @_gemm_bn_leaky_kernel(%arg0: i32, %arg1: memref<32x576xbf16, #tpu.memory_space<vmem>>, %arg2: memref<576x128xbf16, #tpu.memory_space<vmem>>, %arg3: memref<1x128xf32, #tpu.memory_space<vmem>>, %arg4: memref<1x128xf32, #tpu.memory_space<vmem>>, %arg5: memref<32x128xf32, #tpu.memory_space<vmem>>) attributes {dimension_semantics = [#tpu.dimension_semantics<arbitrary>], iteration_bounds = array<i64: 1>, scalar_prefetch = 0 : i64, scratch_operands = 0 : i64, tpu.core_type = #tpu.core_type<tc>, window_params = [{pipeline_mode = #tpu.pipeline_mode<synchronous>, transform_indices = @transform_0, window_bounds = array<i64: 32, 576>}, {pipeline_mode = #tpu.pipeline_mode<synchronous>, transform_indices = @transform_1, window_bounds = array<i64: 576, 128>}, {pipeline_mode = #tpu.pipeline_mode<synchronous>, transform_indices = @transform_2, window_bounds = array<i64: 1, 128>}, {pipeline_mode = #tpu.pipeline_mode<synchronous>, transform_indices = @transform_3, window_bounds = array<i64: 1, 128>}, {pipeline_mode = #tpu.pipeline_mode<synchronous>, transform_indices = @transform_4, window_bounds = array<i64: 32, 128>}]} {
    %c0 = arith.constant 0 : index
    %c0_0 = arith.constant 0 : index
    %0 = vector.load %arg1[%c0, %c0_0] : memref<32x576xbf16, #tpu.memory_space<vmem>>, vector<32x576xbf16>
    %c0_1 = arith.constant 0 : index
    %c0_2 = arith.constant 0 : index
    %1 = vector.load %arg2[%c0_1, %c0_2] : memref<576x128xbf16, #tpu.memory_space<vmem>>, vector<576x128xbf16>
    %cst = arith.constant dense<0.000000e+00> : vector<32x128xf32>
    %2 = tpu.matmul %0, %1, %cst {dimension_numbers = #tpu.dot_dimension_numbers<[1], [0], [0], [1], [0, 0, 1, 1], [], []>} : vector<32x576xbf16>, vector<576x128xbf16>, vector<32x128xf32> -> vector<32x128xf32>
    %cst_3 = arith.constant dense<0.000000e+00> : vector<128xf32>
    %3 = vector.multi_reduction <add>, %2, %cst_3 [0] : vector<32x128xf32> to vector<128xf32>
    %4 = vector.shape_cast %3 : vector<128xf32> to vector<1x128xf32>
    %cst_4 = arith.constant 3.125000e-02 : f32
    %5 = vector.broadcast %cst_4 : f32 to vector<1x128xf32>
    %6 = arith.mulf %4, %5 : vector<1x128xf32>
    %7 = vector.broadcast %6 : vector<1x128xf32> to vector<32x128xf32>
    %8 = arith.subf %2, %7 : vector<32x128xf32>
    %9 = arith.mulf %8, %8 : vector<32x128xf32>
    %cst_5 = arith.constant dense<0.000000e+00> : vector<128xf32>
    %10 = vector.multi_reduction <add>, %9, %cst_5 [0] : vector<32x128xf32> to vector<128xf32>
    %11 = vector.shape_cast %10 : vector<128xf32> to vector<1x128xf32>
    %cst_6 = arith.constant 3.125000e-02 : f32
    %12 = vector.broadcast %cst_6 : f32 to vector<1x128xf32>
    %13 = arith.mulf %11, %12 : vector<1x128xf32>
    %cst_7 = arith.constant 9.99999974E-6 : f32
    %14 = vector.broadcast %cst_7 : f32 to vector<1x128xf32>
    %15 = arith.addf %13, %14 : vector<1x128xf32>
    %16 = math.rsqrt %15 : vector<1x128xf32>
    %c0_8 = arith.constant 0 : index
    %c0_9 = arith.constant 0 : index
    %17 = vector.load %arg3[%c0_8, %c0_9] : memref<1x128xf32, #tpu.memory_space<vmem>>, vector<1x128xf32>
    %18 = arith.mulf %16, %17 : vector<1x128xf32>
    %c0_10 = arith.constant 0 : index
    %c0_11 = arith.constant 0 : index
    %19 = vector.load %arg4[%c0_10, %c0_11] : memref<1x128xf32, #tpu.memory_space<vmem>>, vector<1x128xf32>
    %20 = vector.broadcast %18 : vector<1x128xf32> to vector<32x128xf32>
    %21 = arith.mulf %8, %20 : vector<32x128xf32>
    %22 = vector.broadcast %19 : vector<1x128xf32> to vector<32x128xf32>
    %23 = arith.addf %21, %22 : vector<32x128xf32>
    %cst_12 = arith.constant 0.000000e+00 : f32
    %24 = vector.broadcast %cst_12 : f32 to vector<32x128xf32>
    %25 = arith.cmpf oge, %23, %24 : vector<32x128xf32>
    %cst_13 = arith.constant 5.000000e-02 : f32
    %26 = vector.broadcast %cst_13 : f32 to vector<32x128xf32>
    %27 = arith.mulf %26, %23 : vector<32x128xf32>
    %28 = arith.select %25, %23, %27 : vector<32x128xi1>, vector<32x128xf32>
    %c0_14 = arith.constant 0 : index
    %c0_15 = arith.constant 0 : index
    %29 = vector.load %arg5[%c0_14, %c0_15] : memref<32x128xf32, #tpu.memory_space<vmem>>, vector<32x128xf32>
    tpu.vector_store %arg5[%c0_14, %c0_15], %28 {strides = array<i32>} : memref<32x128xf32, #tpu.memory_space<vmem>>, vector<32x128xf32>,
    return
  }
  func.func @transform_0(%arg0: i32) -> (i32, i32) {
    %c0_i32 = arith.constant 0 : i32
    %c0_i32_0 = arith.constant 0 : i32
    %c0_i32_1 = arith.constant 0 : i32
    return %c0_i32, %c0_i32_0 : i32, i32
  }
  func.func @transform_1(%arg0: i32) -> (i32, i32) {
    %c0_i32 = arith.constant 0 : i32
    %c0_i32_0 = arith.constant 0 : i32
    %c0_i32_1 = arith.constant 0 : i32
    return %c0_i32, %c0_i32_0 : i32, i32
  }
  func.func @transform_2(%arg0: i32) -> (i32, i32) {
    %c0_i32 = arith.constant 0 : i32
    %c0_i32_0 = arith.constant 0 : i32
    %c0_i32_1 = arith.constant 0 : i32
    return %c0_i32, %c0_i32_0 : i32, i32
  }
  func.func @transform_3(%arg0: i32) -> (i32, i32) {
    %c0_i32 = arith.constant 0 : i32
    %c0_i32_0 = arith.constant 0 : i32
    %c0_i32_1 = arith.constant 0 : i32
    return %c0_i32, %c0_i32_0 : i32, i32
  }
  func.func @transform_4(%arg0: i32) -> (i32, i32) {
    %c0_i32 = arith.constant 0 : i32
    %c0_i32_0 = arith.constant 0 : i32
    %c0_i32_1 = arith.constant 0 : i32
    return %c0_i32, %c0_i32_0 : i32, i32
  }
}

module attributes {stable_mosaic.version = 11 : i64} {
  func.func @_gemm_bn_leaky_kernel(%arg0: i32, %arg1: memref<32x1152xbf16, #tpu.memory_space<vmem>>, %arg2: memref<1152x128xbf16, #tpu.memory_space<vmem>>, %arg3: memref<1x128xf32, #tpu.memory_space<vmem>>, %arg4: memref<1x128xf32, #tpu.memory_space<vmem>>, %arg5: memref<32x128xf32, #tpu.memory_space<vmem>>) attributes {dimension_semantics = [#tpu.dimension_semantics<arbitrary>], iteration_bounds = array<i64: 1>, scalar_prefetch = 0 : i64, scratch_operands = 0 : i64, tpu.core_type = #tpu.core_type<tc>, window_params = [{pipeline_mode = #tpu.pipeline_mode<synchronous>, transform_indices = @transform_0, window_bounds = array<i64: 32, 1152>}, {pipeline_mode = #tpu.pipeline_mode<synchronous>, transform_indices = @transform_1, window_bounds = array<i64: 1152, 128>}, {pipeline_mode = #tpu.pipeline_mode<synchronous>, transform_indices = @transform_2, window_bounds = array<i64: 1, 128>}, {pipeline_mode = #tpu.pipeline_mode<synchronous>, transform_indices = @transform_3, window_bounds = array<i64: 1, 128>}, {pipeline_mode = #tpu.pipeline_mode<synchronous>, transform_indices = @transform_4, window_bounds = array<i64: 32, 128>}]} {
    %c0 = arith.constant 0 : index
    %c0_0 = arith.constant 0 : index
    %0 = vector.load %arg1[%c0, %c0_0] : memref<32x1152xbf16, #tpu.memory_space<vmem>>, vector<32x1152xbf16>
    %c0_1 = arith.constant 0 : index
    %c0_2 = arith.constant 0 : index
    %1 = vector.load %arg2[%c0_1, %c0_2] : memref<1152x128xbf16, #tpu.memory_space<vmem>>, vector<1152x128xbf16>
    %cst = arith.constant dense<0.000000e+00> : vector<32x128xf32>
    %2 = tpu.matmul %0, %1, %cst {dimension_numbers = #tpu.dot_dimension_numbers<[1], [0], [0], [1], [0, 0, 1, 1], [], []>} : vector<32x1152xbf16>, vector<1152x128xbf16>, vector<32x128xf32> -> vector<32x128xf32>
    %cst_3 = arith.constant dense<0.000000e+00> : vector<128xf32>
    %3 = vector.multi_reduction <add>, %2, %cst_3 [0] : vector<32x128xf32> to vector<128xf32>
    %4 = vector.shape_cast %3 : vector<128xf32> to vector<1x128xf32>
    %cst_4 = arith.constant 3.125000e-02 : f32
    %5 = vector.broadcast %cst_4 : f32 to vector<1x128xf32>
    %6 = arith.mulf %4, %5 : vector<1x128xf32>
    %7 = vector.broadcast %6 : vector<1x128xf32> to vector<32x128xf32>
    %8 = arith.subf %2, %7 : vector<32x128xf32>
    %9 = arith.mulf %8, %8 : vector<32x128xf32>
    %cst_5 = arith.constant dense<0.000000e+00> : vector<128xf32>
    %10 = vector.multi_reduction <add>, %9, %cst_5 [0] : vector<32x128xf32> to vector<128xf32>
    %11 = vector.shape_cast %10 : vector<128xf32> to vector<1x128xf32>
    %cst_6 = arith.constant 3.125000e-02 : f32
    %12 = vector.broadcast %cst_6 : f32 to vector<1x128xf32>
    %13 = arith.mulf %11, %12 : vector<1x128xf32>
    %cst_7 = arith.constant 9.99999974E-6 : f32
    %14 = vector.broadcast %cst_7 : f32 to vector<1x128xf32>
    %15 = arith.addf %13, %14 : vector<1x128xf32>
    %16 = math.rsqrt %15 : vector<1x128xf32>
    %c0_8 = arith.constant 0 : index
    %c0_9 = arith.constant 0 : index
    %17 = vector.load %arg3[%c0_8, %c0_9] : memref<1x128xf32, #tpu.memory_space<vmem>>, vector<1x128xf32>
    %18 = arith.mulf %16, %17 : vector<1x128xf32>
    %c0_10 = arith.constant 0 : index
    %c0_11 = arith.constant 0 : index
    %19 = vector.load %arg4[%c0_10, %c0_11] : memref<1x128xf32, #tpu.memory_space<vmem>>, vector<1x128xf32>
    %20 = vector.broadcast %18 : vector<1x128xf32> to vector<32x128xf32>
    %21 = arith.mulf %8, %20 : vector<32x128xf32>
    %22 = vector.broadcast %19 : vector<1x128xf32> to vector<32x128xf32>
    %23 = arith.addf %21, %22 : vector<32x128xf32>
    %cst_12 = arith.constant 0.000000e+00 : f32
    %24 = vector.broadcast %cst_12 : f32 to vector<32x128xf32>
    %25 = arith.cmpf oge, %23, %24 : vector<32x128xf32>
    %cst_13 = arith.constant 5.000000e-02 : f32
    %26 = vector.broadcast %cst_13 : f32 to vector<32x128xf32>
    %27 = arith.mulf %26, %23 : vector<32x128xf32>
    %28 = arith.select %25, %23, %27 : vector<32x128xi1>, vector<32x128xf32>
    %c0_14 = arith.constant 0 : index
    %c0_15 = arith.constant 0 : index
    %29 = vector.load %arg5[%c0_14, %c0_15] : memref<32x128xf32, #tpu.memory_space<vmem>>, vector<32x128xf32>
    tpu.vector_store %arg5[%c0_14, %c0_15], %28 {strides = array<i32>} : memref<32x128xf32, #tpu.memory_space<vmem>>, vector<32x128xf32>,
    return
  }
  func.func @transform_0(%arg0: i32) -> (i32, i32) {
    %c0_i32 = arith.constant 0 : i32
    %c0_i32_0 = arith.constant 0 : i32
    %c0_i32_1 = arith.constant 0 : i32
    return %c0_i32, %c0_i32_0 : i32, i32
  }
  func.func @transform_1(%arg0: i32) -> (i32, i32) {
    %c0_i32 = arith.constant 0 : i32
    %c0_i32_0 = arith.constant 0 : i32
    %c0_i32_1 = arith.constant 0 : i32
    return %c0_i32, %c0_i32_0 : i32, i32
  }
  func.func @transform_2(%arg0: i32) -> (i32, i32) {
    %c0_i32 = arith.constant 0 : i32
    %c0_i32_0 = arith.constant 0 : i32
    %c0_i32_1 = arith.constant 0 : i32
    return %c0_i32, %c0_i32_0 : i32, i32
  }
  func.func @transform_3(%arg0: i32) -> (i32, i32) {
    %c0_i32 = arith.constant 0 : i32
    %c0_i32_0 = arith.constant 0 : i32
    %c0_i32_1 = arith.constant 0 : i32
    return %c0_i32, %c0_i32_0 : i32, i32
  }
  func.func @transform_4(%arg0: i32) -> (i32, i32) {
    %c0_i32 = arith.constant 0 : i32
    %c0_i32_0 = arith.constant 0 : i32
    %c0_i32_1 = arith.constant 0 : i32
    return %c0_i32, %c0_i32_0 : i32, i32
  }
}

module attributes {stable_mosaic.version = 11 : i64} {
  func.func @_gemm_bn_leaky_kernel(%arg0: i32, %arg1: memref<32x1152xbf16, #tpu.memory_space<vmem>>, %arg2: memref<1152x512xbf16, #tpu.memory_space<vmem>>, %arg3: memref<1x128xf32, #tpu.memory_space<vmem>>, %arg4: memref<1x128xf32, #tpu.memory_space<vmem>>, %arg5: memref<32x512xf32, #tpu.memory_space<vmem>>) attributes {dimension_semantics = [#tpu.dimension_semantics<arbitrary>], iteration_bounds = array<i64: 1>, scalar_prefetch = 0 : i64, scratch_operands = 0 : i64, tpu.core_type = #tpu.core_type<tc>, window_params = [{pipeline_mode = #tpu.pipeline_mode<synchronous>, transform_indices = @transform_0, window_bounds = array<i64: 32, 1152>}, {pipeline_mode = #tpu.pipeline_mode<synchronous>, transform_indices = @transform_1, window_bounds = array<i64: 1152, 512>}, {pipeline_mode = #tpu.pipeline_mode<synchronous>, transform_indices = @transform_2, window_bounds = array<i64: 1, 128>}, {pipeline_mode = #tpu.pipeline_mode<synchronous>, transform_indices = @transform_3, window_bounds = array<i64: 1, 128>}, {pipeline_mode = #tpu.pipeline_mode<synchronous>, transform_indices = @transform_4, window_bounds = array<i64: 32, 512>}]} {
    %c0 = arith.constant 0 : index
    %c0_0 = arith.constant 0 : index
    %0 = vector.load %arg1[%c0, %c0_0] : memref<32x1152xbf16, #tpu.memory_space<vmem>>, vector<32x1152xbf16>
    %c0_1 = arith.constant 0 : index
    %c0_2 = arith.constant 0 : index
    %1 = vector.load %arg2[%c0_1, %c0_2] : memref<1152x512xbf16, #tpu.memory_space<vmem>>, vector<1152x512xbf16>
    %cst = arith.constant dense<0.000000e+00> : vector<32x512xf32>
    %2 = tpu.matmul %0, %1, %cst {dimension_numbers = #tpu.dot_dimension_numbers<[1], [0], [0], [1], [0, 0, 1, 1], [], []>} : vector<32x1152xbf16>, vector<1152x512xbf16>, vector<32x512xf32> -> vector<32x512xf32>
    %cst_3 = arith.constant dense<0.000000e+00> : vector<512xf32>
    %3 = vector.multi_reduction <add>, %2, %cst_3 [0] : vector<32x512xf32> to vector<512xf32>
    %4 = vector.shape_cast %3 : vector<512xf32> to vector<1x512xf32>
    %5 = vector.extract_strided_slice %4 {offsets = [0, 0], sizes = [1, 128], strides = [1, 1]} : vector<1x512xf32> to vector<1x128xf32>
    %6 = vector.extract_strided_slice %4 {offsets = [0, 128], sizes = [1, 128], strides = [1, 1]} : vector<1x512xf32> to vector<1x128xf32>
    %7 = arith.addf %5, %6 : vector<1x128xf32>
    %8 = vector.extract_strided_slice %4 {offsets = [0, 256], sizes = [1, 128], strides = [1, 1]} : vector<1x512xf32> to vector<1x128xf32>
    %9 = arith.addf %7, %8 : vector<1x128xf32>
    %10 = vector.extract_strided_slice %4 {offsets = [0, 384], sizes = [1, 128], strides = [1, 1]} : vector<1x512xf32> to vector<1x128xf32>
    %11 = arith.addf %9, %10 : vector<1x128xf32>
    %cst_4 = arith.constant 7.812500e-03 : f32
    %12 = vector.broadcast %cst_4 : f32 to vector<1x128xf32>
    %13 = arith.mulf %11, %12 : vector<1x128xf32>
    %14 = tpu.concatenate %13, %13, %13, %13 in 1 : vector<1x128xf32>, vector<1x128xf32>, vector<1x128xf32>, vector<1x128xf32> -> vector<1x512xf32>
    %15 = vector.broadcast %14 : vector<1x512xf32> to vector<32x512xf32>
    %16 = arith.subf %2, %15 : vector<32x512xf32>
    %17 = arith.mulf %16, %16 : vector<32x512xf32>
    %cst_5 = arith.constant dense<0.000000e+00> : vector<512xf32>
    %18 = vector.multi_reduction <add>, %17, %cst_5 [0] : vector<32x512xf32> to vector<512xf32>
    %19 = vector.shape_cast %18 : vector<512xf32> to vector<1x512xf32>
    %20 = vector.extract_strided_slice %19 {offsets = [0, 0], sizes = [1, 128], strides = [1, 1]} : vector<1x512xf32> to vector<1x128xf32>
    %21 = vector.extract_strided_slice %19 {offsets = [0, 128], sizes = [1, 128], strides = [1, 1]} : vector<1x512xf32> to vector<1x128xf32>
    %22 = arith.addf %20, %21 : vector<1x128xf32>
    %23 = vector.extract_strided_slice %19 {offsets = [0, 256], sizes = [1, 128], strides = [1, 1]} : vector<1x512xf32> to vector<1x128xf32>
    %24 = arith.addf %22, %23 : vector<1x128xf32>
    %25 = vector.extract_strided_slice %19 {offsets = [0, 384], sizes = [1, 128], strides = [1, 1]} : vector<1x512xf32> to vector<1x128xf32>
    %26 = arith.addf %24, %25 : vector<1x128xf32>
    %cst_6 = arith.constant 7.812500e-03 : f32
    %27 = vector.broadcast %cst_6 : f32 to vector<1x128xf32>
    %28 = arith.mulf %26, %27 : vector<1x128xf32>
    %cst_7 = arith.constant 9.99999974E-6 : f32
    %29 = vector.broadcast %cst_7 : f32 to vector<1x128xf32>
    %30 = arith.addf %28, %29 : vector<1x128xf32>
    %31 = math.rsqrt %30 : vector<1x128xf32>
    %c0_8 = arith.constant 0 : index
    %c0_9 = arith.constant 0 : index
    %32 = vector.load %arg3[%c0_8, %c0_9] : memref<1x128xf32, #tpu.memory_space<vmem>>, vector<1x128xf32>
    %33 = arith.mulf %31, %32 : vector<1x128xf32>
    %34 = tpu.concatenate %33, %33, %33, %33 in 1 : vector<1x128xf32>, vector<1x128xf32>, vector<1x128xf32>, vector<1x128xf32> -> vector<1x512xf32>
    %c0_10 = arith.constant 0 : index
    %c0_11 = arith.constant 0 : index
    %35 = vector.load %arg4[%c0_10, %c0_11] : memref<1x128xf32, #tpu.memory_space<vmem>>, vector<1x128xf32>
    %36 = tpu.concatenate %35, %35, %35, %35 in 1 : vector<1x128xf32>, vector<1x128xf32>, vector<1x128xf32>, vector<1x128xf32> -> vector<1x512xf32>
    %37 = vector.broadcast %34 : vector<1x512xf32> to vector<32x512xf32>
    %38 = arith.mulf %16, %37 : vector<32x512xf32>
    %39 = vector.broadcast %36 : vector<1x512xf32> to vector<32x512xf32>
    %40 = arith.addf %38, %39 : vector<32x512xf32>
    %cst_12 = arith.constant 0.000000e+00 : f32
    %41 = vector.broadcast %cst_12 : f32 to vector<32x512xf32>
    %42 = arith.cmpf oge, %40, %41 : vector<32x512xf32>
    %cst_13 = arith.constant 5.000000e-02 : f32
    %43 = vector.broadcast %cst_13 : f32 to vector<32x512xf32>
    %44 = arith.mulf %43, %40 : vector<32x512xf32>
    %45 = arith.select %42, %40, %44 : vector<32x512xi1>, vector<32x512xf32>
    %c0_14 = arith.constant 0 : index
    %c0_15 = arith.constant 0 : index
    %46 = vector.load %arg5[%c0_14, %c0_15] : memref<32x512xf32, #tpu.memory_space<vmem>>, vector<32x512xf32>
    tpu.vector_store %arg5[%c0_14, %c0_15], %45 {strides = array<i32>} : memref<32x512xf32, #tpu.memory_space<vmem>>, vector<32x512xf32>,
    return
  }
  func.func @transform_0(%arg0: i32) -> (i32, i32) {
    %c0_i32 = arith.constant 0 : i32
    %c0_i32_0 = arith.constant 0 : i32
    %c0_i32_1 = arith.constant 0 : i32
    return %c0_i32, %c0_i32_0 : i32, i32
  }
  func.func @transform_1(%arg0: i32) -> (i32, i32) {
    %c0_i32 = arith.constant 0 : i32
    %c0_i32_0 = arith.constant 0 : i32
    %c0_i32_1 = arith.constant 0 : i32
    return %c0_i32, %c0_i32_0 : i32, i32
  }
  func.func @transform_2(%arg0: i32) -> (i32, i32) {
    %c0_i32 = arith.constant 0 : i32
    %c0_i32_0 = arith.constant 0 : i32
    %c0_i32_1 = arith.constant 0 : i32
    return %c0_i32, %c0_i32_0 : i32, i32
  }
  func.func @transform_3(%arg0: i32) -> (i32, i32) {
    %c0_i32 = arith.constant 0 : i32
    %c0_i32_0 = arith.constant 0 : i32
    %c0_i32_1 = arith.constant 0 : i32
    return %c0_i32, %c0_i32_0 : i32, i32
  }
  func.func @transform_4(%arg0: i32) -> (i32, i32) {
    %c0_i32 = arith.constant 0 : i32
    %c0_i32_0 = arith.constant 0 : i32
    %c0_i32_1 = arith.constant 0 : i32
    return %c0_i32, %c0_i32_0 : i32, i32
  }
}

module attributes {stable_mosaic.version = 11 : i64} {
  func.func @_gemm_bias_tanh_kernel(%arg0: i32, %arg1: memref<128x576xbf16, #tpu.memory_space<vmem>>, %arg2: memref<576x128xbf16, #tpu.memory_space<vmem>>, %arg3: memref<1x128xf32, #tpu.memory_space<vmem>>, %arg4: memref<128x128xf32, #tpu.memory_space<vmem>>) attributes {dimension_semantics = [#tpu.dimension_semantics<arbitrary>], iteration_bounds = array<i64: 1>, scalar_prefetch = 0 : i64, scratch_operands = 0 : i64, tpu.core_type = #tpu.core_type<tc>, window_params = [{pipeline_mode = #tpu.pipeline_mode<synchronous>, transform_indices = @transform_0, window_bounds = array<i64: 128, 576>}, {pipeline_mode = #tpu.pipeline_mode<synchronous>, transform_indices = @transform_1, window_bounds = array<i64: 576, 128>}, {pipeline_mode = #tpu.pipeline_mode<synchronous>, transform_indices = @transform_2, window_bounds = array<i64: 1, 128>}, {pipeline_mode = #tpu.pipeline_mode<synchronous>, transform_indices = @transform_3, window_bounds = array<i64: 128, 128>}]} {
    %c0 = arith.constant 0 : index
    %c0_0 = arith.constant 0 : index
    %0 = vector.load %arg1[%c0, %c0_0] : memref<128x576xbf16, #tpu.memory_space<vmem>>, vector<128x576xbf16>
    %c0_1 = arith.constant 0 : index
    %c0_2 = arith.constant 0 : index
    %1 = vector.load %arg2[%c0_1, %c0_2] : memref<576x128xbf16, #tpu.memory_space<vmem>>, vector<576x128xbf16>
    %cst = arith.constant dense<0.000000e+00> : vector<128x128xf32>
    %2 = tpu.matmul %0, %1, %cst {dimension_numbers = #tpu.dot_dimension_numbers<[1], [0], [0], [1], [0, 0, 1, 1], [], []>} : vector<128x576xbf16>, vector<576x128xbf16>, vector<128x128xf32> -> vector<128x128xf32>
    %c0_3 = arith.constant 0 : index
    %c0_4 = arith.constant 0 : index
    %3 = vector.load %arg3[%c0_3, %c0_4] : memref<1x128xf32, #tpu.memory_space<vmem>>, vector<1x128xf32>
    %4 = vector.broadcast %3 : vector<1x128xf32> to vector<128x128xf32>
    %5 = arith.addf %2, %4 : vector<128x128xf32>
    %6 = math.tanh %5 : vector<128x128xf32>
    %c0_5 = arith.constant 0 : index
    %c0_6 = arith.constant 0 : index
    %7 = vector.load %arg4[%c0_5, %c0_6] : memref<128x128xf32, #tpu.memory_space<vmem>>, vector<128x128xf32>
    tpu.vector_store %arg4[%c0_5, %c0_6], %6 {strides = array<i32>} : memref<128x128xf32, #tpu.memory_space<vmem>>, vector<128x128xf32>,
    return
  }
  func.func @transform_0(%arg0: i32) -> (i32, i32) {
    %c0_i32 = arith.constant 0 : i32
    %c0_i32_0 = arith.constant 0 : i32
    %c0_i32_1 = arith.constant 0 : i32
    return %c0_i32, %c0_i32_0 : i32, i32
  }
  func.func @transform_1(%arg0: i32) -> (i32, i32) {
    %c0_i32 = arith.constant 0 : i32
    %c0_i32_0 = arith.constant 0 : i32
    %c0_i32_1 = arith.constant 0 : i32
    return %c0_i32, %c0_i32_0 : i32, i32
  }
  func.func @transform_2(%arg0: i32) -> (i32, i32) {
    %c0_i32 = arith.constant 0 : i32
    %c0_i32_0 = arith.constant 0 : i32
    %c0_i32_1 = arith.constant 0 : i32
    return %c0_i32, %c0_i32_0 : i32, i32
  }
  func.func @transform_3(%arg0: i32) -> (i32, i32) {
    %c0_i32 = arith.constant 0 : i32
    %c0_i32_0 = arith.constant 0 : i32
    %c0_i32_1 = arith.constant 0 : i32
    return %c0_i32, %c0_i32_0 : i32, i32
  }
}

</mosaic_0001>

<bundles_post_ra>
// kernel: gxy_forward.6
= control target key start
LH: loop header
LB: loop body
LE: loop exit
PB: predicated region body
PF: predicated region fallthrough
CT: control target
= control target key end

     0   :  { %vm82_vm0 = vcmask 130048   ;;  %s586_s1 = inlined_call_operand.vmem [shape: bf16[16,128], index: 1, kind: input, shape index: {}]   ;;  %s587_s0 = inlined_call_operand.vmem [shape: bf16[128,16], index: 0, kind: input, shape index: {}]   ;;  %s588_s3 = inlined_call_operand.vmem [shape: f32[1,128], index: 3, kind: input, shape index: {}]   ;;  %s589_s2 = inlined_call_operand.vmem [shape: f32[1,128], index: 2, kind: input, shape index: {}]   ;;  %s590_s4 = inlined_call_operand.vmem [shape: f32[128,128], index: 4, kind: output, shape index: {}]  }
   0x1   :  { %v402_v0 = vld [vmem:[%s586_s1] sm:$0xff]  ;;  %v396_v2 = vld [vmem:[%s587_s0 + $0x10] sm:$0xff]  ;;  %v395_v5 = vld [vmem:[%s587_s0 + $0x8] sm:$0xff] }
   0x2   :  { %v394_v1 = vld [vmem:[%s587_s0] sm:$0xff]  ;;  %114 = vmatpush.bf16.msra.mxu0 %v402_v0  ;;  %403 = vmatpush.bf16.msra.mxu1 %v402_v0  ;;  %v400_v4 = vld [vmem:[%s587_s0 + $0x30] sm:$0xff]  ;;  %v397_v6 = vld [vmem:[%s587_s0 + $0x18] sm:$0xff] }
   0x3   :  { %v398_v3 = vld [vmem:[%s587_s0 + $0x20] sm:$0xff]  ;;  %404 = vmatpush.bf16.msra.mxu2 %v402_v0  ;;  %405 = vmatpush.bf16.msra.mxu3 %v402_v0  ;;  %v399_v7 = vld [vmem:[%s587_s0 + $0x28] sm:$0xff]  ;;  %v401_v8 = vld [vmem:[%s587_s0 + $0x38] sm:$0xff] }
   0x5   :  { %386 = vmatmul.msk.bf16.vlgmr.msra.gmra.mxu0 %vm82_vm0, %v394_v1  ;;  %388 = vmatmul.msk.bf16.vlgmr.msra.gmra.mxu1 %vm82_vm0, %v396_v2 }
   0x6   :  { %390 = vmatmul.msk.bf16.vlgmr.msra.gmra.mxu2 %vm82_vm0, %v398_v3  ;;  %392 = vmatmul.msk.bf16.vlgmr.msra.gmra.mxu3 %vm82_vm0, %v400_v4 }
  0x15   :  { %387 = vmatmul.msk.bf16.gmra.mxu0 %vm82_vm0, %v395_v5  ;;  %389 = vmatmul.msk.bf16.gmra.mxu1 %vm82_vm0, %v397_v6 }
  0x16   :  { %391 = vmatmul.msk.bf16.gmra.mxu2 %vm82_vm0, %v399_v7  ;;  %393 = vmatmul.msk.bf16.gmra.mxu3 %vm82_vm0, %v401_v8 }
  0x82   :  { %v116_v9 = vpop.f32.mrf.mxu0  ;;  %v126_v10 = vpop.f32.mrf.mxu1 }
  0x89   :  { %v136_v12 = vpop.f32.mrf.mxu2  ;;  %v146_v15 = vpop.f32.mrf.mxu3 }
  0x8a   :  { %v118_v11 = vpop.f32.mrf.mxu0  ;;  %v128_v13 = vpop.f32.mrf.mxu1 }
  0x8b   :  { %v156_v17 = vadd.f32 %v118_v11, %v116_v9 }
  0x91   :  { %v138_v16 = vpop.f32.mrf.mxu2  ;;  %v148_v23 = vpop.f32.mrf.mxu3 }
  0x92   :  { %v121_v14 = vpop.f32.mrf.mxu0  ;;  %v131_v18 = vpop.f32.mrf.mxu1 }
  0x93   :  { %v157_v19 = vadd.f32 %v156_v17, %v121_v14 }
  0x99   :  { %v141_v25 = vpop.f32.mrf.mxu2  ;;  %v151_v31 = vpop.f32.mrf.mxu3 }
  0x9a   :  { %v123_v20 = vpop.f32.mrf.mxu0  ;;  %v133_v27 = vpop.f32.mrf.mxu1 }
  0x9b   :  { %v158_v21 = vadd.f32 %v157_v19, %v123_v20 }
  0x9d   :  { %v159_v22 = vadd.f32 %v158_v21, %v126_v10 }
  0x9f   :  { %v160_v24 = vadd.f32 %v159_v22, %v128_v13 }
  0xa1   :  { %v161_v26 = vadd.f32 %v160_v24, %v131_v18  ;;  %v143_v33 = vpop.f32.mrf.mxu2  ;;  %v153_v38 = vpop.f32.mrf.mxu3 }
  0xa3   :  { %v162_v28 = vadd.f32 %v161_v26, %v133_v27 }
  0xa5   :  { %v163_v29 = vadd.f32 %v162_v28, %v136_v12 }
  0xa7   :  { %v164_v30 = vadd.f32 %v163_v29, %v138_v16 }
  0xa9   :  { %v165_v32 = vadd.f32 %v164_v30, %v141_v25 }
  0xab   :  { %v166_v34 = vadd.f32 %v165_v32, %v143_v33 }
  0xad   :  { %v167_v35 = vadd.f32 %v166_v34, %v146_v15 }
  0xaf   :  { %v168_v36 = vadd.f32 %v167_v35, %v148_v23 }
  0xb1   :  { %v169_v37 = vadd.f32 %v168_v36, %v151_v31 }
  0xb3   :  { %v170_v39 = vadd.f32 %v169_v37, %v153_v38 }
  0xb5   :  { %v171_v40 = vrot.slane %v170_v39, 4 }
  0xb7   :  { %v172_v41 = vadd.f32 %v171_v40, %v170_v39 }
  0xb9   :  { %v173_v42 = vrot.slane %v172_v41, 2 }
  0xbb   :  { %v174_v43 = vadd.f32 %v173_v42, %v172_v41 }
  0xbd   :  { %v175_v44 = vrot.slane %v174_v43, 1 }
  0xbf   :  { %v176_v45 = vadd.f32 %v175_v44, %v174_v43  ;;  %v243_v44 = vld [vmem:[%s589_s2] sm:$0x1] }
  0xc1   :  { %v177_v46 = vmul.f32 0.0078125, %v176_v45 }
  0xc3   :  { %v469_v47 = vsub.f32 %v116_v9, %v177_v46  ;;  %v471_v48 = vsub.f32 %v118_v11, %v177_v46  ;;  %v473_v49 = vsub.f32 %v121_v14, %v177_v46  ;;  %v479_v52 = vsub.f32 %v123_v20, %v177_v46 }
  0xc4   :  { %v481_v53 = vsub.f32 %v126_v10, %v177_v46  ;;  %v485_v56 = vsub.f32 %v128_v13, %v177_v46  ;;  %v489_v59 = vsub.f32 %v131_v18, %v177_v46  ;;  %v493_v62 = vsub.f32 %v133_v27, %v177_v46 }
  0xc5   :  { %v194_v50 = vmul.f32 %v469_v47, %v469_v47  ;;  %v195_v51 = vmul.f32 %v471_v48, %v471_v48  ;;  %v196_v54 = vmul.f32 %v473_v49, %v473_v49  ;;  %v197_v57 = vmul.f32 %v479_v52, %v479_v52 }
  0xc6   :  { %v198_v60 = vmul.f32 %v481_v53, %v481_v53  ;;  %v199_v63 = vmul.f32 %v485_v56, %v485_v56  ;;  %v186_v1 = vsub.f32 %v136_v12, %v177_v46  ;;  %v200_v2 = vmul.f32 %v489_v59, %v489_v59 }
  0xc7   :  { %v210_v55 = vadd.f32 %v195_v51, %v194_v50  ;;  %v187_v4 = vsub.f32 %v138_v16, %v177_v46  ;;  %v201_v5 = vmul.f32 %v493_v62, %v493_v62  ;;  %v188_v7 = vsub.f32 %v141_v25, %v177_v46 }
  0xc8   :  { %v202_v8 = vmul.f32 %v186_v1, %v186_v1  ;;  %v189_v10 = vsub.f32 %v143_v33, %v177_v46  ;;  %v190_v14 = vsub.f32 %v146_v15, %v177_v46  ;;  %v191_v19 = vsub.f32 %v148_v23, %v177_v46 }
  0xc9   :  { %v211_v58 = vadd.f32 %v210_v55, %v196_v54  ;;  %v203_v11 = vmul.f32 %v187_v4, %v187_v4  ;;  %v204_v17 = vmul.f32 %v188_v7, %v188_v7  ;;  %v192_v21 = vsub.f32 %v151_v31, %v177_v46  ;;  %v509_v55 = vld [vmem:[%s588_s3] ss:$0 sm:$0xff] }
  0xca   :  { %v205_v12 = vmul.f32 %v189_v10, %v189_v10  ;;  %v206_v22 = vmul.f32 %v190_v14, %v190_v14  ;;  %v193_v16 = vsub.f32 %v153_v38, %v177_v46  ;;  %v207_v26 = vmul.f32 %v191_v19, %v191_v19 }
  0xcb   :  { %v212_v61 = vadd.f32 %v211_v58, %v197_v57  ;;  %v208_v28 = vmul.f32 %v192_v21, %v192_v21 }
  0xcc   :  { %v209_v25 = vmul.f32 %v193_v16, %v193_v16 }
  0xcd   :  { %v213_v0 = vadd.f32 %v212_v61, %v198_v60 }
  0xcf   :  { %v214_v3 = vadd.f32 %v213_v0, %v199_v63 }
  0xd1   :  { %v215_v6 = vadd.f32 %v214_v3, %v200_v2 }
  0xd3   :  { %v216_v9 = vadd.f32 %v215_v6, %v201_v5 }
  0xd5   :  { %v217_v13 = vadd.f32 %v216_v9, %v202_v8 }
  0xd7   :  { %v218_v18 = vadd.f32 %v217_v13, %v203_v11 }
  0xd9   :  { %v219_v20 = vadd.f32 %v218_v18, %v204_v17 }
  0xdb   :  { %v220_v24 = vadd.f32 %v219_v20, %v205_v12 }
  0xdd   :  { %v221_v27 = vadd.f32 %v220_v24, %v206_v22 }
  0xdf   :  { %v222_v29 = vadd.f32 %v221_v27, %v207_v26 }
  0xe1   :  { %v223_v30 = vadd.f32 %v222_v29, %v208_v28 }
  0xe3   :  { %v224_v32 = vadd.f32 %v223_v30, %v209_v25 }
  0xe5   :  { %v225_v33 = vrot.slane %v224_v32, 4 }
  0xe7   :  { %v226_v34 = vadd.f32 %v225_v33, %v224_v32 }
  0xe9   :  { %v227_v35 = vrot.slane %v226_v34, 2 }
  0xeb   :  { %v228_v15 = vadd.f32 %v227_v35, %v226_v34 }
  0xed   :  { %v229_v36 = vrot.slane %v228_v15, 1 }
  0xef   :  { %v230_v37 = vadd.f32 %v229_v36, %v228_v15 }
  0xf1   :  { %v231_v23 = vmul.f32 0.0078125, %v230_v37 }
  0xf3   :  { %v232_v39 = vadd.f32 1e-05, %v231_v23 }
  0xf5   :  { %407 = vrsqrt.f32 %v232_v39  ;;  %vm239_vm2 = vweird.f32 %v232_v39 }
  0xfb   :  { %v408_v31 = vpop.eup %407 }
  0xfc   :  { %v234_v40 = vmul.f32 %v408_v31, %v232_v39  ;;  %vm240_vm1 = vweird.f32 %v408_v31 }
  0xfd   :  { %vm241_vm3 = vmor %vm239_vm2, %vm240_vm1 }
  0xfe   :  { %v235_v41 = vmul.f32 %v408_v31, %v234_v40 }
 0x100   :  { %v236_v38 = vmul.f32 0.5, %v235_v41 }
 0x102   :  { %v237_v42 = vsub.f32 1.5, %v236_v38 }
 0x104   :  { %v238_v43 = vmul.f32 %v408_v31, %v237_v42 }
 0x106   :  { %v242_v45 = vsel %vm241_vm3, %v408_v31, %v238_v43 }
 0x107   :  { %v244_v46 = vmul.f32 %v243_v44, %v242_v45 }
 0x109   :  { %v246_v50 = vperm.slane %v244_v46, 0 }
 0x10b   :  { %v247_v51 = vmul.f32 %v246_v50, %v469_v47  ;;  %v248_v54 = vmul.f32 %v246_v50, %v471_v48  ;;  %v249_v57 = vmul.f32 %v246_v50, %v473_v49  ;;  %v250_v58 = vmul.f32 %v246_v50, %v479_v52 }
 0x10c   :  { %v251_v60 = vmul.f32 %v246_v50, %v481_v53  ;;  %v252_v61 = vmul.f32 %v246_v50, %v485_v56  ;;  %v253_v63 = vmul.f32 %v246_v50, %v489_v59  ;;  %v254_v0 = vmul.f32 %v246_v50, %v493_v62 }
 0x10d   :  { %v255_v47 = vmul.f32 %v246_v50, %v186_v1  ;;  %v266_v48 = vadd.f32 %v509_v55, %v247_v51  ;;  %v267_v2 = vadd.f32 %v509_v55, %v248_v54  ;;  %v256_v3 = vmul.f32 %v246_v50, %v187_v4 }
 0x10e   :  { %v257_v5 = vmul.f32 %v246_v50, %v188_v7  ;;  %v258_v6 = vmul.f32 %v246_v50, %v189_v10  ;;  %v268_v49 = vadd.f32 %v509_v55, %v249_v57  ;;  %v259_v8 = vmul.f32 %v246_v50, %v190_v14 }
 0x10f   :  { %v260_v52 = vmul.f32 %v246_v50, %v191_v19  ;;  %v269_v53 = vadd.f32 %v509_v55, %v250_v58  ;;  %v270_v56 = vadd.f32 %v509_v55, %v251_v60  ;;  %v261_v9 = vmul.f32 %v246_v50, %v192_v21 }
 0x110   :  { %v262_v59 = vmul.f32 %v246_v50, %v193_v16  ;;  %v271_v62 = vadd.f32 %v509_v55, %v252_v61  ;;  %v272_v1 = vadd.f32 %v509_v55, %v253_v63  ;;  %v273_v11 = vadd.f32 %v509_v55, %v254_v0 }
 0x111   :  { %v274_v4 = vadd.f32 %v509_v55, %v255_v47  ;;  %vm282_vm4 = vcmp.ge.f32.partialorder %v266_v48, 0.0  ;;  %vm283_vm5 = vcmp.ge.f32.partialorder %v267_v2, 0.0  ;;  %v275_v7 = vadd.f32 %v509_v55, %v256_v3 }
 0x112   :  { %v298_v10 = vmul.f32 0.05, %v266_v48  ;;  %v299_v13 = vmul.f32 0.05, %v267_v2  ;;  %v300_v14 = vmul.f32 0.05, %v268_v49  ;;  %v276_v17 = vadd.f32 %v509_v55, %v257_v5 }
 0x113   :  { %vm284_vm6 = vcmp.ge.f32.partialorder %v268_v49, 0.0  ;;  %v301_v18 = vmul.f32 0.05, %v269_v53  ;;  %v302_v19 = vmul.f32 0.05, %v270_v56  ;;  %vm285_vm7 = vcmp.ge.f32.partialorder %v269_v53, 0.0 }
 0x114   :  { %vm286_vm8 = vcmp.ge.f32.partialorder %v270_v56, 0.0  ;;  %v303_v12 = vmul.f32 0.05, %v271_v62  ;;  %v314_v20 = vsel %vm282_vm4, %v266_v48, %v298_v10  ;;  %v277_v21 = vadd.f32 %v509_v55, %v258_v6 }
 0x115   :  { %vm287_vm9 = vcmp.ge.f32.partialorder %v271_v62, 0.0  ;;  %v304_v22 = vmul.f32 0.05, %v272_v1  ;;  %v315_v24 = vsel %vm283_vm5, %v267_v2, %v299_v13  ;;  %330 = vst [vmem:[%s590_s4] sm:$0xff] %v314_v20  ;;  %v278_v16 = vadd.f32 %v509_v55, %v259_v8 }
 0x116   :  { %vm288_vm10 = vcmp.ge.f32.partialorder %v272_v1, 0.0  ;;  %v305_v26 = vmul.f32 0.05, %v273_v11  ;;  %v316_v27 = vsel %vm284_vm6, %v268_v49, %v300_v14  ;;  %vm289_vm11 = vcmp.ge.f32.partialorder %v273_v11, 0.0  ;;  %331 = vst [vmem:[%s590_s4 + $0x8] sm:$0xff] %v315_v24 }
 0x117   :  { %v306_v28 = vmul.f32 0.05, %v274_v4  ;;  %v317_v29 = vsel %vm285_vm7, %v269_v53, %v301_v18  ;;  %v318_v25 = vsel %vm286_vm8, %v270_v56, %v302_v19  ;;  %v279_v30 = vadd.f32 %v509_v55, %v260_v52  ;;  %332 = vst [vmem:[%s590_s4 + $0x10] sm:$0xff] %v316_v27 }
 0x118   :  { %vm290_vm12 = vcmp.ge.f32.partialorder %v274_v4, 0.0  ;;  %v307_v32 = vmul.f32 0.05, %v275_v7  ;;  %v319_v33 = vsel %vm287_vm9, %v271_v62, %v303_v12  ;;  %v280_v34 = vadd.f32 %v509_v55, %v261_v9  ;;  %333 = vst [vmem:[%s590_s4 + $0x18] sm:$0xff] %v317_v29 }
 0x119   :  { %vm291_vm13 = vcmp.ge.f32.partialorder %v275_v7, 0.0  ;;  %v308_v35 = vmul.f32 0.05, %v276_v17  ;;  %v320_v15 = vsel %vm288_vm10, %v272_v1, %v304_v22  ;;  %v281_v36 = vadd.f32 %v509_v55, %v262_v59  ;;  %334 = vst [vmem:[%s590_s4 + $0x20] sm:$0xff] %v318_v25 }
 0x11a   :  { %vm292_vm14 = vcmp.ge.f32.partialorder %v276_v17, 0.0  ;;  %v309_v37 = vmul.f32 0.05, %v277_v21  ;;  %v321_v23 = vsel %vm289_vm11, %v273_v11, %v305_v26  ;;  %vm293_vm15 = vcmp.ge.f32.partialorder %v277_v21, 0.0  ;;  %335 = vst [vmem:[%s590_s4 + $0x28] sm:$0xff] %v319_v33 }
 0x11b   :  { %v310_v39 = vmul.f32 0.05, %v278_v16  ;;  %v322_v31 = vsel %vm290_vm12, %v274_v4, %v306_v28  ;;  %vm294_vm0 = vcmp.ge.f32.partialorder %v278_v16, 0.0  ;;  %v311_v40 = vmul.f32 0.05, %v279_v30  ;;  %336 = vst [vmem:[%s590_s4 + $0x30] sm:$0xff] %v320_v15 }
 0x11c   :  { %v323_v41 = vsel %vm291_vm13, %v275_v7, %v307_v32  ;;  %vm295_vm1 = vcmp.ge.f32.partialorder %v279_v30, 0.0  ;;  %v312_v38 = vmul.f32 0.05, %v280_v34  ;;  %v324_v42 = vsel %vm292_vm14, %v276_v17, %v308_v35  ;;  %337 = vst [vmem:[%s590_s4 + $0x38] sm:$0xff] %v321_v23 }
 0x11d   :  { %vm296_vm2 = vcmp.ge.f32.partialorder %v280_v34, 0.0  ;;  %v313_v43 = vmul.f32 0.05, %v281_v36  ;;  %v325_v44 = vsel %vm293_vm15, %v277_v21, %v309_v37  ;;  %338 = vst [vmem:[%s590_s4 + $0x40] sm:$0xff] %v322_v31  ;;  %vm297_vm3 = vcmp.ge.f32.partialorder %v281_v36, 0.0 }
 0x11e   :  { %v326_v45 = vsel %vm294_vm0, %v278_v16, %v310_v39  ;;  %339 = vst [vmem:[%s590_s4 + $0x48] sm:$0xff] %v323_v41  ;;  %v327_v46 = vsel %vm295_vm1, %v279_v30, %v311_v40  ;;  %v328_v50 = vsel %vm296_vm2, %v280_v34, %v312_v38 }
 0x11f   :  { %340 = vst [vmem:[%s590_s4 + $0x50] sm:$0xff] %v324_v42  ;;  %v329_v51 = vsel %vm297_vm3, %v281_v36, %v313_v43 }
 0x120   :  { %341 = vst [vmem:[%s590_s4 + $0x58] sm:$0xff] %v325_v44 }
 0x121   :  { %342 = vst [vmem:[%s590_s4 + $0x60] sm:$0xff] %v326_v45 }
 0x122   :  { %343 = vst [vmem:[%s590_s4 + $0x68] sm:$0xff] %v327_v46 }
 0x123   :  { %344 = vst [vmem:[%s590_s4 + $0x70] sm:$0xff] %v328_v50 }
 0x124   :  { %345 = vst [vmem:[%s590_s4 + $0x78] sm:$0xff] %v329_v51 }

// kernel: gxy_forward.7
= control target key start
LH: loop header
LB: loop body
LE: loop exit
PB: predicated region body
PF: predicated region fallthrough
CT: control target
= control target key end

     0   :  { %vm368_vm0 = vcmask 523264   ;;  %s994_s1 = inlined_call_operand.vmem [shape: bf16[576,128], index: 1, kind: input, shape index: {}]   ;;  %s995_s0 = inlined_call_operand.vmem [shape: bf16[32,576], index: 0, kind: input, shape index: {}]   ;;  %s996_s3 = inlined_call_operand.vmem [shape: f32[1,128], index: 3, kind: input, shape index: {}]   ;;  %s997_s2 = inlined_call_operand.vmem [shape: f32[1,128], index: 2, kind: input, shape index: {}]   ;;  %s998_s4 = inlined_call_operand.vmem [shape: f32[32,128], index: 4, kind: output, shape index: {}]  }
   0x1   :  { %v747_v0 = vld [vmem:[%s994_s1 + $0x38] sm:$0xff]  ;;  %v746_v4 = vld [vmem:[%s994_s1 + $0x30] sm:$0xff]  ;;  %v745_v8 = vld [vmem:[%s994_s1 + $0x28] sm:$0xff] }
   0x2   :  { %v755_v1 = vld [vmem:[%s994_s1 + $0x78] sm:$0xff]  ;;  %375 = vmatpush.bf16.msra.mxu0 %v747_v0  ;;  %v754_v5 = vld [vmem:[%s994_s1 + $0x70] sm:$0xff]  ;;  %v753_v9 = vld [vmem:[%s994_s1 + $0x68] sm:$0xff] }
   0x3   :  { %v763_v2 = vld [vmem:[%s994_s1 + $0xb8] sm:$0xff]  ;;  %394 = vmatpush.bf16.msra.mxu1 %v755_v1  ;;  %v762_v6 = vld [vmem:[%s994_s1 + $0xb0] sm:$0xff]  ;;  %v761_v10 = vld [vmem:[%s994_s1 + $0xa8] sm:$0xff] }
   0x4   :  { %v771_v3 = vld [vmem:[%s994_s1 + $0xf8] sm:$0xff]  ;;  %413 = vmatpush.bf16.msra.mxu2 %v763_v2  ;;  %v770_v7 = vld [vmem:[%s994_s1 + $0xf0] sm:$0xff]  ;;  %v769_v11 = vld [vmem:[%s994_s1 + $0xe8] sm:$0xff] }
   0x5   :  { %432 = vmatpush.bf16.msra.mxu3 %v771_v3  ;;  %v744_v12 = vld [vmem:[%s994_s1 + $0x20] sm:$0xff]  ;;  %v743_v16 = vld [vmem:[%s994_s1 + $0x18] sm:$0xff]  ;;  %v742_v20 = vld [vmem:[%s994_s1 + $0x10] sm:$0xff] }
   0x6   :  { %376 = vmatpush.bf16.msra.mxu0 %v746_v4  ;;  %v752_v13 = vld [vmem:[%s994_s1 + $0x60] sm:$0xff]  ;;  %v751_v17 = vld [vmem:[%s994_s1 + $0x58] sm:$0xff]  ;;  %v750_v21 = vld [vmem:[%s994_s1 + $0x50] sm:$0xff] }
   0x7   :  { %395 = vmatpush.bf16.msra.mxu1 %v754_v5  ;;  %v760_v14 = vld [vmem:[%s994_s1 + $0xa0] sm:$0xff]  ;;  %v759_v18 = vld [vmem:[%s994_s1 + $0x98] sm:$0xff]  ;;  %v758_v22 = vld [vmem:[%s994_s1 + $0x90] sm:$0xff] }
   0x8   :  { %414 = vmatpush.bf16.msra.mxu2 %v762_v6  ;;  %v768_v15 = vld [vmem:[%s994_s1 + $0xe0] sm:$0xff]  ;;  %v767_v19 = vld [vmem:[%s994_s1 + $0xd8] sm:$0xff]  ;;  %v766_v23 = vld [vmem:[%s994_s1 + $0xd0] sm:$0xff] }
   0x9   :  { %433 = vmatpush.bf16.msra.mxu3 %v770_v7  ;;  %v741_v24 = vld [vmem:[%s994_s1 + $0x8] sm:$0xff]  ;;  %v740_v28 = vld [vmem:[%s994_s1] sm:$0xff]  ;;  %v732_v33 = vld [vmem:[%s995_s0 + $0x10] sm:$0xf0] }
   0xa   :  { %377 = vmatpush.bf16.msra.mxu0 %v745_v8  ;;  %v749_v25 = vld [vmem:[%s994_s1 + $0x48] sm:$0xff]  ;;  %v748_v29 = vld [vmem:[%s994_s1 + $0x40] sm:$0xff]  ;;  %v548_v35 = vld [vmem:[%s995_s0 + $0x14] sm:$0xf0] }
   0xb   :  { %396 = vmatpush.bf16.msra.mxu1 %v753_v9  ;;  %v757_v26 = vld [vmem:[%s994_s1 + $0x88] sm:$0xff]  ;;  %v756_v30 = vld [vmem:[%s994_s1 + $0x80] sm:$0xff]  ;;  %v733_v37 = vld [vmem:[%s995_s0 + $0x18] sm:$0xf0] }
   0xc   :  { %415 = vmatpush.bf16.msra.mxu2 %v761_v10  ;;  %v765_v27 = vld [vmem:[%s994_s1 + $0xc8] sm:$0xff]  ;;  %v764_v31 = vld [vmem:[%s994_s1 + $0xc0] sm:$0xff]  ;;  %v775_v40 = vld [vmem:[%s994_s1 + $0x118] sm:$0xff] }
   0xd   :  { %434 = vmatpush.bf16.msra.mxu3 %v769_v11  ;;  %v546_v32 = vld [vmem:[%s995_s0] sm:$0xf]  ;;  %v730_v34 = vld [vmem:[%s995_s0 + $0x4] sm:$0xf]  ;;  %v554_v36 = vld [vmem:[%s995_s0 + $0x8] sm:$0xf] }
   0xe   :  { %378 = vmatpush.bf16.msra.mxu0 %v744_v12  ;;  %v731_v38 = vld [vmem:[%s995_s0 + $0xc] sm:$0xf]  ;;  %v556_v39 = vld [vmem:[%s995_s0 + $0x1c] sm:$0xf0]  ;;  %v547_v41 = vor.u32 %v732_v33, %v546_v32  ;;  %v551_v42 = vor.u32 %v730_v34, %v548_v35  ;;  %v555_v43 = vor.u32 %v733_v37, %v554_v36  ;;  %v774_v45 = vld [vmem:[%s994_s1 + $0x110] sm:$0xff] }
   0xf   :  { %397 = vmatpush.bf16.msra.mxu1 %v752_v13  ;;  %v559_v44 = vor.u32 %v731_v38, %v556_v39  ;;  %v773_v46 = vld [vmem:[%s994_s1 + $0x108] sm:$0xff]  ;;  %v772_v47 = vld [vmem:[%s994_s1 + $0x100] sm:$0xff]  ;;  %v737_v49 = vld [vmem:[%s995_s0 + $0x38] sm:$0xf0] }
  0x10   :  { %416 = vmatpush.bf16.msra.mxu2 %v760_v14  ;;  %v566_v48 = vld [vmem:[%s995_s0 + $0x28] sm:$0xf]  ;;  %v735_v50 = vld [vmem:[%s995_s0 + $0x2c] sm:$0xf]  ;;  %v568_v51 = vld [vmem:[%s995_s0 + $0x3c] sm:$0xf0] }
  0x11   :  { %435 = vmatpush.bf16.msra.mxu3 %v768_v15  ;;  %v574_v52 = vld [vmem:[%s995_s0 + $0x30] sm:$0xf]  ;;  %v738_v53 = vld [vmem:[%s995_s0 + $0x40] sm:$0xf0]  ;;  %v736_v54 = vld [vmem:[%s995_s0 + $0x34] sm:$0xf]  ;;  %v567_v56 = vor.u32 %v737_v49, %v566_v48  ;;  %v571_v57 = vor.u32 %v735_v50, %v568_v51 }
  0x12   :  { %379 = vmatpush.bf16.msra.mxu0 %v743_v16  ;;  %v576_v55 = vld [vmem:[%s995_s0 + $0x44] sm:$0xf0]  ;;  %v575_v58 = vor.u32 %v738_v53, %v574_v52  ;;  %v562_v60 = vld [vmem:[%s995_s0 + $0x10] sm:$0xf]  ;;  %v734_v61 = vld [vmem:[%s995_s0 + $0x20] sm:$0xf0] }
  0x13   :  { %398 = vmatpush.bf16.msra.mxu1 %v751_v17  ;;  %v579_v59 = vor.u32 %v736_v54, %v576_v55  ;;  %v582_v62 = vld [vmem:[%s995_s0 + $0x38] sm:$0xf]  ;;  %v739_v63 = vld [vmem:[%s995_s0 + $0x48] sm:$0xf0]  ;;  %v563_v0 = vor.u32 %v734_v61, %v562_v60 }
  0x14   :  { %417 = vmatpush.bf16.msra.mxu2 %v759_v18  ;;  %v583_v1 = vor.u32 %v739_v63, %v582_v62 }
  0x15   :  { %436 = vmatpush.bf16.msra.mxu3 %v767_v19 }
  0x16   :  { %380 = vmatpush.bf16.msra.mxu0 %v742_v20 }
  0x17   :  { %399 = vmatpush.bf16.msra.mxu1 %v750_v21 }
  0x18   :  { %418 = vmatpush.bf16.msra.mxu2 %v758_v22 }
  0x19   :  { %437 = vmatpush.bf16.msra.mxu3 %v766_v23 }
  0x1a   :  { %381 = vmatpush.bf16.msra.mxu0 %v741_v24 }
  0x1b   :  { %400 = vmatpush.bf16.msra.mxu1 %v749_v25 }
  0x1c   :  { %419 = vmatpush.bf16.msra.mxu2 %v757_v26 }
  0x1d   :  { %438 = vmatpush.bf16.msra.mxu3 %v765_v27 }
  0x1e   :  { %382 = vmatpush.bf16.msra.mxu0 %v740_v28 }
  0x1f   :  { %401 = vmatpush.bf16.msra.mxu1 %v748_v29 }
  0x20   :  { %420 = vmatpush.bf16.msra.mxu2 %v756_v30 }
  0x21   :  { %439 = vmatpush.bf16.msra.mxu3 %v764_v31  ;;  %383 = vmatmul.bf16.vlgmr.msra.gmra.mxu0 %v547_v41 }
  0x22   :  { %455 = vmatpush.bf16.msrb.mxu0 %v775_v40  ;;  %402 = vmatmul.bf16.vlgmr.msra.gmra.mxu1 %v551_v42 }
  0x23   :  { %776 = vmatpush.bf16.msrb.mxu1 %v775_v40  ;;  %421 = vmatmul.bf16.vlgmr.msra.gmra.mxu2 %v555_v43 }
  0x24   :  { %440 = vmatmul.bf16.vlgmr.msra.gmra.mxu3 %v559_v44 }
  0x26   :  { %456 = vmatpush.bf16.msrb.mxu0 %v774_v45 }
  0x27   :  { %777 = vmatpush.bf16.msrb.mxu1 %v774_v45 }
  0x2a   :  { %457 = vmatpush.bf16.msrb.mxu0 %v773_v46 }
  0x2b   :  { %778 = vmatpush.bf16.msrb.mxu1 %v773_v46 }
  0x2e   :  { %458 = vmatpush.bf16.msrb.mxu0 %v772_v47 }
  0x2f   :  { %779 = vmatpush.bf16.msrb.mxu1 %v772_v47 }
  0x31   :  { %388 = vmatmul.bf16.gmra.mxu0 %v567_v56 }
  0x32   :  { %407 = vmatmul.bf16.gmra.mxu1 %v571_v57 }
  0x33   :  { %426 = vmatmul.bf16.gmra.mxu2 %v575_v58 }
  0x34   :  { %445 = vmatmul.bf16.gmra.mxu3 %v579_v59 }
  0x41   :  { %728 = vmatmul.msk.bf16.vlgmr.msrb.gmra.mxu0 %vm368_vm0, %v563_v0 }
  0x42   :  { %729 = vmatmul.msk.bf16.vlgmr.msrb.gmra.mxu1 %vm368_vm0, %v583_v1 }
  0x9e   :  { %v384_v2 = vpop.f32.mrf.mxu0 }
  0x9f   :  { %v403_v3 = vpop.f32.mrf.mxu1 }
  0xa0   :  { %v404_v18 = vadd.f32 %v403_v3, %v384_v2 }
  0xa6   :  { %v422_v4 = vpop.f32.mrf.mxu2  ;;  %v386_v5 = vpop.f32.mrf.mxu0 }
  0xa7   :  { %v405_v6 = vpop.f32.mrf.mxu1  ;;  %v441_v7 = vpop.f32.mrf.mxu3  ;;  %v423_v20 = vadd.f32 %v422_v4, %v404_v18 }
  0xa8   :  { %v406_v19 = vadd.f32 %v405_v6, %v386_v5 }
  0xa9   :  { %v442_v26 = vadd.f32 %v441_v7, %v423_v20 }
  0xae   :  { %v424_v8 = vpop.f32.mrf.mxu2  ;;  %v389_v9 = vpop.f32.mrf.mxu0 }
  0xaf   :  { %v408_v10 = vpop.f32.mrf.mxu1  ;;  %v443_v11 = vpop.f32.mrf.mxu3  ;;  %v425_v21 = vadd.f32 %v424_v8, %v406_v19 }
  0xb0   :  { %v409_v22 = vadd.f32 %v408_v10, %v389_v9  ;;  %v509_v9 = vld [vmem:[%s997_s2] sm:$0x1] }
  0xb1   :  { %v444_v27 = vadd.f32 %v443_v11, %v425_v21 }
  0xb6   :  { %v391_v12 = vpop.f32.mrf.mxu0  ;;  %v427_v14 = vpop.f32.mrf.mxu2 }
  0xb7   :  { %v410_v13 = vpop.f32.mrf.mxu1  ;;  %v446_v15 = vpop.f32.mrf.mxu3  ;;  %v428_v24 = vadd.f32 %v427_v14, %v409_v22 }
  0xb8   :  { %v411_v25 = vadd.f32 %v410_v13, %v391_v12  ;;  %v780_v13 = vld [vmem:[%s996_s3] ss:$0 sm:$0xff] }
  0xb9   :  { %v447_v31 = vadd.f32 %v446_v15, %v428_v24 }
  0xbe   :  { %v460_v16 = vpop.f32.mrf.mxu0  ;;  %v429_v23 = vpop.f32.mrf.mxu2 }
  0xbf   :  { %v465_v17 = vpop.f32.mrf.mxu1  ;;  %v430_v28 = vadd.f32 %v429_v23, %v411_v25  ;;  %v448_v29 = vpop.f32.mrf.mxu3  ;;  %v461_v32 = vadd.f32 %v460_v16, %v442_v26 }
  0xc0   :  { %v466_v36 = vadd.f32 %v465_v17, %v447_v31 }
  0xc1   :  { %v449_v35 = vadd.f32 %v448_v29, %v430_v28 }
  0xc6   :  { %v462_v30 = vpop.f32.mrf.mxu0 }
  0xc7   :  { %v463_v33 = vadd.f32 %v462_v30, %v444_v27  ;;  %v467_v34 = vpop.f32.mrf.mxu1 }
  0xc8   :  { %v468_v38 = vadd.f32 %v467_v34, %v449_v35 }
  0xc9   :  { %v470_v37 = vadd.f32 %v463_v33, %v461_v32 }
  0xcb   :  { %v471_v39 = vadd.f32 %v470_v37, %v466_v36 }
  0xcd   :  { %v472_v40 = vadd.f32 %v471_v39, %v468_v38 }
  0xcf   :  { %v473_v41 = vrot.slane %v472_v40, 4 }
  0xd1   :  { %v474_v42 = vadd.f32 %v473_v41, %v472_v40 }
  0xd3   :  { %v475_v43 = vrot.slane %v474_v42, 2 }
  0xd5   :  { %v476_v44 = vadd.f32 %v475_v43, %v474_v42 }
  0xd7   :  { %v477_v45 = vrot.slane %v476_v44, 1 }
  0xd9   :  { %v478_v46 = vadd.f32 %v477_v45, %v476_v44 }
  0xdb   :  { %v479_v47 = vmul.f32 0.03125, %v478_v46 }
  0xdd   :  { %v480_v48 = vsub.f32 %v461_v32, %v479_v47  ;;  %v481_v49 = vsub.f32 %v463_v33, %v479_v47  ;;  %v482_v50 = vsub.f32 %v466_v36, %v479_v47  ;;  %v483_v51 = vsub.f32 %v468_v38, %v479_v47 }
  0xdf   :  { %v484_v52 = vmul.f32 %v480_v48, %v480_v48  ;;  %v485_v53 = vmul.f32 %v481_v49, %v481_v49  ;;  %v486_v54 = vmul.f32 %v482_v50, %v482_v50  ;;  %v487_v56 = vmul.f32 %v483_v51, %v483_v51 }
  0xe1   :  { %v488_v55 = vadd.f32 %v485_v53, %v484_v52 }
  0xe3   :  { %v489_v57 = vadd.f32 %v488_v55, %v486_v54 }
  0xe5   :  { %v490_v58 = vadd.f32 %v489_v57, %v487_v56 }
  0xe7   :  { %v491_v59 = vrot.slane %v490_v58, 4 }
  0xe9   :  { %v492_v60 = vadd.f32 %v491_v59, %v490_v58 }
  0xeb   :  { %v493_v61 = vrot.slane %v492_v60, 2 }
  0xed   :  { %v494_v62 = vadd.f32 %v493_v61, %v492_v60 }
  0xef   :  { %v495_v63 = vrot.slane %v494_v62, 1 }
  0xf1   :  { %v496_v0 = vadd.f32 %v495_v63, %v494_v62 }
  0xf3   :  { %v497_v1 = vmul.f32 0.03125, %v496_v0 }
  0xf5   :  { %v498_v2 = vadd.f32 1e-05, %v497_v1 }
  0xf7   :  { %781 = vrsqrt.f32 %v498_v2  ;;  %vm505_vm2 = vweird.f32 %v498_v2 }
  0xfd   :  { %v782_v3 = vpop.eup %781 }
  0xfe   :  { %v500_v4 = vmul.f32 %v782_v3, %v498_v2  ;;  %vm506_vm1 = vweird.f32 %v782_v3 }
  0xff   :  { %vm507_vm3 = vmor %vm505_vm2, %vm506_vm1 }
 0x100   :  { %v501_v5 = vmul.f32 %v782_v3, %v500_v4 }
 0x102   :  { %v502_v6 = vmul.f32 0.5, %v501_v5 }
 0x104   :  { %v503_v7 = vsub.f32 1.5, %v502_v6 }
 0x106   :  { %v504_v8 = vmul.f32 %v782_v3, %v503_v7 }
 0x108   :  { %v508_v10 = vsel %vm507_vm3, %v782_v3, %v504_v8 }
 0x109   :  { %v510_v11 = vmul.f32 %v509_v9, %v508_v10 }
 0x10b   :  { %v512_v12 = vperm.slane %v510_v11, 0 }
 0x10d   :  { %v513_v14 = vmul.f32 %v512_v12, %v480_v48  ;;  %v514_v15 = vmul.f32 %v512_v12, %v481_v49  ;;  %v515_v16 = vmul.f32 %v512_v12, %v482_v50  ;;  %v516_v17 = vmul.f32 %v512_v12, %v483_v51 }
 0x10f   :  { %v520_v18 = vadd.f32 %v780_v13, %v513_v14  ;;  %v521_v19 = vadd.f32 %v780_v13, %v514_v15  ;;  %v522_v20 = vadd.f32 %v780_v13, %v515_v16  ;;  %v523_v21 = vadd.f32 %v780_v13, %v516_v17 }
 0x111   :  { %vm524_vm4 = vcmp.ge.f32.partialorder %v520_v18, 0.0  ;;  %vm525_vm5 = vcmp.ge.f32.partialorder %v521_v19, 0.0  ;;  %vm526_vm6 = vcmp.ge.f32.partialorder %v522_v20, 0.0  ;;  %vm527_vm7 = vcmp.ge.f32.partialorder %v523_v21, 0.0 }
 0x112   :  { %v528_v22 = vmul.f32 0.05, %v520_v18  ;;  %v529_v23 = vmul.f32 0.05, %v521_v19  ;;  %v530_v24 = vmul.f32 0.05, %v522_v20 }
 0x113   :  { %v531_v25 = vmul.f32 0.05, %v523_v21 }
 0x114   :  { %v532_v26 = vsel %vm524_vm4, %v520_v18, %v528_v22  ;;  %v533_v27 = vsel %vm525_vm5, %v521_v19, %v529_v23  ;;  %v534_v28 = vsel %vm526_vm6, %v522_v20, %v530_v24 }
 0x115   :  { %v535_v29 = vsel %vm527_vm7, %v523_v21, %v531_v25  ;;  %536 = vst [vmem:[%s998_s4] sm:$0xff] %v532_v26 }
 0x116   :  { %537 = vst [vmem:[%s998_s4 + $0x8] sm:$0xff] %v533_v27 }
 0x117   :  { %538 = vst [vmem:[%s998_s4 + $0x10] sm:$0xff] %v534_v28 }
 0x118   :  { %539 = vst [vmem:[%s998_s4 + $0x18] sm:$0xff] %v535_v29 }

// kernel: gxy_forward.8
= control target key start
LH: loop header
LB: loop body
LE: loop exit
PB: predicated region body
PF: predicated region fallthrough
CT: control target
= control target key end

     0   :  { %s1778_s1 = inlined_call_operand.vmem [shape: bf16[1152,128], index: 1, kind: input, shape index: {}]   ;;  %s1779_s0 = inlined_call_operand.vmem [shape: bf16[32,1152], index: 0, kind: input, shape index: {}]   ;;  %s1780_s3 = inlined_call_operand.vmem [shape: f32[1,128], index: 3, kind: input, shape index: {}]   ;;  %s1781_s2 = inlined_call_operand.vmem [shape: f32[1,128], index: 2, kind: input, shape index: {}]   ;;  %s1782_s4 = inlined_call_operand.vmem [shape: f32[32,128], index: 4, kind: output, shape index: {}]  }
   0x1   :  { %v1335_v0 = vld [vmem:[%s1778_s1 + $0x38] sm:$0xff]  ;;  %v1334_v4 = vld [vmem:[%s1778_s1 + $0x30] sm:$0xff]  ;;  %v1333_v8 = vld [vmem:[%s1778_s1 + $0x28] sm:$0xff] }
   0x2   :  { %v1343_v1 = vld [vmem:[%s1778_s1 + $0x78] sm:$0xff]  ;;  %705 = vmatpush.bf16.msra.mxu0 %v1335_v0  ;;  %v1342_v5 = vld [vmem:[%s1778_s1 + $0x70] sm:$0xff]  ;;  %v1341_v9 = vld [vmem:[%s1778_s1 + $0x68] sm:$0xff] }
   0x3   :  { %v1351_v2 = vld [vmem:[%s1778_s1 + $0xb8] sm:$0xff]  ;;  %724 = vmatpush.bf16.msra.mxu1 %v1343_v1  ;;  %v1350_v6 = vld [vmem:[%s1778_s1 + $0xb0] sm:$0xff]  ;;  %v1349_v10 = vld [vmem:[%s1778_s1 + $0xa8] sm:$0xff] }
   0x4   :  { %v1359_v3 = vld [vmem:[%s1778_s1 + $0xf8] sm:$0xff]  ;;  %743 = vmatpush.bf16.msra.mxu2 %v1351_v2  ;;  %v1358_v7 = vld [vmem:[%s1778_s1 + $0xf0] sm:$0xff]  ;;  %v1357_v11 = vld [vmem:[%s1778_s1 + $0xe8] sm:$0xff] }
   0x5   :  { %762 = vmatpush.bf16.msra.mxu3 %v1359_v3  ;;  %v1332_v12 = vld [vmem:[%s1778_s1 + $0x20] sm:$0xff]  ;;  %v1331_v16 = vld [vmem:[%s1778_s1 + $0x18] sm:$0xff]  ;;  %v1330_v20 = vld [vmem:[%s1778_s1 + $0x10] sm:$0xff] }
   0x6   :  { %706 = vmatpush.bf16.msra.mxu0 %v1334_v4  ;;  %v1340_v13 = vld [vmem:[%s1778_s1 + $0x60] sm:$0xff]  ;;  %v1339_v17 = vld [vmem:[%s1778_s1 + $0x58] sm:$0xff]  ;;  %v1338_v21 = vld [vmem:[%s1778_s1 + $0x50] sm:$0xff] }
   0x7   :  { %725 = vmatpush.bf16.msra.mxu1 %v1342_v5  ;;  %v1348_v14 = vld [vmem:[%s1778_s1 + $0xa0] sm:$0xff]  ;;  %v1347_v18 = vld [vmem:[%s1778_s1 + $0x98] sm:$0xff]  ;;  %v1346_v22 = vld [vmem:[%s1778_s1 + $0x90] sm:$0xff] }
   0x8   :  { %744 = vmatpush.bf16.msra.mxu2 %v1350_v6  ;;  %v1356_v15 = vld [vmem:[%s1778_s1 + $0xe0] sm:$0xff]  ;;  %v1355_v19 = vld [vmem:[%s1778_s1 + $0xd8] sm:$0xff]  ;;  %v1354_v23 = vld [vmem:[%s1778_s1 + $0xd0] sm:$0xff] }
   0x9   :  { %763 = vmatpush.bf16.msra.mxu3 %v1358_v7  ;;  %v1329_v24 = vld [vmem:[%s1778_s1 + $0x8] sm:$0xff]  ;;  %v1328_v28 = vld [vmem:[%s1778_s1] sm:$0xff]  ;;  %v962_v39 = vld [vmem:[%s1779_s0 + $0x2c] sm:$0xf0] }
   0xa   :  { %707 = vmatpush.bf16.msra.mxu0 %v1333_v8  ;;  %v1337_v25 = vld [vmem:[%s1778_s1 + $0x48] sm:$0xff]  ;;  %v1336_v29 = vld [vmem:[%s1778_s1 + $0x40] sm:$0xff]  ;;  %v1367_v40 = vld [vmem:[%s1778_s1 + $0x138] sm:$0xff] }
   0xb   :  { %726 = vmatpush.bf16.msra.mxu1 %v1341_v9  ;;  %v1345_v26 = vld [vmem:[%s1778_s1 + $0x88] sm:$0xff]  ;;  %v1344_v30 = vld [vmem:[%s1778_s1 + $0x80] sm:$0xff]  ;;  %v1375_v41 = vld [vmem:[%s1778_s1 + $0x178] sm:$0xff] }
   0xc   :  { %745 = vmatpush.bf16.msra.mxu2 %v1349_v10  ;;  %v1353_v27 = vld [vmem:[%s1778_s1 + $0xc8] sm:$0xff]  ;;  %v1352_v31 = vld [vmem:[%s1778_s1 + $0xc0] sm:$0xff]  ;;  %v1383_v46 = vld [vmem:[%s1778_s1 + $0x1b8] sm:$0xff] }
   0xd   :  { %764 = vmatpush.bf16.msra.mxu3 %v1357_v11  ;;  %v952_v32 = vld [vmem:[%s1779_s0] sm:$0xf]  ;;  %v1314_v33 = vld [vmem:[%s1779_s0 + $0x20] sm:$0xf0]  ;;  %v954_v35 = vld [vmem:[%s1779_s0 + $0x24] sm:$0xf0] }
   0xe   :  { %708 = vmatpush.bf16.msra.mxu0 %v1332_v12  ;;  %v1310_v34 = vld [vmem:[%s1779_s0 + $0x4] sm:$0xf]  ;;  %v960_v36 = vld [vmem:[%s1779_s0 + $0x8] sm:$0xf]  ;;  %v1315_v37 = vld [vmem:[%s1779_s0 + $0x28] sm:$0xf0]  ;;  %v953_v42 = vor.u32 %v1314_v33, %v952_v32 }
   0xf   :  { %727 = vmatpush.bf16.msra.mxu1 %v1340_v13  ;;  %v1311_v38 = vld [vmem:[%s1779_s0 + $0xc] sm:$0xf]  ;;  %v957_v43 = vor.u32 %v1310_v34, %v954_v35  ;;  %v961_v44 = vor.u32 %v1315_v37, %v960_v36  ;;  %v1391_v47 = vld [vmem:[%s1778_s1 + $0x1f8] sm:$0xff]  ;;  %v1366_v48 = vld [vmem:[%s1778_s1 + $0x130] sm:$0xff] }
  0x10   :  { %746 = vmatpush.bf16.msra.mxu2 %v1348_v14  ;;  %v965_v45 = vor.u32 %v1311_v38, %v962_v39  ;;  %v1374_v49 = vld [vmem:[%s1778_s1 + $0x170] sm:$0xff]  ;;  %v1365_v52 = vld [vmem:[%s1778_s1 + $0x128] sm:$0xff]  ;;  %v1364_v56 = vld [vmem:[%s1778_s1 + $0x120] sm:$0xff] }
  0x11   :  { %765 = vmatpush.bf16.msra.mxu3 %v1356_v15  ;;  %v1382_v50 = vld [vmem:[%s1778_s1 + $0x1b0] sm:$0xff]  ;;  %v1373_v53 = vld [vmem:[%s1778_s1 + $0x168] sm:$0xff]  ;;  %v1372_v57 = vld [vmem:[%s1778_s1 + $0x160] sm:$0xff] }
  0x12   :  { %709 = vmatpush.bf16.msra.mxu0 %v1331_v16  ;;  %v1390_v51 = vld [vmem:[%s1778_s1 + $0x1f0] sm:$0xff]  ;;  %v1381_v54 = vld [vmem:[%s1778_s1 + $0x1a8] sm:$0xff]  ;;  %v1380_v58 = vld [vmem:[%s1778_s1 + $0x1a0] sm:$0xff] }
  0x13   :  { %728 = vmatpush.bf16.msra.mxu1 %v1339_v17  ;;  %v1389_v55 = vld [vmem:[%s1778_s1 + $0x1e8] sm:$0xff]  ;;  %v1388_v59 = vld [vmem:[%s1778_s1 + $0x1e0] sm:$0xff]  ;;  %v990_v63 = vld [vmem:[%s1779_s0 + $0x6c] sm:$0xf0] }
  0x14   :  { %747 = vmatpush.bf16.msra.mxu2 %v1347_v18  ;;  %v988_v60 = vld [vmem:[%s1779_s0 + $0x48] sm:$0xf]  ;;  %v1323_v61 = vld [vmem:[%s1779_s0 + $0x68] sm:$0xf0]  ;;  %v996_v0 = vld [vmem:[%s1779_s0 + $0x50] sm:$0xf] }
  0x15   :  { %766 = vmatpush.bf16.msra.mxu3 %v1355_v19  ;;  %v1319_v62 = vld [vmem:[%s1779_s0 + $0x4c] sm:$0xf]  ;;  %v1324_v1 = vld [vmem:[%s1779_s0 + $0x70] sm:$0xf0]  ;;  %v998_v3 = vld [vmem:[%s1779_s0 + $0x74] sm:$0xf0]  ;;  %v989_v6 = vor.u32 %v1323_v61, %v988_v60 }
  0x16   :  { %710 = vmatpush.bf16.msra.mxu0 %v1330_v20  ;;  %v1320_v2 = vld [vmem:[%s1779_s0 + $0x54] sm:$0xf]  ;;  %v1363_v4 = vld [vmem:[%s1778_s1 + $0x118] sm:$0xff]  ;;  %v993_v7 = vor.u32 %v1319_v62, %v990_v63  ;;  %v997_v8 = vor.u32 %v1324_v1, %v996_v0  ;;  %v1361_v16 = vld [vmem:[%s1778_s1 + $0x108] sm:$0xff] }
  0x17   :  { %729 = vmatpush.bf16.msra.mxu1 %v1338_v21  ;;  %v1371_v5 = vld [vmem:[%s1778_s1 + $0x158] sm:$0xff]  ;;  %v1001_v9 = vor.u32 %v1320_v2, %v998_v3  ;;  %v1362_v12 = vld [vmem:[%s1778_s1 + $0x110] sm:$0xff]  ;;  %v1369_v17 = vld [vmem:[%s1778_s1 + $0x148] sm:$0xff] }
  0x18   :  { %748 = vmatpush.bf16.msra.mxu2 %v1346_v22  ;;  %v1379_v10 = vld [vmem:[%s1778_s1 + $0x198] sm:$0xff]  ;;  %v1370_v13 = vld [vmem:[%s1778_s1 + $0x150] sm:$0xff]  ;;  %v1377_v18 = vld [vmem:[%s1778_s1 + $0x188] sm:$0xff] }
  0x19   :  { %767 = vmatpush.bf16.msra.mxu3 %v1354_v23  ;;  %v1387_v11 = vld [vmem:[%s1778_s1 + $0x1d8] sm:$0xff]  ;;  %v1378_v14 = vld [vmem:[%s1778_s1 + $0x190] sm:$0xff]  ;;  %v1385_v19 = vld [vmem:[%s1778_s1 + $0x1c8] sm:$0xff] }
  0x1a   :  { %711 = vmatpush.bf16.msra.mxu0 %v1329_v24  ;;  %v1386_v15 = vld [vmem:[%s1778_s1 + $0x1d0] sm:$0xff]  ;;  %v1360_v20 = vld [vmem:[%s1778_s1 + $0x100] sm:$0xff]  ;;  %v1397_v38 = vld [vmem:[%s1778_s1 + $0x228] sm:$0xff] }
  0x1b   :  { %730 = vmatpush.bf16.msra.mxu1 %v1337_v25  ;;  %v1368_v21 = vld [vmem:[%s1778_s1 + $0x140] sm:$0xff]  ;;  %v968_v24 = vld [vmem:[%s1779_s0 + $0x10] sm:$0xf]  ;;  %v1316_v25 = vld [vmem:[%s1779_s0 + $0x30] sm:$0xf0] }
  0x1c   :  { %749 = vmatpush.bf16.msra.mxu2 %v1345_v26  ;;  %v1376_v22 = vld [vmem:[%s1778_s1 + $0x180] sm:$0xff]  ;;  %v1399_v26 = vld [vmem:[%s1778_s1 + $0x238] sm:$0xff]  ;;  %v969_v33 = vor.u32 %v1316_v25, %v968_v24  ;;  %v1398_v37 = vld [vmem:[%s1778_s1 + $0x230] sm:$0xff] }
  0x1d   :  { %768 = vmatpush.bf16.msra.mxu3 %v1353_v27  ;;  %v1384_v23 = vld [vmem:[%s1778_s1 + $0x1c0] sm:$0xff]  ;;  %v1312_v27 = vld [vmem:[%s1779_s0 + $0x14] sm:$0xf] }
  0x1e   :  { %712 = vmatpush.bf16.msra.mxu0 %v1328_v28  ;;  %v970_v28 = vld [vmem:[%s1779_s0 + $0x34] sm:$0xf0]  ;;  %v978_v32 = vld [vmem:[%s1779_s0 + $0x3c] sm:$0xf0] }
  0x1f   :  { %731 = vmatpush.bf16.msra.mxu1 %v1336_v29  ;;  %v976_v29 = vld [vmem:[%s1779_s0 + $0x18] sm:$0xf]  ;;  %v973_v34 = vor.u32 %v1312_v27, %v970_v28  ;;  %v1396_v39 = vld [vmem:[%s1778_s1 + $0x220] sm:$0xff] }
  0x20   :  { %750 = vmatpush.bf16.msra.mxu2 %v1344_v30  ;;  %v1317_v30 = vld [vmem:[%s1779_s0 + $0x38] sm:$0xf0] }
  0x21   :  { %769 = vmatpush.bf16.msra.mxu3 %v1352_v31  ;;  %713 = vmatmul.bf16.vlgmr.msra.gmra.mxu0 %v953_v42  ;;  %v1313_v31 = vld [vmem:[%s1779_s0 + $0x1c] sm:$0xf]  ;;  %v977_v35 = vor.u32 %v1317_v30, %v976_v29 }
  0x22   :  { %781 = vmatpush.bf16.msrb.mxu0 %v1367_v40  ;;  %732 = vmatmul.bf16.vlgmr.msra.gmra.mxu1 %v957_v43  ;;  %v981_v36 = vor.u32 %v1313_v31, %v978_v32  ;;  %v1004_v40 = vld [vmem:[%s1779_s0 + $0x58] sm:$0xf]  ;;  %v1321_v42 = vld [vmem:[%s1779_s0 + $0x5c] sm:$0xf]  ;;  %v1006_v43 = vld [vmem:[%s1779_s0 + $0x7c] sm:$0xf0] }
  0x23   :  { %800 = vmatpush.bf16.msrb.mxu1 %v1375_v41  ;;  %751 = vmatmul.bf16.vlgmr.msra.gmra.mxu2 %v961_v44  ;;  %v1325_v41 = vld [vmem:[%s1779_s0 + $0x78] sm:$0xf0]  ;;  %v1012_v44 = vld [vmem:[%s1779_s0 + $0x60] sm:$0xf] }
  0x24   :  { %770 = vmatmul.bf16.vlgmr.msra.gmra.mxu3 %v965_v45  ;;  %819 = vmatpush.bf16.msrb.mxu2 %v1383_v46  ;;  %v1326_v45 = vld [vmem:[%s1779_s0 + $0x80] sm:$0xf0]  ;;  %v1395_v46 = vld [vmem:[%s1778_s1 + $0x218] sm:$0xff] }
  0x25   :  { %838 = vmatpush.bf16.msrb.mxu3 %v1391_v47  ;;  %v1322_v47 = vld [vmem:[%s1779_s0 + $0x64] sm:$0xf] }
  0x26   :  { %782 = vmatpush.bf16.msrb.mxu0 %v1366_v48  ;;  %v1014_v48 = vld [vmem:[%s1779_s0 + $0x84] sm:$0xf0] }
  0x27   :  { %801 = vmatpush.bf16.msrb.mxu1 %v1374_v49  ;;  %v1005_v49 = vor.u32 %v1325_v41, %v1004_v40 }
  0x28   :  { %820 = vmatpush.bf16.msrb.mxu2 %v1382_v50  ;;  %v1009_v50 = vor.u32 %v1321_v42, %v1006_v43 }
  0x29   :  { %839 = vmatpush.bf16.msrb.mxu3 %v1390_v51  ;;  %v1013_v51 = vor.u32 %v1326_v45, %v1012_v44 }
  0x2a   :  { %783 = vmatpush.bf16.msrb.mxu0 %v1365_v52  ;;  %v1017_v52 = vor.u32 %v1322_v47, %v1014_v48 }
  0x2b   :  { %802 = vmatpush.bf16.msrb.mxu1 %v1373_v53  ;;  %v1394_v53 = vld [vmem:[%s1778_s1 + $0x210] sm:$0xff] }
  0x2c   :  { %821 = vmatpush.bf16.msrb.mxu2 %v1381_v54  ;;  %v1393_v54 = vld [vmem:[%s1778_s1 + $0x208] sm:$0xff] }
  0x2d   :  { %840 = vmatpush.bf16.msrb.mxu3 %v1389_v55  ;;  %v1392_v55 = vld [vmem:[%s1778_s1 + $0x200] sm:$0xff] }
  0x2e   :  { %784 = vmatpush.bf16.msrb.mxu0 %v1364_v56  ;;  %v984_v56 = vld [vmem:[%s1779_s0 + $0x20] sm:$0xf] }
  0x2f   :  { %803 = vmatpush.bf16.msrb.mxu1 %v1372_v57  ;;  %v1318_v57 = vld [vmem:[%s1779_s0 + $0x40] sm:$0xf0] }
  0x30   :  { %822 = vmatpush.bf16.msrb.mxu2 %v1380_v58  ;;  %v1020_v58 = vld [vmem:[%s1779_s0 + $0x68] sm:$0xf]  ;;  %v985_v60 = vor.u32 %v1318_v57, %v984_v56 }
  0x31   :  { %841 = vmatpush.bf16.msrb.mxu3 %v1388_v59  ;;  %718 = vmatmul.bf16.gmra.mxu0 %v989_v6  ;;  %v1327_v59 = vld [vmem:[%s1779_s0 + $0x88] sm:$0xf0] }
  0x32   :  { %785 = vmatpush.bf16.msrb.mxu0 %v1363_v4  ;;  %737 = vmatmul.bf16.gmra.mxu1 %v993_v7  ;;  %v1021_v61 = vor.u32 %v1327_v59, %v1020_v58 }
  0x33   :  { %804 = vmatpush.bf16.msrb.mxu1 %v1371_v5  ;;  %756 = vmatmul.bf16.gmra.mxu2 %v997_v8 }
  0x34   :  { %775 = vmatmul.bf16.gmra.mxu3 %v1001_v9  ;;  %823 = vmatpush.bf16.msrb.mxu2 %v1379_v10 }
  0x35   :  { %842 = vmatpush.bf16.msrb.mxu3 %v1387_v11 }
  0x36   :  { %786 = vmatpush.bf16.msrb.mxu0 %v1362_v12 }
  0x37   :  { %805 = vmatpush.bf16.msrb.mxu1 %v1370_v13 }
  0x38   :  { %824 = vmatpush.bf16.msrb.mxu2 %v1378_v14 }
  0x39   :  { %843 = vmatpush.bf16.msrb.mxu3 %v1386_v15 }
  0x3a   :  { %787 = vmatpush.bf16.msrb.mxu0 %v1361_v16 }
  0x3b   :  { %806 = vmatpush.bf16.msrb.mxu1 %v1369_v17 }
  0x3c   :  { %825 = vmatpush.bf16.msrb.mxu2 %v1377_v18 }
  0x3d   :  { %844 = vmatpush.bf16.msrb.mxu3 %v1385_v19 }
  0x3e   :  { %788 = vmatpush.bf16.msrb.mxu0 %v1360_v20 }
  0x3f   :  { %807 = vmatpush.bf16.msrb.mxu1 %v1368_v21 }
  0x40   :  { %826 = vmatpush.bf16.msrb.mxu2 %v1376_v22 }
  0x41   :  { %845 = vmatpush.bf16.msrb.mxu3 %v1384_v23  ;;  %789 = vmatmul.bf16.vlgmr.msrb.gmra.mxu0 %v969_v33 }
  0x42   :  { %857 = vmatpush.bf16.msra.mxu0 %v1399_v26  ;;  %808 = vmatmul.bf16.vlgmr.msrb.gmra.mxu1 %v973_v34 }
  0x43   :  { %1400 = vmatpush.bf16.msra.mxu1 %v1399_v26  ;;  %827 = vmatmul.bf16.vlgmr.msrb.gmra.mxu2 %v977_v35 }
  0x44   :  { %846 = vmatmul.bf16.vlgmr.msrb.gmra.mxu3 %v981_v36 }
  0x46   :  { %858 = vmatpush.bf16.msra.mxu0 %v1398_v37 }
  0x47   :  { %1401 = vmatpush.bf16.msra.mxu1 %v1398_v37 }
  0x4a   :  { %859 = vmatpush.bf16.msra.mxu0 %v1397_v38 }
  0x4b   :  { %1402 = vmatpush.bf16.msra.mxu1 %v1397_v38 }
  0x4e   :  { %860 = vmatpush.bf16.msra.mxu0 %v1396_v39 }
  0x4f   :  { %1403 = vmatpush.bf16.msra.mxu1 %v1396_v39 }
  0x51   :  { %794 = vmatmul.bf16.gmra.mxu0 %v1005_v49 }
  0x52   :  { %861 = vmatpush.bf16.msra.mxu0 %v1395_v46  ;;  %813 = vmatmul.bf16.gmra.mxu1 %v1009_v50 }
  0x53   :  { %1404 = vmatpush.bf16.msra.mxu1 %v1395_v46  ;;  %832 = vmatmul.bf16.gmra.mxu2 %v1013_v51 }
  0x54   :  { %851 = vmatmul.bf16.gmra.mxu3 %v1017_v52 }
  0x56   :  { %862 = vmatpush.bf16.msra.mxu0 %v1394_v53 }
  0x57   :  { %1405 = vmatpush.bf16.msra.mxu1 %v1394_v53 }
  0x5a   :  { %863 = vmatpush.bf16.msra.mxu0 %v1393_v54 }
  0x5b   :  { %1406 = vmatpush.bf16.msra.mxu1 %v1393_v54 }
  0x5e   :  { %864 = vmatpush.bf16.msra.mxu0 %v1392_v55 }
  0x5f   :  { %1407 = vmatpush.bf16.msra.mxu1 %v1392_v55 }
  0x61   :  { %865 = vmatmul.bf16.vlgmr.msra.gmra.mxu0 %v985_v60 }
  0x62   :  { %870 = vmatmul.bf16.vlgmr.msra.gmra.mxu1 %v1021_v61 }
  0x9e   :  { %v714_v62 = vpop.f32.mrf.mxu0 }
  0x9f   :  { %v733_v63 = vpop.f32.mrf.mxu1 }
  0xa0   :  { %v734_v24 = vadd.f32 %v733_v63, %v714_v62 }
  0xa6   :  { %v752_v0 = vpop.f32.mrf.mxu2  ;;  %v716_v2 = vpop.f32.mrf.mxu0 }
  0xa7   :  { %v771_v1 = vpop.f32.mrf.mxu3  ;;  %v735_v3 = vpop.f32.mrf.mxu1  ;;  %v753_v26 = vadd.f32 %v752_v0, %v734_v24 }
  0xa8   :  { %v736_v25 = vadd.f32 %v735_v3, %v716_v2 }
  0xa9   :  { %v772_v34 = vadd.f32 %v771_v1, %v753_v26 }
  0xae   :  { %v754_v4 = vpop.f32.mrf.mxu2  ;;  %v719_v6 = vpop.f32.mrf.mxu0 }
  0xaf   :  { %v773_v5 = vpop.f32.mrf.mxu3  ;;  %v738_v7 = vpop.f32.mrf.mxu1  ;;  %v755_v27 = vadd.f32 %v754_v4, %v736_v25 }
  0xb0   :  { %v739_v28 = vadd.f32 %v738_v7, %v719_v6 }
  0xb1   :  { %v774_v35 = vadd.f32 %v773_v5, %v755_v27 }
  0xb6   :  { %v757_v8 = vpop.f32.mrf.mxu2  ;;  %v721_v10 = vpop.f32.mrf.mxu0 }
  0xb7   :  { %v776_v9 = vpop.f32.mrf.mxu3  ;;  %v740_v11 = vpop.f32.mrf.mxu1  ;;  %v758_v31 = vadd.f32 %v757_v8, %v739_v28 }
  0xb8   :  { %v741_v32 = vadd.f32 %v740_v11, %v721_v10 }
  0xb9   :  { %v777_v37 = vadd.f32 %v776_v9, %v758_v31 }
  0xbe   :  { %v759_v12 = vpop.f32.mrf.mxu2  ;;  %v790_v14 = vpop.f32.mrf.mxu0 }
  0xbf   :  { %v778_v13 = vpop.f32.mrf.mxu3  ;;  %v809_v15 = vpop.f32.mrf.mxu1  ;;  %v760_v36 = vadd.f32 %v759_v12, %v741_v32  ;;  %v791_v38 = vadd.f32 %v790_v14, %v772_v34 }
  0xc1   :  { %v779_v41 = vadd.f32 %v778_v13, %v760_v36  ;;  %v810_v45 = vadd.f32 %v809_v15, %v791_v38 }
  0xc6   :  { %v828_v16 = vpop.f32.mrf.mxu2  ;;  %v792_v17 = vpop.f32.mrf.mxu0 }
  0xc7   :  { %v811_v18 = vpop.f32.mrf.mxu1  ;;  %v847_v19 = vpop.f32.mrf.mxu3  ;;  %v793_v39 = vadd.f32 %v792_v17, %v774_v35  ;;  %v829_v48 = vadd.f32 %v828_v16, %v810_v45 }
  0xc9   :  { %v812_v46 = vadd.f32 %v811_v18, %v793_v39  ;;  %v848_v54 = vadd.f32 %v847_v19, %v829_v48 }
  0xce   :  { %v830_v20 = vpop.f32.mrf.mxu2  ;;  %v795_v21 = vpop.f32.mrf.mxu0 }
  0xcf   :  { %v814_v22 = vpop.f32.mrf.mxu1  ;;  %v849_v23 = vpop.f32.mrf.mxu3  ;;  %v796_v42 = vadd.f32 %v795_v21, %v777_v37  ;;  %v831_v49 = vadd.f32 %v830_v20, %v812_v46  ;;  %v915_v37 = vld [vmem:[%s1781_s2] sm:$0x1] }
  0xd1   :  { %v815_v50 = vadd.f32 %v814_v22, %v796_v42  ;;  %v850_v55 = vadd.f32 %v849_v23, %v831_v49 }
  0xd6   :  { %v797_v29 = vpop.f32.mrf.mxu0  ;;  %v833_v33 = vpop.f32.mrf.mxu2 }
  0xd7   :  { %v816_v30 = vpop.f32.mrf.mxu1  ;;  %v852_v40 = vpop.f32.mrf.mxu3  ;;  %v798_v47 = vadd.f32 %v797_v29, %v779_v41  ;;  %v834_v52 = vadd.f32 %v833_v33, %v815_v50  ;;  %v1408_v41 = vld [vmem:[%s1780_s3] ss:$0 sm:$0xff] }
  0xd9   :  { %v817_v53 = vadd.f32 %v816_v30, %v798_v47  ;;  %v853_v59 = vadd.f32 %v852_v40, %v834_v52 }
  0xde   :  { %v866_v43 = vpop.f32.mrf.mxu0  ;;  %v835_v51 = vpop.f32.mrf.mxu2 }
  0xdf   :  { %v871_v44 = vpop.f32.mrf.mxu1  ;;  %v836_v56 = vadd.f32 %v835_v51, %v817_v53  ;;  %v854_v57 = vpop.f32.mrf.mxu3  ;;  %v867_v60 = vadd.f32 %v866_v43, %v848_v54 }
  0xe0   :  { %v872_v0 = vadd.f32 %v871_v44, %v853_v59 }
  0xe1   :  { %v855_v63 = vadd.f32 %v854_v57, %v836_v56 }
  0xe6   :  { %v868_v58 = vpop.f32.mrf.mxu0 }
  0xe7   :  { %v869_v61 = vadd.f32 %v868_v58, %v850_v55  ;;  %v873_v62 = vpop.f32.mrf.mxu1 }
  0xe8   :  { %v874_v2 = vadd.f32 %v873_v62, %v855_v63 }
  0xe9   :  { %v876_v1 = vadd.f32 %v869_v61, %v867_v60 }
  0xeb   :  { %v877_v3 = vadd.f32 %v876_v1, %v872_v0 }
  0xed   :  { %v878_v4 = vadd.f32 %v877_v3, %v874_v2 }
  0xef   :  { %v879_v5 = vrot.slane %v878_v4, 4 }
  0xf1   :  { %v880_v6 = vadd.f32 %v879_v5, %v878_v4 }
  0xf3   :  { %v881_v7 = vrot.slane %v880_v6, 2 }
  0xf5   :  { %v882_v8 = vadd.f32 %v881_v7, %v880_v6 }
  0xf7   :  { %v883_v9 = vrot.slane %v882_v8, 1 }
  0xf9   :  { %v884_v10 = vadd.f32 %v883_v9, %v882_v8 }
  0xfb   :  { %v885_v11 = vmul.f32 0.03125, %v884_v10 }
  0xfd   :  { %v886_v12 = vsub.f32 %v867_v60, %v885_v11  ;;  %v887_v13 = vsub.f32 %v869_v61, %v885_v11  ;;  %v888_v14 = vsub.f32 %v872_v0, %v885_v11  ;;  %v889_v15 = vsub.f32 %v874_v2, %v885_v11 }
  0xff   :  { %v890_v16 = vmul.f32 %v886_v12, %v886_v12  ;;  %v891_v17 = vmul.f32 %v887_v13, %v887_v13  ;;  %v892_v18 = vmul.f32 %v888_v14, %v888_v14  ;;  %v893_v20 = vmul.f32 %v889_v15, %v889_v15 }
 0x101   :  { %v894_v19 = vadd.f32 %v891_v17, %v890_v16 }
 0x103   :  { %v895_v21 = vadd.f32 %v894_v19, %v892_v18 }
 0x105   :  { %v896_v22 = vadd.f32 %v895_v21, %v893_v20 }
 0x107   :  { %v897_v23 = vrot.slane %v896_v22, 4 }
 0x109   :  { %v898_v24 = vadd.f32 %v897_v23, %v896_v22 }
 0x10b   :  { %v899_v25 = vrot.slane %v898_v24, 2 }
 0x10d   :  { %v900_v26 = vadd.f32 %v899_v25, %v898_v24 }
 0x10f   :  { %v901_v27 = vrot.slane %v900_v26, 1 }
 0x111   :  { %v902_v28 = vadd.f32 %v901_v27, %v900_v26 }
 0x113   :  { %v903_v29 = vmul.f32 0.03125, %v902_v28 }
 0x115   :  { %v904_v30 = vadd.f32 1e-05, %v903_v29 }
 0x117   :  { %1409 = vrsqrt.f32 %v904_v30  ;;  %vm911_vm1 = vweird.f32 %v904_v30 }
 0x11d   :  { %v1410_v31 = vpop.eup %1409 }
 0x11e   :  { %v906_v32 = vmul.f32 %v1410_v31, %v904_v30  ;;  %vm912_vm0 = vweird.f32 %v1410_v31 }
 0x11f   :  { %vm913_vm2 = vmor %vm911_vm1, %vm912_vm0 }
 0x120   :  { %v907_v33 = vmul.f32 %v1410_v31, %v906_v32 }
 0x122   :  { %v908_v34 = vmul.f32 0.5, %v907_v33 }
 0x124   :  { %v909_v35 = vsub.f32 1.5, %v908_v34 }
 0x126   :  { %v910_v36 = vmul.f32 %v1410_v31, %v909_v35 }
 0x128   :  { %v914_v38 = vsel %vm913_vm2, %v1410_v31, %v910_v36 }
 0x129   :  { %v916_v39 = vmul.f32 %v915_v37, %v914_v38 }
 0x12b   :  { %v918_v40 = vperm.slane %v916_v39, 0 }
 0x12d   :  { %v919_v42 = vmul.f32 %v918_v40, %v886_v12  ;;  %v920_v43 = vmul.f32 %v918_v40, %v887_v13  ;;  %v921_v44 = vmul.f32 %v918_v40, %v888_v14  ;;  %v922_v45 = vmul.f32 %v918_v40, %v889_v15 }
 0x12f   :  { %v926_v46 = vadd.f32 %v1408_v41, %v919_v42  ;;  %v927_v47 = vadd.f32 %v1408_v41, %v920_v43  ;;  %v928_v48 = vadd.f32 %v1408_v41, %v921_v44  ;;  %v929_v49 = vadd.f32 %v1408_v41, %v922_v45 }
 0x131   :  { %vm930_vm3 = vcmp.ge.f32.partialorder %v926_v46, 0.0  ;;  %vm931_vm4 = vcmp.ge.f32.partialorder %v927_v47, 0.0  ;;  %vm932_vm5 = vcmp.ge.f32.partialorder %v928_v48, 0.0  ;;  %vm933_vm6 = vcmp.ge.f32.partialorder %v929_v49, 0.0 }
 0x132   :  { %v934_v50 = vmul.f32 0.05, %v926_v46  ;;  %v935_v51 = vmul.f32 0.05, %v927_v47  ;;  %v936_v52 = vmul.f32 0.05, %v928_v48 }
 0x133   :  { %v937_v53 = vmul.f32 0.05, %v929_v49 }
 0x134   :  { %v938_v54 = vsel %vm930_vm3, %v926_v46, %v934_v50  ;;  %v939_v55 = vsel %vm931_vm4, %v927_v47, %v935_v51  ;;  %v940_v56 = vsel %vm932_vm5, %v928_v48, %v936_v52 }
 0x135   :  { %v941_v57 = vsel %vm933_vm6, %v929_v49, %v937_v53  ;;  %942 = vst [vmem:[%s1782_s4] sm:$0xff] %v938_v54 }
 0x136   :  { %943 = vst [vmem:[%s1782_s4 + $0x8] sm:$0xff] %v939_v55 }
 0x137   :  { %944 = vst [vmem:[%s1782_s4 + $0x10] sm:$0xff] %v940_v56 }
 0x138   :  { %945 = vst [vmem:[%s1782_s4 + $0x18] sm:$0xff] %v941_v57 }

// kernel: gxy_forward.10
= control target key start
LH: loop header
LB: loop body
LE: loop exit
PB: predicated region body
PF: predicated region fallthrough
CT: control target
= control target key end

     0   :  { %s6508_s1 = inlined_call_operand.vmem [shape: bf16[1152,512], index: 1, kind: input, shape index: {}]   ;;  %s6509_s0 = inlined_call_operand.vmem [shape: bf16[32,1152], index: 0, kind: input, shape index: {}]   ;;  %s6510_s3 = inlined_call_operand.vmem [shape: f32[1,128], index: 3, kind: input, shape index: {}]   ;;  %s6511_s2 = inlined_call_operand.vmem [shape: f32[1,128], index: 2, kind: input, shape index: {}]   ;;  %s6512_s4 = inlined_call_operand.vmem [shape: f32[32,512], index: 4, kind: output, shape index: {}]  }
   0x1   :  { %v2956_v0 = vld [vmem:[%s6508_s1 + $0xe0] sm:$0xf]  ;;  %v4042_v1 = vld [vmem:[%s6508_s1 + $0xec] sm:$0xf0] }
   0x2   :  { %v3084_v2 = vld [vmem:[%s6508_s1 + $0x1e0] sm:$0xf]  ;;  %v2957_v3 = vor.u32 %v4042_v1, %v2956_v0  ;;  %v4074_v4 = vld [vmem:[%s6508_s1 + $0x1ec] sm:$0xf0] }
   0x3   :  { %v3212_v5 = vld [vmem:[%s6508_s1 + $0x2e0] sm:$0xf]  ;;  %v4106_v6 = vld [vmem:[%s6508_s1 + $0x2ec] sm:$0xf0]  ;;  %v3085_v7 = vor.u32 %v4074_v4, %v3084_v2 }
   0x4   :  { %v3213_v8 = vor.u32 %v4106_v6, %v3212_v5  ;;  %v3340_v9 = vld [vmem:[%s6508_s1 + $0x3e0] sm:$0xf]  ;;  %v4138_v10 = vld [vmem:[%s6508_s1 + $0x3ec] sm:$0xf0]  ;;  %1857 = vmatpush.bf16.msra.mxu0 %v2957_v3 }
   0x5   :  { %v2940_v11 = vld [vmem:[%s6508_s1 + $0xc0] sm:$0xf]  ;;  %v3341_v12 = vor.u32 %v4138_v10, %v3340_v9  ;;  %v4038_v13 = vld [vmem:[%s6508_s1 + $0xcc] sm:$0xf0]  ;;  %1876 = vmatpush.bf16.msra.mxu1 %v3085_v7 }
   0x6   :  { %v3068_v14 = vld [vmem:[%s6508_s1 + $0x1c0] sm:$0xf]  ;;  %v4070_v15 = vld [vmem:[%s6508_s1 + $0x1cc] sm:$0xf0]  ;;  %1895 = vmatpush.bf16.msra.mxu2 %v3213_v8  ;;  %v2941_v16 = vor.u32 %v4038_v13, %v2940_v11 }
   0x7   :  { %v3069_v17 = vor.u32 %v4070_v15, %v3068_v14  ;;  %v3196_v18 = vld [vmem:[%s6508_s1 + $0x2c0] sm:$0xf]  ;;  %v4102_v19 = vld [vmem:[%s6508_s1 + $0x2cc] sm:$0xf0]  ;;  %1914 = vmatpush.bf16.msra.mxu3 %v3341_v12 }
   0x8   :  { %v3324_v20 = vld [vmem:[%s6508_s1 + $0x3c0] sm:$0xf]  ;;  %v3197_v21 = vor.u32 %v4102_v19, %v3196_v18  ;;  %v4134_v22 = vld [vmem:[%s6508_s1 + $0x3cc] sm:$0xf0]  ;;  %1858 = vmatpush.bf16.msra.mxu0 %v2941_v16 }
   0x9   :  { %v2924_v23 = vld [vmem:[%s6508_s1 + $0xa0] sm:$0xf]  ;;  %v4034_v24 = vld [vmem:[%s6508_s1 + $0xac] sm:$0xf0]  ;;  %v3325_v25 = vor.u32 %v4134_v22, %v3324_v20  ;;  %1877 = vmatpush.bf16.msra.mxu1 %v3069_v17 }
   0xa   :  { %v3052_v26 = vld [vmem:[%s6508_s1 + $0x1a0] sm:$0xf]  ;;  %v4066_v27 = vld [vmem:[%s6508_s1 + $0x1ac] sm:$0xf0]  ;;  %v2925_v29 = vor.u32 %v4034_v24, %v2924_v23  ;;  %1896 = vmatpush.bf16.msra.mxu2 %v3197_v21 }
   0xb   :  { %v3180_v28 = vld [vmem:[%s6508_s1 + $0x2a0] sm:$0xf]  ;;  %v4098_v30 = vld [vmem:[%s6508_s1 + $0x2ac] sm:$0xf0]  ;;  %v3053_v33 = vor.u32 %v4066_v27, %v3052_v26  ;;  %1915 = vmatpush.bf16.msra.mxu3 %v3325_v25 }
   0xc   :  { %v3308_v31 = vld [vmem:[%s6508_s1 + $0x3a0] sm:$0xf]  ;;  %v4130_v32 = vld [vmem:[%s6508_s1 + $0x3ac] sm:$0xf0]  ;;  %v3181_v34 = vor.u32 %v4098_v30, %v3180_v28  ;;  %1859 = vmatpush.bf16.msra.mxu0 %v2925_v29  ;;  %v3998_v29 = vld [vmem:[%s6509_s0 + $0x20] sm:$0xf0] }
   0xd   :  { %v2908_v35 = vld [vmem:[%s6508_s1 + $0x80] sm:$0xf]  ;;  %v4030_v36 = vld [vmem:[%s6508_s1 + $0x8c] sm:$0xf0]  ;;  %v3309_v38 = vor.u32 %v4130_v32, %v3308_v31  ;;  %1878 = vmatpush.bf16.msra.mxu1 %v3053_v33  ;;  %v3994_v30 = vld [vmem:[%s6509_s0 + $0x4] sm:$0xf] }
   0xe   :  { %v3036_v37 = vld [vmem:[%s6508_s1 + $0x180] sm:$0xf]  ;;  %v4062_v39 = vld [vmem:[%s6508_s1 + $0x18c] sm:$0xf0]  ;;  %v2909_v44 = vor.u32 %v4030_v36, %v2908_v35  ;;  %1897 = vmatpush.bf16.msra.mxu2 %v3181_v34  ;;  %v2774_v31 = vld [vmem:[%s6509_s0 + $0x24] sm:$0xf0] }
   0xf   :  { %v3164_v40 = vld [vmem:[%s6508_s1 + $0x280] sm:$0xf]  ;;  %v4094_v41 = vld [vmem:[%s6508_s1 + $0x28c] sm:$0xf0]  ;;  %v3037_v45 = vor.u32 %v4062_v39, %v3036_v37  ;;  %1916 = vmatpush.bf16.msra.mxu3 %v3309_v38  ;;  %v2780_v35 = vld [vmem:[%s6509_s0 + $0x8] sm:$0xf] }
  0x10   :  { %v3292_v42 = vld [vmem:[%s6508_s1 + $0x380] sm:$0xf]  ;;  %v4126_v43 = vld [vmem:[%s6508_s1 + $0x38c] sm:$0xf0]  ;;  %v3165_v46 = vor.u32 %v4094_v41, %v3164_v40  ;;  %1860 = vmatpush.bf16.msra.mxu0 %v2909_v44  ;;  %v3999_v40 = vld [vmem:[%s6509_s0 + $0x28] sm:$0xf0] }
  0x11   :  { %v2892_v47 = vld [vmem:[%s6508_s1 + $0x60] sm:$0xf]  ;;  %v4026_v48 = vld [vmem:[%s6508_s1 + $0x6c] sm:$0xf0]  ;;  %v3293_v50 = vor.u32 %v4126_v43, %v3292_v42  ;;  %1879 = vmatpush.bf16.msra.mxu1 %v3037_v45  ;;  %v3995_v41 = vld [vmem:[%s6509_s0 + $0xc] sm:$0xf] }
  0x12   :  { %v3020_v49 = vld [vmem:[%s6508_s1 + $0x160] sm:$0xf]  ;;  %v4058_v51 = vld [vmem:[%s6508_s1 + $0x16c] sm:$0xf0]  ;;  %v2893_v56 = vor.u32 %v4026_v48, %v2892_v47  ;;  %1898 = vmatpush.bf16.msra.mxu2 %v3165_v46 }
  0x13   :  { %v3148_v52 = vld [vmem:[%s6508_s1 + $0x260] sm:$0xf]  ;;  %v4090_v53 = vld [vmem:[%s6508_s1 + $0x26c] sm:$0xf0]  ;;  %v3021_v57 = vor.u32 %v4058_v51, %v3020_v49  ;;  %1917 = vmatpush.bf16.msra.mxu3 %v3293_v50 }
  0x14   :  { %v3276_v54 = vld [vmem:[%s6508_s1 + $0x360] sm:$0xf]  ;;  %v4122_v55 = vld [vmem:[%s6508_s1 + $0x36c] sm:$0xf0]  ;;  %v3149_v58 = vor.u32 %v4090_v53, %v3148_v52  ;;  %1861 = vmatpush.bf16.msra.mxu0 %v2893_v56  ;;  %v4576_v53 = vor.u32 %v3994_v30, %v2774_v31 }
  0x15   :  { %v2876_v59 = vld [vmem:[%s6508_s1 + $0x40] sm:$0xf]  ;;  %v4022_v60 = vld [vmem:[%s6508_s1 + $0x4c] sm:$0xf0]  ;;  %v3277_v62 = vor.u32 %v4122_v55, %v3276_v54  ;;  %1880 = vmatpush.bf16.msra.mxu1 %v3021_v57  ;;  %v4578_v54 = vor.u32 %v3999_v40, %v2780_v35 }
  0x16   :  { %v3004_v61 = vld [vmem:[%s6508_s1 + $0x140] sm:$0xf]  ;;  %v4054_v63 = vld [vmem:[%s6508_s1 + $0x14c] sm:$0xf0]  ;;  %v2877_v4 = vor.u32 %v4022_v60, %v2876_v59  ;;  %1899 = vmatpush.bf16.msra.mxu2 %v3149_v58 }
  0x17   :  { %v3132_v0 = vld [vmem:[%s6508_s1 + $0x240] sm:$0xf]  ;;  %v4086_v1 = vld [vmem:[%s6508_s1 + $0x24c] sm:$0xf0]  ;;  %v3005_v5 = vor.u32 %v4054_v63, %v3004_v61  ;;  %1918 = vmatpush.bf16.msra.mxu3 %v3277_v62 }
  0x18   :  { %v3260_v2 = vld [vmem:[%s6508_s1 + $0x340] sm:$0xf]  ;;  %v4118_v3 = vld [vmem:[%s6508_s1 + $0x34c] sm:$0xf0]  ;;  %v3133_v6 = vor.u32 %v4086_v1, %v3132_v0  ;;  %1862 = vmatpush.bf16.msra.mxu0 %v2877_v4 }
  0x19   :  { %v2860_v7 = vld [vmem:[%s6508_s1 + $0x20] sm:$0xf]  ;;  %v4018_v8 = vld [vmem:[%s6508_s1 + $0x2c] sm:$0xf0]  ;;  %v3261_v10 = vor.u32 %v4118_v3, %v3260_v2  ;;  %1881 = vmatpush.bf16.msra.mxu1 %v3005_v5 }
  0x1a   :  { %v2988_v9 = vld [vmem:[%s6508_s1 + $0x120] sm:$0xf]  ;;  %v4050_v11 = vld [vmem:[%s6508_s1 + $0x12c] sm:$0xf0]  ;;  %v2861_v17 = vor.u32 %v4018_v8, %v2860_v7  ;;  %1900 = vmatpush.bf16.msra.mxu2 %v3133_v6 }
  0x1b   :  { %v3116_v12 = vld [vmem:[%s6508_s1 + $0x220] sm:$0xf]  ;;  %v4082_v13 = vld [vmem:[%s6508_s1 + $0x22c] sm:$0xf0]  ;;  %v2989_v21 = vor.u32 %v4050_v11, %v2988_v9  ;;  %1919 = vmatpush.bf16.msra.mxu3 %v3261_v10 }
  0x1c   :  { %v3244_v14 = vld [vmem:[%s6508_s1 + $0x320] sm:$0xf]  ;;  %v4114_v15 = vld [vmem:[%s6508_s1 + $0x32c] sm:$0xf0]  ;;  %v3117_v22 = vor.u32 %v4082_v13, %v3116_v12  ;;  %1863 = vmatpush.bf16.msra.mxu0 %v2861_v17 }
  0x1d   :  { %v2844_v16 = vld [vmem:[%s6508_s1] sm:$0xf]  ;;  %v4014_v18 = vld [vmem:[%s6508_s1 + $0xc] sm:$0xf0]  ;;  %v3245_v26 = vor.u32 %v4114_v15, %v3244_v14  ;;  %1882 = vmatpush.bf16.msra.mxu1 %v2989_v21 }
  0x1e   :  { %v2972_v19 = vld [vmem:[%s6508_s1 + $0x100] sm:$0xf]  ;;  %v4046_v20 = vld [vmem:[%s6508_s1 + $0x10c] sm:$0xf0]  ;;  %v2845_v34 = vor.u32 %v4014_v18, %v2844_v16  ;;  %1901 = vmatpush.bf16.msra.mxu2 %v3117_v22 }
  0x1f   :  { %v3100_v23 = vld [vmem:[%s6508_s1 + $0x200] sm:$0xf]  ;;  %v4078_v24 = vld [vmem:[%s6508_s1 + $0x20c] sm:$0xf0]  ;;  %v2973_v38 = vor.u32 %v4046_v20, %v2972_v19  ;;  %1920 = vmatpush.bf16.msra.mxu3 %v3245_v26  ;;  %v4007_v26 = vld [vmem:[%s6509_s0 + $0x68] sm:$0xf0] }
  0x20   :  { %v3228_v25 = vld [vmem:[%s6508_s1 + $0x300] sm:$0xf]  ;;  %v4110_v27 = vld [vmem:[%s6508_s1 + $0x30c] sm:$0xf0]  ;;  %v3101_v39 = vor.u32 %v4078_v24, %v3100_v23  ;;  %1864 = vmatpush.bf16.msra.mxu0 %v2845_v34 }
  0x21   :  { %v2772_v28 = vld [vmem:[%s6509_s0] sm:$0xf]  ;;  %v4234_v33 = vld [vmem:[%s6508_s1 + $0x6ec] sm:$0xf0]  ;;  %v3229_v43 = vor.u32 %v4110_v27, %v3228_v25  ;;  %1883 = vmatpush.bf16.msra.mxu1 %v2973_v38  ;;  %v2808_v25 = vld [vmem:[%s6509_s0 + $0x48] sm:$0xf] }
  0x22   :  { %v3724_v32 = vld [vmem:[%s6508_s1 + $0x6e0] sm:$0xf]  ;;  %v4202_v37 = vld [vmem:[%s6508_s1 + $0x5ec] sm:$0xf0]  ;;  %v4565_v48 = vor.u32 %v3998_v29, %v2772_v28  ;;  %1902 = vmatpush.bf16.msra.mxu2 %v3101_v39  ;;  %v4003_v28 = vld [vmem:[%s6509_s0 + $0x4c] sm:$0xf] }
  0x23   :  { %v3596_v36 = vld [vmem:[%s6508_s1 + $0x5e0] sm:$0xf]  ;;  %v2782_v42 = vld [vmem:[%s6509_s0 + $0x2c] sm:$0xf0]  ;;  %v3725_v44 = vor.u32 %v4234_v33, %v3724_v32  ;;  %1921 = vmatpush.bf16.msra.mxu3 %v3229_v43  ;;  %v2818_v38 = vld [vmem:[%s6509_s0 + $0x74] sm:$0xf0] }
  0x24   :  { %v3468_v45 = vld [vmem:[%s6508_s1 + $0x4e0] sm:$0xf]  ;;  %v4170_v46 = vld [vmem:[%s6508_s1 + $0x4ec] sm:$0xf0]  ;;  %v3597_v49 = vor.u32 %v4202_v37, %v3596_v36  ;;  %v4586_v57 = vor.u32 %v3995_v41, %v2782_v42  ;;  %1865 = vmatmul.bf16.vlgmr.msra.gmra.mxu0 %v4565_v48  ;;  %1884 = vmatmul.bf16.vlgmr.msra.gmra.mxu1 %v4576_v53  ;;  %v4008_v36 = vld [vmem:[%s6509_s0 + $0x70] sm:$0xf0] }
  0x25   :  { %v3852_v47 = vld [vmem:[%s6508_s1 + $0x7e0] sm:$0xf]  ;;  %v4266_v50 = vld [vmem:[%s6508_s1 + $0x7ec] sm:$0xf0]  ;;  %v3469_v58 = vor.u32 %v4170_v46, %v3468_v45  ;;  %1903 = vmatmul.bf16.vlgmr.msra.gmra.mxu2 %v4578_v54  ;;  %v4004_v37 = vld [vmem:[%s6509_s0 + $0x54] sm:$0xf] }
  0x26   :  { %v3708_v51 = vld [vmem:[%s6508_s1 + $0x6c0] sm:$0xf]  ;;  %v4230_v52 = vld [vmem:[%s6508_s1 + $0x6cc] sm:$0xf0]  ;;  %1971 = vmatpush.bf16.msrb.mxu2 %v3725_v44  ;;  %v3853_v59 = vor.u32 %v4266_v50, %v3852_v47  ;;  %1952 = vmatpush.bf16.msrb.mxu1 %v3597_v49  ;;  %v4697_v44 = vor.u32 %v4007_v26, %v2808_v25 }
  0x27   :  { %v3580_v55 = vld [vmem:[%s6508_s1 + $0x5c0] sm:$0xf]  ;;  %v4198_v56 = vld [vmem:[%s6508_s1 + $0x5cc] sm:$0xf0]  ;;  %v3709_v60 = vor.u32 %v4230_v52, %v3708_v51  ;;  %1922 = vmatmul.bf16.vlgmr.msra.gmra.mxu3 %v4586_v57  ;;  %1933 = vmatpush.bf16.msrb.mxu0 %v3469_v58 }
  0x28   :  { %v3452_v61 = vld [vmem:[%s6508_s1 + $0x4c0] sm:$0xf]  ;;  %v4166_v62 = vld [vmem:[%s6508_s1 + $0x4cc] sm:$0xf0]  ;;  %v3581_v0 = vor.u32 %v4198_v56, %v3580_v55  ;;  %1990 = vmatpush.bf16.msrb.mxu3 %v3853_v59  ;;  %v4718_v56 = vor.u32 %v4004_v37, %v2818_v38  ;;  %v4104_v37 = vld [vmem:[%s6508_s1 + $0x2e4] sm:$0xf] }
  0x29   :  { %v3836_v63 = vld [vmem:[%s6508_s1 + $0x7c0] sm:$0xf]  ;;  %v4262_v1 = vld [vmem:[%s6508_s1 + $0x7cc] sm:$0xf0]  ;;  %v3453_v6 = vor.u32 %v4166_v62, %v3452_v61 }
  0x2a   :  { %v3692_v2 = vld [vmem:[%s6508_s1 + $0x6a0] sm:$0xf]  ;;  %v4226_v3 = vld [vmem:[%s6508_s1 + $0x6ac] sm:$0xf0]  ;;  %1972 = vmatpush.bf16.msrb.mxu2 %v3709_v60  ;;  %v3837_v7 = vor.u32 %v4262_v1, %v3836_v63  ;;  %1953 = vmatpush.bf16.msrb.mxu1 %v3581_v0 }
  0x2b   :  { %v3564_v4 = vld [vmem:[%s6508_s1 + $0x5a0] sm:$0xf]  ;;  %v4194_v5 = vld [vmem:[%s6508_s1 + $0x5ac] sm:$0xf0]  ;;  %v3693_v8 = vor.u32 %v4226_v3, %v3692_v2  ;;  %1934 = vmatpush.bf16.msrb.mxu0 %v3453_v6 }
  0x2c   :  { %v3436_v9 = vld [vmem:[%s6508_s1 + $0x4a0] sm:$0xf]  ;;  %v4162_v10 = vld [vmem:[%s6508_s1 + $0x4ac] sm:$0xf0]  ;;  %v3565_v12 = vor.u32 %v4194_v5, %v3564_v4  ;;  %1991 = vmatpush.bf16.msrb.mxu3 %v3837_v7 }
  0x2d   :  { %v3820_v11 = vld [vmem:[%s6508_s1 + $0x7a0] sm:$0xf]  ;;  %v4258_v13 = vld [vmem:[%s6508_s1 + $0x7ac] sm:$0xf0]  ;;  %v3437_v18 = vor.u32 %v4162_v10, %v3436_v9 }
  0x2e   :  { %v3676_v14 = vld [vmem:[%s6508_s1 + $0x680] sm:$0xf]  ;;  %v4222_v15 = vld [vmem:[%s6508_s1 + $0x68c] sm:$0xf0]  ;;  %1973 = vmatpush.bf16.msrb.mxu2 %v3693_v8  ;;  %v3821_v22 = vor.u32 %v4258_v13, %v3820_v11  ;;  %1954 = vmatpush.bf16.msrb.mxu1 %v3565_v12 }
  0x2f   :  { %v3548_v16 = vld [vmem:[%s6508_s1 + $0x580] sm:$0xf]  ;;  %v4190_v17 = vld [vmem:[%s6508_s1 + $0x58c] sm:$0xf0]  ;;  %v3677_v23 = vor.u32 %v4222_v15, %v3676_v14  ;;  %1935 = vmatpush.bf16.msrb.mxu0 %v3437_v18  ;;  %v4072_v18 = vld [vmem:[%s6508_s1 + $0x1e4] sm:$0xf] }
  0x30   :  { %v3420_v19 = vld [vmem:[%s6508_s1 + $0x480] sm:$0xf]  ;;  %v4158_v20 = vld [vmem:[%s6508_s1 + $0x48c] sm:$0xf0]  ;;  %v3549_v27 = vor.u32 %v4190_v17, %v3548_v16  ;;  %1992 = vmatpush.bf16.msrb.mxu3 %v3821_v22  ;;  %v4040_v22 = vld [vmem:[%s6508_s1 + $0xe4] sm:$0xf] }
  0x31   :  { %v3804_v21 = vld [vmem:[%s6508_s1 + $0x780] sm:$0xf]  ;;  %v4254_v24 = vld [vmem:[%s6508_s1 + $0x78c] sm:$0xf0]  ;;  %v3421_v35 = vor.u32 %v4158_v20, %v3420_v19  ;;  %v3086_v19 = vld [vmem:[%s6508_s1 + $0x1f0] sm:$0xf0] }
  0x32   :  { %v2810_v29 = vld [vmem:[%s6509_s0 + $0x6c] sm:$0xf0]  ;;  %v3660_v30 = vld [vmem:[%s6508_s1 + $0x660] sm:$0xf]  ;;  %1974 = vmatpush.bf16.msrb.mxu2 %v3677_v23  ;;  %v3805_v39 = vor.u32 %v4254_v24, %v3804_v21  ;;  %1955 = vmatpush.bf16.msrb.mxu1 %v3549_v27  ;;  %v2958_v23 = vld [vmem:[%s6508_s1 + $0xf0] sm:$0xf0] }
  0x33   :  { %v4218_v31 = vld [vmem:[%s6508_s1 + $0x66c] sm:$0xf0]  ;;  %v3532_v33 = vld [vmem:[%s6508_s1 + $0x560] sm:$0xf]  ;;  %v4708_v50 = vor.u32 %v4003_v28, %v2810_v29  ;;  %1936 = vmatpush.bf16.msrb.mxu0 %v3421_v35  ;;  %v2961_v38 = vor.u32 %v4040_v22, %v2958_v23 }
  0x34   :  { %v2816_v32 = vld [vmem:[%s6509_s0 + $0x50] sm:$0xf]  ;;  %v3661_v40 = vor.u32 %v4218_v31, %v3660_v30  ;;  %v3404_v41 = vld [vmem:[%s6508_s1 + $0x460] sm:$0xf]  ;;  %1993 = vmatpush.bf16.msrb.mxu3 %v3805_v39  ;;  %1870 = vmatmul.bf16.gmra.mxu0 %v4697_v44  ;;  %v4000_v31 = vld [vmem:[%s6509_s0 + $0x30] sm:$0xf0] }
  0x35   :  { %v4186_v34 = vld [vmem:[%s6508_s1 + $0x56c] sm:$0xf0]  ;;  %v3788_v43 = vld [vmem:[%s6508_s1 + $0x760] sm:$0xf]  ;;  %v4710_v51 = vor.u32 %v4008_v36, %v2816_v32  ;;  %1889 = vmatmul.bf16.gmra.mxu1 %v4708_v50  ;;  %v3996_v32 = vld [vmem:[%s6509_s0 + $0x14] sm:$0xf] }
  0x36   :  { %v4154_v42 = vld [vmem:[%s6508_s1 + $0x46c] sm:$0xf0]  ;;  %v3533_v45 = vor.u32 %v4186_v34, %v3532_v33  ;;  %v3644_v47 = vld [vmem:[%s6508_s1 + $0x640] sm:$0xf]  ;;  %1975 = vmatpush.bf16.msrb.mxu2 %v3661_v40  ;;  %v2790_v33 = vld [vmem:[%s6509_s0 + $0x34] sm:$0xf0]  ;;  %v3089_v34 = vor.u32 %v4072_v18, %v3086_v19 }
  0x37   :  { %v4250_v46 = vld [vmem:[%s6508_s1 + $0x76c] sm:$0xf0]  ;;  %v3516_v52 = vld [vmem:[%s6508_s1 + $0x540] sm:$0xf]  ;;  %v3405_v58 = vor.u32 %v4154_v42, %v3404_v41  ;;  %1908 = vmatmul.bf16.gmra.mxu2 %v4710_v51  ;;  %1927 = vmatmul.bf16.gmra.mxu3 %v4718_v56  ;;  %v3214_v39 = vld [vmem:[%s6508_s1 + $0x2f0] sm:$0xf0] }
  0x38   :  { %v4214_v49 = vld [vmem:[%s6508_s1 + $0x64c] sm:$0xf0]  ;;  %v3789_v59 = vor.u32 %v4250_v46, %v3788_v43  ;;  %v3388_v61 = vld [vmem:[%s6508_s1 + $0x440] sm:$0xf]  ;;  %1956 = vmatpush.bf16.msrb.mxu1 %v3533_v45  ;;  %v4068_v40 = vld [vmem:[%s6508_s1 + $0x1c4] sm:$0xf] }
  0x39   :  { %v4182_v55 = vld [vmem:[%s6508_s1 + $0x54c] sm:$0xf0]  ;;  %v3645_v60 = vor.u32 %v4214_v49, %v3644_v47  ;;  %v3772_v63 = vld [vmem:[%s6508_s1 + $0x740] sm:$0xf]  ;;  %1937 = vmatpush.bf16.msrb.mxu0 %v3405_v58  ;;  %v3070_v41 = vld [vmem:[%s6508_s1 + $0x1d0] sm:$0xf0] }
  0x3a   :  { %v4150_v62 = vld [vmem:[%s6508_s1 + $0x44c] sm:$0xf0]  ;;  %v3517_v0 = vor.u32 %v4182_v55, %v3516_v52  ;;  %v3628_v2 = vld [vmem:[%s6508_s1 + $0x620] sm:$0xf]  ;;  %1994 = vmatpush.bf16.msrb.mxu3 %v3789_v59  ;;  %v2796_v43 = vld [vmem:[%s6509_s0 + $0x18] sm:$0xf]  ;;  %v3217_v59 = vor.u32 %v4104_v37, %v3214_v39 }
  0x3b   :  { %v4246_v1 = vld [vmem:[%s6508_s1 + $0x74c] sm:$0xf0]  ;;  %v3500_v4 = vld [vmem:[%s6508_s1 + $0x520] sm:$0xf]  ;;  %v3389_v6 = vor.u32 %v4150_v62, %v3388_v61  ;;  %1976 = vmatpush.bf16.msrb.mxu2 %v3645_v60  ;;  %v4001_v45 = vld [vmem:[%s6509_s0 + $0x38] sm:$0xf0]  ;;  %v3073_v60 = vor.u32 %v4068_v40, %v3070_v41 }
  0x3c   :  { %v4210_v3 = vld [vmem:[%s6508_s1 + $0x62c] sm:$0xf0]  ;;  %v3372_v7 = vld [vmem:[%s6508_s1 + $0x420] sm:$0xf]  ;;  %v3773_v8 = vor.u32 %v4246_v1, %v3772_v63  ;;  %1957 = vmatpush.bf16.msrb.mxu1 %v3517_v0  ;;  %v3997_v46 = vld [vmem:[%s6509_s0 + $0x1c] sm:$0xf]  ;;  %v4855_v1 = vor.u32 %v3996_v32, %v2790_v33 }
  0x3d   :  { %v4178_v5 = vld [vmem:[%s6508_s1 + $0x52c] sm:$0xf0]  ;;  %v3629_v9 = vor.u32 %v4210_v3, %v3628_v2  ;;  %v3756_v11 = vld [vmem:[%s6508_s1 + $0x720] sm:$0xf]  ;;  %1938 = vmatpush.bf16.msrb.mxu0 %v3389_v6  ;;  %v4036_v61 = vld [vmem:[%s6508_s1 + $0xc4] sm:$0xf] }
  0x3e   :  { %v4146_v10 = vld [vmem:[%s6508_s1 + $0x42c] sm:$0xf0]  ;;  %v3501_v13 = vor.u32 %v4178_v5, %v3500_v4  ;;  %v3612_v14 = vld [vmem:[%s6508_s1 + $0x600] sm:$0xf]  ;;  %1995 = vmatpush.bf16.msrb.mxu3 %v3773_v8  ;;  %v2942_v62 = vld [vmem:[%s6508_s1 + $0xd0] sm:$0xf0]  ;;  %v4866_v5 = vor.u32 %v4001_v45, %v2796_v43 }
  0x3f   :  { %v4242_v12 = vld [vmem:[%s6508_s1 + $0x72c] sm:$0xf0]  ;;  %v3484_v16 = vld [vmem:[%s6508_s1 + $0x500] sm:$0xf]  ;;  %v3373_v20 = vor.u32 %v4146_v10, %v3372_v7  ;;  %1977 = vmatpush.bf16.msrb.mxu2 %v3629_v9  ;;  %v4100_v63 = vld [vmem:[%s6508_s1 + $0x2c4] sm:$0xf]  ;;  %v2945_v8 = vor.u32 %v4036_v61, %v2942_v62 }
  0x40   :  { %v4206_v15 = vld [vmem:[%s6508_s1 + $0x60c] sm:$0xf0]  ;;  %v3356_v21 = vld [vmem:[%s6508_s1 + $0x400] sm:$0xf]  ;;  %v3757_v24 = vor.u32 %v4242_v12, %v3756_v11  ;;  %1958 = vmatpush.bf16.msrb.mxu1 %v3501_v13  ;;  %v3198_v2 = vld [vmem:[%s6508_s1 + $0x2d0] sm:$0xf0] }
  0x41   :  { %v4174_v17 = vld [vmem:[%s6508_s1 + $0x50c] sm:$0xf0]  ;;  %v3613_v25 = vor.u32 %v4206_v15, %v3612_v14  ;;  %v3740_v27 = vld [vmem:[%s6508_s1 + $0x700] sm:$0xf]  ;;  %1939 = vmatpush.bf16.msrb.mxu0 %v3373_v20  ;;  %v4064_v3 = vld [vmem:[%s6508_s1 + $0x1a4] sm:$0xf]  ;;  %v3201_v11 = vor.u32 %v4100_v63, %v3198_v2 }
  0x42   :  { %v4142_v26 = vld [vmem:[%s6508_s1 + $0x40c] sm:$0xf0]  ;;  %v3485_v29 = vor.u32 %v4174_v17, %v3484_v16  ;;  %v3980_v35 = vld [vmem:[%s6508_s1 + $0x8e0] sm:$0xf]  ;;  %1996 = vmatpush.bf16.msrb.mxu3 %v3757_v24  ;;  %v3054_v4 = vld [vmem:[%s6508_s1 + $0x1b0] sm:$0xf0] }
  0x43   :  { %v4238_v28 = vld [vmem:[%s6508_s1 + $0x70c] sm:$0xf0]  ;;  %v3357_v42 = vor.u32 %v4142_v26, %v3356_v21  ;;  %1978 = vmatpush.bf16.msrb.mxu2 %v3613_v25  ;;  %v2798_v49 = vld [vmem:[%s6509_s0 + $0x3c] sm:$0xf0]  ;;  %v3057_v12 = vor.u32 %v4064_v3, %v3054_v4  ;;  %v4032_v13 = vld [vmem:[%s6508_s1 + $0xa4] sm:$0xf] }
  0x44   :  { %v2788_v30 = vld [vmem:[%s6509_s0 + $0x10] sm:$0xf]  ;;  %v3741_v47 = vor.u32 %v4238_v28, %v3740_v27  ;;  %v3964_v55 = vld [vmem:[%s6508_s1 + $0x8c0] sm:$0xf]  ;;  %1959 = vmatpush.bf16.msrb.mxu1 %v3485_v29  ;;  %v4868_v6 = vor.u32 %v3997_v46, %v2798_v49  ;;  %v2926_v14 = vld [vmem:[%s6508_s1 + $0xb0] sm:$0xf0] }
  0x45   :  { %v4298_v36 = vld [vmem:[%s6508_s1 + $0x8ec] sm:$0xf0]  ;;  %v4853_v0 = vor.u32 %v4000_v31, %v2788_v30  ;;  %1940 = vmatpush.bf16.msrb.mxu0 %v3357_v42  ;;  %v3948_v9 = vld [vmem:[%s6508_s1 + $0x8a0] sm:$0xf]  ;;  %v4096_v15 = vld [vmem:[%s6508_s1 + $0x2a4] sm:$0xf]  ;;  %v2929_v20 = vor.u32 %v4032_v13, %v2926_v14 }
  0x46   :  { %v3981_v52 = vor.u32 %v4298_v36, %v3980_v35  ;;  %v4294_v58 = vld [vmem:[%s6508_s1 + $0x8cc] sm:$0xf0]  ;;  %1997 = vmatpush.bf16.msrb.mxu3 %v3741_v47  ;;  %v3182_v16 = vld [vmem:[%s6508_s1 + $0x2b0] sm:$0xf0]  ;;  %v4060_v17 = vld [vmem:[%s6508_s1 + $0x184] sm:$0xf] }
  0x47   :  { %2047 = vmatpush.bf16.msra.mxu2 %v3089_v34  ;;  %v3965_v7 = vor.u32 %v4294_v58, %v3964_v55  ;;  %v4290_v10 = vld [vmem:[%s6508_s1 + $0x8ac] sm:$0xf0]  ;;  %1960 = vmatmul.bf16.vlgmr.msrb.gmra.mxu1 %v4855_v1  ;;  %v3038_v18 = vld [vmem:[%s6508_s1 + $0x190] sm:$0xf0]  ;;  %v3932_v21 = vld [vmem:[%s6508_s1 + $0x880] sm:$0xf]  ;;  %v3185_v23 = vor.u32 %v4096_v15, %v3182_v16 }
  0x48   :  { %2028 = vmatpush.bf16.msra.mxu1 %v2961_v38  ;;  %1941 = vmatmul.bf16.vlgmr.msrb.gmra.mxu0 %v4853_v0  ;;  %v3949_v19 = vor.u32 %v4290_v10, %v3948_v9  ;;  %v4286_v22 = vld [vmem:[%s6508_s1 + $0x88c] sm:$0xf0]  ;;  %v3041_v24 = vor.u32 %v4060_v17, %v3038_v18  ;;  %v4028_v25 = vld [vmem:[%s6508_s1 + $0x84] sm:$0xf]  ;;  %v2910_v26 = vld [vmem:[%s6508_s1 + $0x90] sm:$0xf0] }
  0x49   :  { %2009 = vmatpush.bf16.msra.mxu0 %v3981_v52  ;;  %1979 = vmatmul.bf16.vlgmr.msrb.gmra.mxu2 %v4866_v5  ;;  %v4092_v27 = vld [vmem:[%s6508_s1 + $0x284] sm:$0xf]  ;;  %v3166_v28 = vld [vmem:[%s6508_s1 + $0x290] sm:$0xf0]  ;;  %v3933_v31 = vor.u32 %v4286_v22, %v3932_v21  ;;  %v2913_v32 = vor.u32 %v4028_v25, %v2910_v26  ;;  %v3916_v33 = vld [vmem:[%s6508_s1 + $0x860] sm:$0xf] }
  0x4a   :  { %2066 = vmatpush.bf16.msra.mxu3 %v3217_v59  ;;  %v4056_v29 = vld [vmem:[%s6508_s1 + $0x164] sm:$0xf]  ;;  %v3022_v30 = vld [vmem:[%s6508_s1 + $0x170] sm:$0xf0]  ;;  %v4282_v34 = vld [vmem:[%s6508_s1 + $0x86c] sm:$0xf0]  ;;  %v3169_v35 = vor.u32 %v4092_v27, %v3166_v28 }
  0x4b   :  { %2048 = vmatpush.bf16.msra.mxu2 %v3073_v60  ;;  %1998 = vmatmul.bf16.vlgmr.msrb.gmra.mxu3 %v4868_v6  ;;  %v2824_v36 = vld [vmem:[%s6509_s0 + $0x58] sm:$0xf]  ;;  %v4009_v37 = vld [vmem:[%s6509_s0 + $0x78] sm:$0xf0]  ;;  %v2826_v39 = vld [vmem:[%s6509_s0 + $0x7c] sm:$0xf0]  ;;  %v3025_v40 = vor.u32 %v4056_v29, %v3022_v30  ;;  %v3917_v59 = vor.u32 %v4282_v34, %v3916_v33 }
  0x4c   :  { %2029 = vmatpush.bf16.msra.mxu1 %v2945_v8  ;;  %v4005_v38 = vld [vmem:[%s6509_s0 + $0x5c] sm:$0xf]  ;;  %v4024_v41 = vld [vmem:[%s6508_s1 + $0x64] sm:$0xf]  ;;  %v2894_v42 = vld [vmem:[%s6508_s1 + $0x70] sm:$0xf0]  ;;  %v4985_v8 = vor.u32 %v4009_v37, %v2824_v36 }
  0x4d   :  { %2010 = vmatpush.bf16.msra.mxu0 %v3965_v7  ;;  %v4088_v43 = vld [vmem:[%s6508_s1 + $0x264] sm:$0xf]  ;;  %v3150_v45 = vld [vmem:[%s6508_s1 + $0x270] sm:$0xf0]  ;;  %v2832_v49 = vld [vmem:[%s6509_s0 + $0x60] sm:$0xf]  ;;  %v2897_v60 = vor.u32 %v4024_v41, %v2894_v42  ;;  %v4987_v9 = vor.u32 %v4005_v38, %v2826_v39 }
  0x4e   :  { %2067 = vmatpush.bf16.msra.mxu3 %v3201_v11  ;;  %v4052_v46 = vld [vmem:[%s6508_s1 + $0x144] sm:$0xf]  ;;  %v3006_v47 = vld [vmem:[%s6508_s1 + $0x150] sm:$0xf0]  ;;  %v2834_v58 = vld [vmem:[%s6509_s0 + $0x84] sm:$0xf0]  ;;  %v3153_v63 = vor.u32 %v4088_v43, %v3150_v45 }
  0x4f   :  { %2049 = vmatpush.bf16.msra.mxu2 %v3057_v12  ;;  %v4010_v52 = vld [vmem:[%s6509_s0 + $0x80] sm:$0xf0]  ;;  %v3900_v61 = vld [vmem:[%s6508_s1 + $0x840] sm:$0xf]  ;;  %v4278_v62 = vld [vmem:[%s6508_s1 + $0x84c] sm:$0xf0]  ;;  %v3009_v2 = vor.u32 %v4052_v46, %v3006_v47 }
  0x50   :  { %2030 = vmatpush.bf16.msra.mxu1 %v2929_v20  ;;  %v4006_v55 = vld [vmem:[%s6509_s0 + $0x64] sm:$0xf]  ;;  %v2878_v4 = vld [vmem:[%s6508_s1 + $0x50] sm:$0xf0]  ;;  %v4998_v13 = vor.u32 %v4010_v52, %v2832_v49  ;;  %v3901_v15 = vor.u32 %v4278_v62, %v3900_v61  ;;  %v3884_v17 = vld [vmem:[%s6508_s1 + $0x820] sm:$0xf] }
  0x51   :  { %2011 = vmatpush.bf16.msra.mxu0 %v3949_v19  ;;  %v4020_v3 = vld [vmem:[%s6508_s1 + $0x44] sm:$0xf]  ;;  %v3134_v10 = vld [vmem:[%s6508_s1 + $0x250] sm:$0xf0]  ;;  %v5000_v14 = vor.u32 %v4006_v55, %v2834_v58  ;;  %v4274_v18 = vld [vmem:[%s6508_s1 + $0x82c] sm:$0xf0] }
  0x52   :  { %2068 = vmatpush.bf16.msra.mxu3 %v3185_v23  ;;  %v4084_v7 = vld [vmem:[%s6508_s1 + $0x244] sm:$0xf]  ;;  %v2990_v12 = vld [vmem:[%s6508_s1 + $0x130] sm:$0xf0]  ;;  %v2881_v16 = vor.u32 %v4020_v3, %v2878_v4  ;;  %v3885_v29 = vor.u32 %v4274_v18, %v3884_v17 }
  0x53   :  { %2050 = vmatpush.bf16.msra.mxu2 %v3041_v24  ;;  %v4048_v11 = vld [vmem:[%s6508_s1 + $0x124] sm:$0xf]  ;;  %v3137_v19 = vor.u32 %v4084_v7, %v3134_v10  ;;  %v2862_v22 = vld [vmem:[%s6508_s1 + $0x30] sm:$0xf0] }
  0x54   :  { %2031 = vmatpush.bf16.msra.mxu1 %v2913_v32  ;;  %v2993_v20 = vor.u32 %v4048_v11, %v2990_v12  ;;  %v4016_v21 = vld [vmem:[%s6508_s1 + $0x24] sm:$0xf]  ;;  %v3118_v24 = vld [vmem:[%s6508_s1 + $0x230] sm:$0xf0]  ;;  %v4270_v32 = vld [vmem:[%s6508_s1 + $0x80c] sm:$0xf0] }
  0x55   :  { %2012 = vmatpush.bf16.msra.mxu0 %v3933_v31  ;;  %v4080_v23 = vld [vmem:[%s6508_s1 + $0x224] sm:$0xf]  ;;  %v2974_v26 = vld [vmem:[%s6508_s1 + $0x110] sm:$0xf0]  ;;  %v2865_v30 = vor.u32 %v4016_v21, %v2862_v22  ;;  %v3868_v31 = vld [vmem:[%s6508_s1 + $0x800] sm:$0xf] }
  0x56   :  { %2069 = vmatpush.bf16.msra.mxu3 %v3169_v35  ;;  %v4044_v25 = vld [vmem:[%s6508_s1 + $0x104] sm:$0xf]  ;;  %v3598_v28 = vld [vmem:[%s6508_s1 + $0x5f0] sm:$0xf0]  ;;  %v3121_v34 = vor.u32 %v4080_v23, %v3118_v24  ;;  %v3869_v47 = vor.u32 %v4270_v32, %v3868_v31 }
  0x57   :  { %2051 = vmatpush.bf16.msra.mxu2 %v3025_v40  ;;  %1965 = vmatmul.bf16.gmra.mxu1 %v4987_v9  ;;  %v4200_v27 = vld [vmem:[%s6508_s1 + $0x5e4] sm:$0xf]  ;;  %v2977_v35 = vor.u32 %v4044_v25, %v2974_v26  ;;  %v2846_v36 = vld [vmem:[%s6508_s1 + $0x10] sm:$0xf0] }
  0x58   :  { %2032 = vmatpush.bf16.msra.mxu1 %v2897_v60  ;;  %1946 = vmatmul.bf16.gmra.mxu0 %v4985_v8  ;;  %v4012_v33 = vld [vmem:[%s6508_s1 + $0x4] sm:$0xf]  ;;  %v3102_v38 = vld [vmem:[%s6508_s1 + $0x210] sm:$0xf0]  ;;  %v3601_v39 = vor.u32 %v4200_v27, %v3598_v28 }
  0x59   :  { %2013 = vmatpush.bf16.msra.mxu0 %v3917_v59  ;;  %1984 = vmatmul.bf16.gmra.mxu2 %v4998_v13  ;;  %v4076_v37 = vld [vmem:[%s6508_s1 + $0x204] sm:$0xf]  ;;  %v3342_v41 = vld [vmem:[%s6508_s1 + $0x3f0] sm:$0xf0]  ;;  %v2849_v49 = vor.u32 %v4012_v33, %v2846_v36 }
  0x5a   :  { %2070 = vmatpush.bf16.msra.mxu3 %v3153_v63  ;;  %v4136_v40 = vld [vmem:[%s6508_s1 + $0x3e4] sm:$0xf]  ;;  %v3470_v43 = vld [vmem:[%s6508_s1 + $0x4f0] sm:$0xf0]  ;;  %v3105_v58 = vor.u32 %v4076_v37, %v3102_v38 }
  0x5b   :  { %2052 = vmatpush.bf16.msra.mxu2 %v3009_v2  ;;  %2003 = vmatmul.bf16.gmra.mxu3 %v5000_v14  ;;  %v4168_v42 = vld [vmem:[%s6508_s1 + $0x4e4] sm:$0xf]  ;;  %v3726_v46 = vld [vmem:[%s6508_s1 + $0x6f0] sm:$0xf0]  ;;  %v3345_v59 = vor.u32 %v4136_v40, %v3342_v41  ;;  %v2804_v2 = vld [vmem:[%s6509_s0 + $0x20] sm:$0xf] }
  0x5c   :  { %2033 = vmatpush.bf16.msra.mxu1 %v2881_v16  ;;  %v4232_v45 = vld [vmem:[%s6508_s1 + $0x6e4] sm:$0xf]  ;;  %v3582_v55 = vld [vmem:[%s6508_s1 + $0x5d0] sm:$0xf0]  ;;  %v3473_v60 = vor.u32 %v4168_v42, %v3470_v43 }
  0x5d   :  { %2014 = vmatpush.bf16.msra.mxu0 %v3901_v15  ;;  %v4196_v52 = vld [vmem:[%s6508_s1 + $0x5c4] sm:$0xf]  ;;  %v3729_v61 = vor.u32 %v4232_v45, %v3726_v46  ;;  %v3326_v63 = vld [vmem:[%s6508_s1 + $0x3d0] sm:$0xf0] }
  0x5e   :  { %2071 = vmatpush.bf16.msra.mxu3 %v3137_v19  ;;  %v4132_v62 = vld [vmem:[%s6508_s1 + $0x3c4] sm:$0xf]  ;;  %v3585_v4 = vor.u32 %v4196_v52, %v3582_v55  ;;  %v3454_v10 = vld [vmem:[%s6508_s1 + $0x4d0] sm:$0xf0] }
  0x5f   :  { %2053 = vmatpush.bf16.msra.mxu2 %v2993_v20  ;;  %v4002_v3 = vld [vmem:[%s6509_s0 + $0x40] sm:$0xf0]  ;;  %v3329_v11 = vor.u32 %v4132_v62, %v3326_v63  ;;  %v3710_v15 = vld [vmem:[%s6508_s1 + $0x6d0] sm:$0xf0] }
  0x60   :  { %2034 = vmatpush.bf16.msra.mxu1 %v2865_v30  ;;  %v4164_v7 = vld [vmem:[%s6508_s1 + $0x4c4] sm:$0xf]  ;;  %v5105_v17 = vor.u32 %v4002_v3, %v2804_v2  ;;  %v3566_v18 = vld [vmem:[%s6508_s1 + $0x5b0] sm:$0xf0]  ;;  %v2840_v3 = vld [vmem:[%s6509_s0 + $0x68] sm:$0xf] }
  0x61   :  { %2015 = vmatpush.bf16.msra.mxu0 %v3885_v29  ;;  %v4228_v12 = vld [vmem:[%s6508_s1 + $0x6c4] sm:$0xf]  ;;  %v3310_v20 = vld [vmem:[%s6508_s1 + $0x3b0] sm:$0xf0]  ;;  %v3457_v21 = vor.u32 %v4164_v7, %v3454_v10 }
  0x62   :  { %2072 = vmatpush.bf16.msra.mxu3 %v3121_v34  ;;  %v4192_v16 = vld [vmem:[%s6508_s1 + $0x5a4] sm:$0xf]  ;;  %v3713_v22 = vor.u32 %v4228_v12, %v3710_v15  ;;  %v3438_v24 = vld [vmem:[%s6508_s1 + $0x4b0] sm:$0xf0] }
  0x63   :  { %2054 = vmatpush.bf16.msra.mxu2 %v2977_v35  ;;  %v4128_v19 = vld [vmem:[%s6508_s1 + $0x3a4] sm:$0xf]  ;;  %v3569_v25 = vor.u32 %v4192_v16, %v3566_v18  ;;  %v3694_v28 = vld [vmem:[%s6508_s1 + $0x6b0] sm:$0xf0] }
  0x64   :  { %2035 = vmatpush.bf16.msra.mxu1 %v2849_v49  ;;  %v4160_v23 = vld [vmem:[%s6508_s1 + $0x4a4] sm:$0xf]  ;;  %v3313_v26 = vor.u32 %v4128_v19, %v3310_v20  ;;  %v3550_v30 = vld [vmem:[%s6508_s1 + $0x590] sm:$0xf0] }
  0x65   :  { %2016 = vmatpush.bf16.msra.mxu0 %v3869_v47  ;;  %v4224_v27 = vld [vmem:[%s6508_s1 + $0x6a4] sm:$0xf]  ;;  %v3294_v32 = vld [vmem:[%s6508_s1 + $0x390] sm:$0xf0]  ;;  %v3441_v33 = vor.u32 %v4160_v23, %v3438_v24 }
  0x66   :  { %2073 = vmatpush.bf16.msra.mxu3 %v3105_v58  ;;  %v4188_v29 = vld [vmem:[%s6508_s1 + $0x584] sm:$0xf]  ;;  %v3697_v34 = vor.u32 %v4224_v27, %v3694_v28  ;;  %v3422_v36 = vld [vmem:[%s6508_s1 + $0x490] sm:$0xf0] }
  0x67   :  { %2123 = vmatpush.bf16.msrb.mxu2 %v3601_v39  ;;  %2036 = vmatmul.bf16.vlgmr.msra.gmra.mxu1 %v4565_v48  ;;  %v4124_v31 = vld [vmem:[%s6508_s1 + $0x384] sm:$0xf]  ;;  %v3553_v37 = vor.u32 %v4188_v29, %v3550_v30  ;;  %v3678_v40 = vld [vmem:[%s6508_s1 + $0x690] sm:$0xf0] }
  0x68   :  { %2104 = vmatpush.bf16.msrb.mxu1 %v3473_v60  ;;  %2017 = vmatmul.bf16.vlgmr.msra.gmra.mxu0 %v5105_v17  ;;  %v4156_v35 = vld [vmem:[%s6508_s1 + $0x484] sm:$0xf]  ;;  %v3297_v38 = vor.u32 %v4124_v31, %v3294_v32  ;;  %v3534_v42 = vld [vmem:[%s6508_s1 + $0x570] sm:$0xf0] }
  0x69   :  { %2085 = vmatpush.bf16.msrb.mxu0 %v3345_v59  ;;  %2055 = vmatmul.bf16.vlgmr.msra.gmra.mxu2 %v4576_v53  ;;  %v4220_v39 = vld [vmem:[%s6508_s1 + $0x684] sm:$0xf]  ;;  %v3278_v45 = vld [vmem:[%s6508_s1 + $0x370] sm:$0xf0]  ;;  %v3425_v46 = vor.u32 %v4156_v35, %v3422_v36 }
  0x6a   :  { %2142 = vmatpush.bf16.msrb.mxu3 %v3729_v61  ;;  %v4184_v41 = vld [vmem:[%s6508_s1 + $0x564] sm:$0xf]  ;;  %v3681_v47 = vor.u32 %v4220_v39, %v3678_v40  ;;  %v3406_v52 = vld [vmem:[%s6508_s1 + $0x470] sm:$0xf0] }
  0x6b   :  { %2124 = vmatpush.bf16.msrb.mxu2 %v3585_v4  ;;  %2074 = vmatmul.bf16.vlgmr.msra.gmra.mxu3 %v4578_v54  ;;  %v4120_v43 = vld [vmem:[%s6508_s1 + $0x364] sm:$0xf]  ;;  %v3537_v55 = vor.u32 %v4184_v41, %v3534_v42  ;;  %v3662_v60 = vld [vmem:[%s6508_s1 + $0x670] sm:$0xf0]  ;;  %v4011_v4 = vld [vmem:[%s6509_s0 + $0x88] sm:$0xf0] }
  0x6c   :  { %2105 = vmatpush.bf16.msrb.mxu1 %v3457_v21  ;;  %v4152_v49 = vld [vmem:[%s6508_s1 + $0x464] sm:$0xf]  ;;  %v3281_v58 = vor.u32 %v4120_v43, %v3278_v45  ;;  %v3518_v62 = vld [vmem:[%s6508_s1 + $0x550] sm:$0xf0]  ;;  %v5213_v21 = vor.u32 %v4011_v4, %v2840_v3 }
  0x6d   :  { %2086 = vmatpush.bf16.msrb.mxu0 %v3329_v11  ;;  %v4216_v59 = vld [vmem:[%s6508_s1 + $0x664] sm:$0xf]  ;;  %v3262_v2 = vld [vmem:[%s6508_s1 + $0x350] sm:$0xf0]  ;;  %v3409_v7 = vor.u32 %v4152_v49, %v3406_v52 }
  0x6e   :  { %2143 = vmatpush.bf16.msrb.mxu3 %v3713_v22  ;;  %v4180_v61 = vld [vmem:[%s6508_s1 + $0x544] sm:$0xf]  ;;  %v3665_v10 = vor.u32 %v4216_v59, %v3662_v60  ;;  %v3390_v12 = vld [vmem:[%s6508_s1 + $0x450] sm:$0xf0] }
  0x6f   :  { %2125 = vmatpush.bf16.msrb.mxu2 %v3569_v25  ;;  %v4116_v63 = vld [vmem:[%s6508_s1 + $0x344] sm:$0xf]  ;;  %v3521_v15 = vor.u32 %v4180_v61, %v3518_v62  ;;  %v3646_v19 = vld [vmem:[%s6508_s1 + $0x650] sm:$0xf0]  ;;  %v3092_v61 = vld [vmem:[%s6508_s1 + $0x1e8] sm:$0xf] }
  0x70   :  { %2106 = vmatpush.bf16.msrb.mxu1 %v3441_v33  ;;  %v4148_v11 = vld [vmem:[%s6508_s1 + $0x444] sm:$0xf]  ;;  %v3265_v16 = vor.u32 %v4116_v63, %v3262_v2  ;;  %v3502_v22 = vld [vmem:[%s6508_s1 + $0x530] sm:$0xf0]  ;;  %v4075_v62 = vld [vmem:[%s6508_s1 + $0x1f4] sm:$0xf0] }
  0x71   :  { %2087 = vmatpush.bf16.msrb.mxu0 %v3313_v26  ;;  %v4212_v18 = vld [vmem:[%s6508_s1 + $0x644] sm:$0xf]  ;;  %v3246_v24 = vld [vmem:[%s6508_s1 + $0x330] sm:$0xf0]  ;;  %v3393_v25 = vor.u32 %v4148_v11, %v3390_v12  ;;  %v2948_v63 = vld [vmem:[%s6508_s1 + $0xc8] sm:$0xf]  ;;  %v3093_v12 = vor.u32 %v4075_v62, %v3092_v61 }
  0x72   :  { %2144 = vmatpush.bf16.msrb.mxu3 %v3697_v34  ;;  %v4176_v20 = vld [vmem:[%s6508_s1 + $0x524] sm:$0xf]  ;;  %v3649_v26 = vor.u32 %v4212_v18, %v3646_v19  ;;  %v3374_v28 = vld [vmem:[%s6508_s1 + $0x430] sm:$0xf0]  ;;  %v4039_v2 = vld [vmem:[%s6508_s1 + $0xd4] sm:$0xf0] }
  0x73   :  { %2126 = vmatpush.bf16.msrb.mxu2 %v3553_v37  ;;  %v4112_v23 = vld [vmem:[%s6508_s1 + $0x324] sm:$0xf]  ;;  %v3505_v30 = vor.u32 %v4176_v20, %v3502_v22  ;;  %v3630_v32 = vld [vmem:[%s6508_s1 + $0x630] sm:$0xf0]  ;;  %v2964_v37 = vld [vmem:[%s6508_s1 + $0xe8] sm:$0xf] }
  0x74   :  { %2107 = vmatpush.bf16.msrb.mxu1 %v3425_v46  ;;  %v4144_v27 = vld [vmem:[%s6508_s1 + $0x424] sm:$0xf]  ;;  %v3249_v31 = vor.u32 %v4112_v23, %v3246_v24  ;;  %v3486_v34 = vld [vmem:[%s6508_s1 + $0x510] sm:$0xf0]  ;;  %v3076_v20 = vld [vmem:[%s6508_s1 + $0x1c8] sm:$0xf] }
  0x75   :  { %2088 = vmatpush.bf16.msrb.mxu0 %v3297_v38  ;;  %v4208_v29 = vld [vmem:[%s6508_s1 + $0x624] sm:$0xf]  ;;  %v3230_v36 = vld [vmem:[%s6508_s1 + $0x310] sm:$0xf0]  ;;  %v4043_v38 = vld [vmem:[%s6508_s1 + $0xf4] sm:$0xf0]  ;;  %v3377_v41 = vor.u32 %v4144_v27, %v3374_v28 }
  0x76   :  { %2145 = vmatpush.bf16.msrb.mxu3 %v3681_v47  ;;  %v4172_v33 = vld [vmem:[%s6508_s1 + $0x504] sm:$0xf]  ;;  %v3854_v40 = vld [vmem:[%s6508_s1 + $0x7f0] sm:$0xf0]  ;;  %v3633_v42 = vor.u32 %v4208_v29, %v3630_v32  ;;  %v2965_v59 = vor.u32 %v4043_v38, %v2964_v37  ;;  %v4071_v22 = vld [vmem:[%s6508_s1 + $0x1d4] sm:$0xf0] }
  0x77   :  { %2127 = vmatpush.bf16.msrb.mxu2 %v3537_v55  ;;  %2041 = vmatmul.bf16.gmra.mxu1 %v4697_v44  ;;  %v4108_v35 = vld [vmem:[%s6508_s1 + $0x304] sm:$0xf]  ;;  %v3358_v45 = vld [vmem:[%s6508_s1 + $0x410] sm:$0xf0]  ;;  %v3489_v47 = vor.u32 %v4172_v33, %v3486_v34  ;;  %v2932_v23 = vld [vmem:[%s6508_s1 + $0xa8] sm:$0xf] }
  0x78   :  { %2108 = vmatpush.bf16.msrb.mxu1 %v3409_v7  ;;  %2022 = vmatmul.bf16.gmra.mxu0 %v5213_v21  ;;  %v4264_v39 = vld [vmem:[%s6508_s1 + $0x7e4] sm:$0xf]  ;;  %v3233_v49 = vor.u32 %v4108_v35, %v3230_v36  ;;  %v3614_v52 = vld [vmem:[%s6508_s1 + $0x610] sm:$0xf0]  ;;  %v4035_v24 = vld [vmem:[%s6508_s1 + $0xb4] sm:$0xf0] }
  0x79   :  { %2089 = vmatpush.bf16.msrb.mxu0 %v3281_v58  ;;  %2060 = vmatmul.bf16.gmra.mxu2 %v4708_v50  ;;  %v4140_v43 = vld [vmem:[%s6508_s1 + $0x404] sm:$0xf]  ;;  %v3982_v58 = vld [vmem:[%s6508_s1 + $0x8f0] sm:$0xf0]  ;;  %v3857_v60 = vor.u32 %v4264_v39, %v3854_v40  ;;  %v4067_v32 = vld [vmem:[%s6508_s1 + $0x1b4] sm:$0xf0]  ;;  %v2933_v33 = vor.u32 %v4035_v24, %v2932_v23 }
  0x7a   :  { %2146 = vmatpush.bf16.msrb.mxu3 %v3665_v10  ;;  %v4204_v46 = vld [vmem:[%s6508_s1 + $0x604] sm:$0xf]  ;;  %v3838_v4 = vld [vmem:[%s6508_s1 + $0x7d0] sm:$0xf0]  ;;  %v3361_v7 = vor.u32 %v4140_v43, %v3358_v45  ;;  %v2916_v35 = vld [vmem:[%s6508_s1 + $0x88] sm:$0xf] }
  0x7b   :  { %2128 = vmatpush.bf16.msrb.mxu2 %v3521_v15  ;;  %2079 = vmatmul.bf16.gmra.mxu3 %v4710_v51  ;;  %v4296_v55 = vld [vmem:[%s6508_s1 + $0x8e4] sm:$0xf]  ;;  %v3617_v10 = vor.u32 %v4204_v46, %v3614_v52  ;;  %v3966_v19 = vld [vmem:[%s6508_s1 + $0x8d0] sm:$0xf0]  ;;  %v4031_v36 = vld [vmem:[%s6508_s1 + $0x94] sm:$0xf0] }
  0x7c   :  { %2109 = vmatpush.bf16.msrb.mxu1 %v3393_v25  ;;  %v4260_v3 = vld [vmem:[%s6508_s1 + $0x7c4] sm:$0xf]  ;;  %v3985_v11 = vor.u32 %v4296_v55, %v3982_v58  ;;  %v3822_v28 = vld [vmem:[%s6508_s1 + $0x7b0] sm:$0xf0]  ;;  %v3044_v43 = vld [vmem:[%s6508_s1 + $0x188] sm:$0xf]  ;;  %v2917_v46 = vor.u32 %v4031_v36, %v2916_v35 }
  0x7d   :  { %2090 = vmatpush.bf16.msrb.mxu0 %v3265_v16  ;;  %v4292_v15 = vld [vmem:[%s6508_s1 + $0x8c4] sm:$0xf]  ;;  %v2949_v16 = vor.u32 %v4039_v2, %v2948_v63  ;;  %v3841_v18 = vor.u32 %v4260_v3, %v3838_v4  ;;  %v3806_v40 = vld [vmem:[%s6508_s1 + $0x790] sm:$0xf0]  ;;  %v4063_v45 = vld [vmem:[%s6508_s1 + $0x194] sm:$0xf0] }
  0x7e   :  { %2147 = vmatpush.bf16.msrb.mxu3 %v3649_v26  ;;  %v3969_v25 = vor.u32 %v4292_v15, %v3966_v19  ;;  %v3077_v26 = vor.u32 %v4071_v22, %v3076_v20  ;;  %v4256_v27 = vld [vmem:[%s6508_s1 + $0x7a4] sm:$0xf]  ;;  %v4027_v52 = vld [vmem:[%s6508_s1 + $0x74] sm:$0xf0]  ;;  %v3045_v58 = vor.u32 %v4063_v45, %v3044_v43  ;;  %v3918_v62 = vld [vmem:[%s6508_s1 + $0x870] sm:$0xf0] }
  0x7f   :  { %2129 = vmatpush.bf16.msrb.mxu2 %v3505_v30  ;;  %v4288_v29 = vld [vmem:[%s6508_s1 + $0x8a4] sm:$0xf]  ;;  %v3950_v30 = vld [vmem:[%s6508_s1 + $0x8b0] sm:$0xf0]  ;;  %v3825_v34 = vor.u32 %v4256_v27, %v3822_v28  ;;  %v3028_v63 = vld [vmem:[%s6508_s1 + $0x168] sm:$0xf] }
  0x80   :  { %2110 = vmatpush.bf16.msrb.mxu1 %v3377_v41  ;;  %v3953_v37 = vor.u32 %v4288_v29, %v3950_v30  ;;  %v4252_v39 = vld [vmem:[%s6508_s1 + $0x784] sm:$0xf]  ;;  %v4059_v2 = vld [vmem:[%s6508_s1 + $0x174] sm:$0xf0]  ;;  %v3902_v19 = vld [vmem:[%s6508_s1 + $0x850] sm:$0xf0] }
  0x81   :  { %2091 = vmatpush.bf16.msrb.mxu0 %v3249_v31  ;;  %v3060_v31 = vld [vmem:[%s6508_s1 + $0x1a8] sm:$0xf]  ;;  %v4284_v41 = vld [vmem:[%s6508_s1 + $0x884] sm:$0xf]  ;;  %v4055_v22 = vld [vmem:[%s6508_s1 + $0x154] sm:$0xf0] }
  0x82   :  { %2148 = vmatpush.bf16.msrb.mxu3 %v3633_v42  ;;  %v3061_v38 = vor.u32 %v4067_v32, %v3060_v31  ;;  %v3934_v42 = vld [vmem:[%s6508_s1 + $0x890] sm:$0xf0]  ;;  %v4280_v61 = vld [vmem:[%s6508_s1 + $0x864] sm:$0xf]  ;;  %v3012_v20 = vld [vmem:[%s6508_s1 + $0x148] sm:$0xf] }
  0x83   :  { %2130 = vmatpush.bf16.msrb.mxu2 %v3489_v47  ;;  %v3809_v47 = vor.u32 %v4252_v39, %v3806_v40  ;;  %v3937_v55 = vor.u32 %v4284_v41, %v3934_v42  ;;  %v4244_v15 = vld [vmem:[%s6508_s1 + $0x744] sm:$0xf]  ;;  %v3013_v28 = vor.u32 %v4055_v22, %v3012_v20  ;;  %v3758_v30 = vld [vmem:[%s6508_s1 + $0x730] sm:$0xf0]  ;;  %v2852_v35 = vld [vmem:[%s6508_s1 + $0x8] sm:$0xf] }
  0x84   :  { %2111 = vmatpush.bf16.msrb.mxu1 %v3361_v7  ;;  %v2884_v7 = vld [vmem:[%s6508_s1 + $0x48] sm:$0xf]  ;;  %v4240_v29 = vld [vmem:[%s6508_s1 + $0x724] sm:$0xf]  ;;  %v3886_v32 = vld [vmem:[%s6508_s1 + $0x830] sm:$0xf0] }
  0x85   :  { %2092 = vmatpush.bf16.msrb.mxu0 %v3233_v49  ;;  %v2900_v49 = vld [vmem:[%s6508_s1 + $0x68] sm:$0xf]  ;;  %v4272_v31 = vld [vmem:[%s6508_s1 + $0x824] sm:$0xf]  ;;  %v3742_v40 = vld [vmem:[%s6508_s1 + $0x710] sm:$0xf0] }
  0x86   :  { %2149 = vmatpush.bf16.msrb.mxu3 %v3617_v10  ;;  %v2901_v3 = vor.u32 %v4027_v52, %v2900_v49  ;;  %v4023_v10 = vld [vmem:[%s6508_s1 + $0x54] sm:$0xf0]  ;;  %v4236_v39 = vld [vmem:[%s6508_s1 + $0x704] sm:$0xf]  ;;  %v3889_v41 = vor.u32 %v4272_v31, %v3886_v32  ;;  %v3870_v45 = vld [vmem:[%s6508_s1 + $0x810] sm:$0xf0] }
  0x87   :  { %2199 = vmatpush.bf16.msra.mxu2 %v2965_v59  ;;  %2112 = vmatmul.bf16.vlgmr.msrb.gmra.mxu1 %v4853_v0  ;;  %v4248_v59 = vld [vmem:[%s6508_s1 + $0x764] sm:$0xf]  ;;  %v2885_v23 = vor.u32 %v4023_v10, %v2884_v7  ;;  %v3476_v49 = vld [vmem:[%s6508_s1 + $0x4e8] sm:$0xf]  ;;  %v4171_v52 = vld [vmem:[%s6508_s1 + $0x4f4] sm:$0xf0] }
  0x88   :  { %2180 = vmatpush.bf16.msra.mxu1 %v3985_v11  ;;  %2093 = vmatmul.bf16.vlgmr.msrb.gmra.mxu0 %v4586_v57  ;;  %v3921_v11 = vor.u32 %v4280_v61, %v3918_v62  ;;  %v4268_v43 = vld [vmem:[%s6508_s1 + $0x804] sm:$0xf]  ;;  %v3745_v61 = vor.u32 %v4236_v39, %v3742_v40  ;;  %v4139_v62 = vld [vmem:[%s6508_s1 + $0x3f4] sm:$0xf0]  ;;  %v3477_v7 = vor.u32 %v4171_v52, %v3476_v49  ;;  %v3332_v20 = vld [vmem:[%s6508_s1 + $0x3c8] sm:$0xf] }
  0x89   :  { %2161 = vmatpush.bf16.msra.mxu0 %v3857_v60  ;;  %2131 = vmatmul.bf16.vlgmr.msrb.gmra.mxu2 %v4855_v1  ;;  %v3790_v60 = vld [vmem:[%s6508_s1 + $0x770] sm:$0xf0]  ;;  %v4135_v22 = vld [vmem:[%s6508_s1 + $0x3d4] sm:$0xf0]  ;;  %v3188_v31 = vld [vmem:[%s6508_s1 + $0x2a8] sm:$0xf] }
  0x8a   :  { %2218 = vmatpush.bf16.msra.mxu3 %v3093_v12  ;;  %v3793_v4 = vor.u32 %v4248_v59, %v3790_v60  ;;  %v3029_v12 = vor.u32 %v4059_v2, %v3028_v63  ;;  %v3348_v59 = vld [vmem:[%s6508_s1 + $0x3e8] sm:$0xf]  ;;  %v4203_v2 = vld [vmem:[%s6508_s1 + $0x5f4] sm:$0xf0] }
  0x8b   :  { %2200 = vmatpush.bf16.msra.mxu2 %v2949_v16  ;;  %2150 = vmatmul.bf16.vlgmr.msrb.gmra.mxu3 %v4866_v5  ;;  %v3774_v16 = vld [vmem:[%s6508_s1 + $0x750] sm:$0xf0]  ;;  %v3604_v63 = vld [vmem:[%s6508_s1 + $0x5e8] sm:$0xf]  ;;  %v4099_v32 = vld [vmem:[%s6508_s1 + $0x2b4] sm:$0xf0] }
  0x8c   :  { %2181 = vmatpush.bf16.msra.mxu1 %v3969_v25  ;;  %v3777_v24 = vor.u32 %v4244_v15, %v3774_v16  ;;  %v2868_v25 = vld [vmem:[%s6508_s1 + $0x28] sm:$0xf]  ;;  %v3349_v15 = vor.u32 %v4139_v62, %v3348_v59  ;;  %v3605_v16 = vor.u32 %v4203_v2, %v3604_v63  ;;  %v4095_v49 = vld [vmem:[%s6508_s1 + $0x294] sm:$0xf0] }
  0x8d   :  { %2162 = vmatpush.bf16.msra.mxu0 %v3841_v18  ;;  %v4276_v18 = vld [vmem:[%s6508_s1 + $0x844] sm:$0xf]  ;;  %v3300_v52 = vld [vmem:[%s6508_s1 + $0x388] sm:$0xf]  ;;  %v4191_v59 = vld [vmem:[%s6508_s1 + $0x594] sm:$0xf0] }
  0x8e   :  { %2219 = vmatpush.bf16.msra.mxu3 %v3077_v26  ;;  %v4019_v26 = vld [vmem:[%s6508_s1 + $0x34] sm:$0xf0]  ;;  %v3905_v27 = vor.u32 %v4276_v18, %v3902_v19  ;;  %v3204_v18 = vld [vmem:[%s6508_s1 + $0x2c8] sm:$0xf] }
  0x8f   :  { %2201 = vmatpush.bf16.msra.mxu2 %v2933_v33  ;;  %v2996_v33 = vld [vmem:[%s6508_s1 + $0x128] sm:$0xf]  ;;  %v2869_v36 = vor.u32 %v4019_v26, %v2868_v25  ;;  %v4103_v19 = vld [vmem:[%s6508_s1 + $0x2d4] sm:$0xf0] }
  0x90   :  { %2182 = vmatpush.bf16.msra.mxu1 %v3953_v37  ;;  %v3761_v37 = vor.u32 %v4240_v29, %v3758_v30  ;;  %v3205_v26 = vor.u32 %v4103_v19, %v3204_v18  ;;  %v3444_v29 = vld [vmem:[%s6508_s1 + $0x4a8] sm:$0xf]  ;;  %v4163_v30 = vld [vmem:[%s6508_s1 + $0x4b4] sm:$0xf0] }
  0x91   :  { %2163 = vmatpush.bf16.msra.mxu0 %v3825_v34  ;;  %v4051_v34 = vld [vmem:[%s6508_s1 + $0x134] sm:$0xf0]  ;;  %v3445_v40 = vor.u32 %v4163_v30, %v3444_v29  ;;  %v3412_v62 = vld [vmem:[%s6508_s1 + $0x468] sm:$0xf] }
  0x92   :  { %2220 = vmatpush.bf16.msra.mxu3 %v3061_v38  ;;  %v4015_v38 = vld [vmem:[%s6508_s1 + $0x14] sm:$0xf0]  ;;  %v2997_v42 = vor.u32 %v4051_v34, %v2996_v33  ;;  %v3316_v33 = vld [vmem:[%s6508_s1 + $0x3a8] sm:$0xf] }
  0x93   :  { %2202 = vmatpush.bf16.msra.mxu2 %v2917_v46  ;;  %v2980_v46 = vld [vmem:[%s6508_s1 + $0x108] sm:$0xf]  ;;  %v2853_v60 = vor.u32 %v4015_v38, %v2852_v35  ;;  %v4131_v35 = vld [vmem:[%s6508_s1 + $0x3b4] sm:$0xf0] }
  0x94   :  { %2183 = vmatpush.bf16.msra.mxu1 %v3937_v55  ;;  %v3220_v55 = vld [vmem:[%s6508_s1 + $0x2e8] sm:$0xf]  ;;  %v4155_v63 = vld [vmem:[%s6508_s1 + $0x474] sm:$0xf0] }
  0x95   :  { %2164 = vmatpush.bf16.msra.mxu0 %v3809_v47  ;;  %v4047_v47 = vld [vmem:[%s6508_s1 + $0x114] sm:$0xf0]  ;;  %v3540_v19 = vld [vmem:[%s6508_s1 + $0x568] sm:$0xf] }
  0x96   :  { %2221 = vmatpush.bf16.msra.mxu3 %v3045_v58  ;;  %v4107_v58 = vld [vmem:[%s6508_s1 + $0x2f4] sm:$0xf0] }
  0x97   :  { %2203 = vmatpush.bf16.msra.mxu2 %v2901_v3  ;;  %2117 = vmatmul.bf16.gmra.mxu1 %v4985_v8  ;;  %v3873_v3 = vor.u32 %v4268_v43, %v3870_v45  ;;  %v3221_v10 = vor.u32 %v4107_v58, %v3220_v55  ;;  %v4159_v43 = vld [vmem:[%s6508_s1 + $0x494] sm:$0xf0]  ;;  %v3317_v45 = vor.u32 %v4131_v35, %v3316_v33  ;;  %v3556_v58 = vld [vmem:[%s6508_s1 + $0x588] sm:$0xf] }
  0x98   :  { %2184 = vmatpush.bf16.msra.mxu1 %v3921_v11  ;;  %2098 = vmatmul.bf16.gmra.mxu0 %v4718_v56  ;;  %v3460_v11 = vld [vmem:[%s6508_s1 + $0x4c8] sm:$0xf]  ;;  %v4127_v55 = vld [vmem:[%s6508_s1 + $0x394] sm:$0xf0] }
  0x99   :  { %2165 = vmatpush.bf16.msra.mxu0 %v3793_v4  ;;  %2136 = vmatmul.bf16.gmra.mxu2 %v4987_v9  ;;  %v2981_v4 = vor.u32 %v4047_v47, %v2980_v46  ;;  %v3172_v47 = vld [vmem:[%s6508_s1 + $0x288] sm:$0xf]  ;;  %v4123_v18 = vld [vmem:[%s6508_s1 + $0x374] sm:$0xf0] }
  0x9a   :  { %2222 = vmatpush.bf16.msra.mxu3 %v3029_v12  ;;  %v4167_v12 = vld [vmem:[%s6508_s1 + $0x4d4] sm:$0xf0]  ;;  %v3268_v33 = vld [vmem:[%s6508_s1 + $0x348] sm:$0xf] }
  0x9b   :  { %2204 = vmatpush.bf16.msra.mxu2 %v2885_v23  ;;  %2155 = vmatmul.bf16.gmra.mxu3 %v4998_v13  ;;  %v3588_v23 = vld [vmem:[%s6508_s1 + $0x5c8] sm:$0xf]  ;;  %v3461_v25 = vor.u32 %v4167_v12, %v3460_v11 }
  0x9c   :  { %2185 = vmatpush.bf16.msra.mxu1 %v3905_v27  ;;  %v3333_v27 = vor.u32 %v4135_v22, %v3332_v20  ;;  %v3284_v11 = vld [vmem:[%s6508_s1 + $0x368] sm:$0xf]  ;;  %v4187_v20 = vld [vmem:[%s6508_s1 + $0x574] sm:$0xf0] }
  0x9d   :  { %2166 = vmatpush.bf16.msra.mxu0 %v3777_v24  ;;  %v4199_v24 = vld [vmem:[%s6508_s1 + $0x5d4] sm:$0xf0]  ;;  %v3285_v29 = vor.u32 %v4123_v18, %v3284_v11  ;;  %v3541_v30 = vor.u32 %v4187_v20, %v3540_v19  ;;  %v3524_v35 = vld [vmem:[%s6508_s1 + $0x548] sm:$0xf] }
  0x9e   :  { %2223 = vmatpush.bf16.msra.mxu3 %v3013_v28  ;;  %v3589_v28 = vor.u32 %v4199_v24, %v3588_v23  ;;  %v3413_v23 = vor.u32 %v4155_v63, %v3412_v62  ;;  %v3364_v63 = vld [vmem:[%s6508_s1 + $0x408] sm:$0xf]  ;;  %v4079_v11 = vld [vmem:[%s6508_s1 + $0x214] sm:$0xf0] }
  0x9f   :  { %2205 = vmatpush.bf16.msra.mxu2 %v2869_v36  ;;  %v3572_v36 = vld [vmem:[%s6508_s1 + $0x5a8] sm:$0xf]  ;;  %v4111_v18 = vld [vmem:[%s6508_s1 + $0x314] sm:$0xf0] }
  0xa0   :  { %2186 = vmatpush.bf16.msra.mxu1 %v3889_v41  ;;  %v3189_v41 = vor.u32 %v4099_v32, %v3188_v31  ;;  %v3140_v31 = vld [vmem:[%s6508_s1 + $0x248] sm:$0xf]  ;;  %v4087_v32 = vld [vmem:[%s6508_s1 + $0x254] sm:$0xf0] }
  0xa1   :  { %2167 = vmatpush.bf16.msra.mxu0 %v3761_v37  ;;  %v1866_v34 = vpop.f32.mrf.mxu0  ;;  %v4195_v37 = vld [vmem:[%s6508_s1 + $0x5b4] sm:$0xf0]  ;;  %v1885_v38 = vpop.f32.mrf.mxu1  ;;  %v3492_v19 = vld [vmem:[%s6508_s1 + $0x508] sm:$0xf] }
  0xa2   :  { %2224 = vmatpush.bf16.msra.mxu3 %v2997_v42  ;;  %v1886_v39 = vadd.f32 %v1885_v38, %v1866_v34  ;;  %v3428_v42 = vld [vmem:[%s6508_s1 + $0x488] sm:$0xf]  ;;  %v3573_v46 = vor.u32 %v4195_v37, %v3572_v36  ;;  %v4119_v34 = vld [vmem:[%s6508_s1 + $0x354] sm:$0xf0]  ;;  %v3141_v38 = vor.u32 %v4087_v32, %v3140_v31  ;;  %v4041_v31 = vld [vmem:[%s6508_s1 + $0xec] sm:$0xf] }
  0xa3   :  { %2206 = vmatpush.bf16.msra.mxu2 %v2853_v60  ;;  %v3429_v60 = vor.u32 %v4159_v43, %v3428_v42  ;;  %v4183_v36 = vld [vmem:[%s6508_s1 + $0x554] sm:$0xf0]  ;;  %v3269_v42 = vor.u32 %v4119_v34, %v3268_v33  ;;  %v2966_v32 = vld [vmem:[%s6508_s1 + $0xf8] sm:$0xf0] }
  0xa4   :  { %2187 = vmatpush.bf16.msra.mxu1 %v3873_v3  ;;  %v3301_v3 = vor.u32 %v4127_v55, %v3300_v52  ;;  %v3525_v43 = vor.u32 %v4183_v36, %v3524_v35  ;;  %v4175_v20 = vld [vmem:[%s6508_s1 + $0x514] sm:$0xf0] }
  0xa5   :  { %2168 = vmatpush.bf16.msra.mxu0 %v3745_v61  ;;  %v3173_v61 = vor.u32 %v4095_v49, %v3172_v47  ;;  %v3252_v47 = vld [vmem:[%s6508_s1 + $0x328] sm:$0xf]  ;;  %v3493_v35 = vor.u32 %v4175_v20, %v3492_v19  ;;  %v4259_v20 = vld [vmem:[%s6508_s1 + $0x7b4] sm:$0xf0] }
  0xa6   :  { %2225 = vmatpush.bf16.msra.mxu3 %v2981_v4  ;;  %v3557_v4 = vor.u32 %v4191_v59, %v3556_v58  ;;  %v4115_v58 = vld [vmem:[%s6508_s1 + $0x334] sm:$0xf0]  ;;  %v3508_v59 = vld [vmem:[%s6508_s1 + $0x528] sm:$0xf] }
  0xa7   :  { %2275 = vmatpush.bf16.msrb.mxu2 %v3477_v7  ;;  %2188 = vmatmul.bf16.vlgmr.msra.gmra.mxu1 %v5105_v17  ;;  %v3156_v7 = vld [vmem:[%s6508_s1 + $0x268] sm:$0xf] }
  0xa8   :  { %2256 = vmatpush.bf16.msrb.mxu1 %v3349_v15  ;;  %2169 = vmatmul.bf16.vlgmr.msra.gmra.mxu0 %v4868_v6  ;;  %v1904_v2 = vpop.f32.mrf.mxu2 }
  0xa9   :  { %2237 = vmatpush.bf16.msrb.mxu0 %v3221_v10  ;;  %2207 = vmatmul.bf16.vlgmr.msra.gmra.mxu2 %v4565_v48  ;;  %v4091_v10 = vld [vmem:[%s6508_s1 + $0x274] sm:$0xf0]  ;;  %v1905_v12 = vadd.f32 %v1904_v2, %v1886_v39  ;;  %v1887_v22 = vpop.f32.mrf.mxu1  ;;  %v3380_v39 = vld [vmem:[%s6508_s1 + $0x428] sm:$0xf] }
  0xaa   :  { %2294 = vmatpush.bf16.msrb.mxu3 %v3605_v16  ;;  %v1923_v15 = vpop.f32.mrf.mxu3  ;;  %v1868_v16 = vpop.f32.mrf.mxu0 }
  0xab   :  { %2276 = vmatpush.bf16.msrb.mxu2 %v3461_v25  ;;  %2226 = vmatmul.bf16.vlgmr.msra.gmra.mxu3 %v4576_v53  ;;  %v5588_v24 = vadd.f32 %v1923_v15, %v1905_v12  ;;  %v1888_v25 = vadd.f32 %v1887_v22, %v1868_v16  ;;  %v3253_v12 = vor.u32 %v4115_v58, %v3252_v47  ;;  %v3236_v16 = vld [vmem:[%s6508_s1 + $0x308] sm:$0xf] }
  0xac   :  { %2257 = vmatpush.bf16.msrb.mxu1 %v3333_v27  ;;  %v3396_v27 = vld [vmem:[%s6508_s1 + $0x448] sm:$0xf]  ;;  %v3237_v34 = vor.u32 %v4111_v18, %v3236_v16 }
  0xad   :  { %2238 = vmatpush.bf16.msrb.mxu0 %v3205_v26  ;;  %v3157_v26 = vor.u32 %v4091_v10, %v3156_v7  ;;  %v4143_v7 = vld [vmem:[%s6508_s1 + $0x414] sm:$0xf0]  ;;  %v3108_v10 = vld [vmem:[%s6508_s1 + $0x208] sm:$0xf] }
  0xae   :  { %2295 = vmatpush.bf16.msrb.mxu3 %v3589_v28  ;;  %v4151_v28 = vld [vmem:[%s6508_s1 + $0x454] sm:$0xf0]  ;;  %v3988_v22 = vld [vmem:[%s6508_s1 + $0x8e8] sm:$0xf] }
  0xaf   :  { %2277 = vmatpush.bf16.msrb.mxu2 %v3445_v40  ;;  %v3397_v37 = vor.u32 %v4151_v28, %v3396_v27  ;;  %v4147_v40 = vld [vmem:[%s6508_s1 + $0x434] sm:$0xf0]  ;;  %v3860_v27 = vld [vmem:[%s6508_s1 + $0x7e8] sm:$0xf]  ;;  %v3365_v28 = vor.u32 %v4143_v7, %v3364_v63 }
  0xb0   :  { %2258 = vmatpush.bf16.msrb.mxu1 %v3317_v45  ;;  %v3124_v45 = vld [vmem:[%s6508_s1 + $0x228] sm:$0xf]  ;;  %v3381_v62 = vor.u32 %v4147_v40, %v3380_v39 }
  0xb1   :  { %2239 = vmatpush.bf16.msrb.mxu0 %v3189_v41  ;;  %v1906_v41 = vpop.f32.mrf.mxu2  ;;  %v3716_v47 = vld [vmem:[%s6508_s1 + $0x6c8] sm:$0xf] }
  0xb2   :  { %2296 = vmatpush.bf16.msrb.mxu3 %v3573_v46  ;;  %v4083_v46 = vld [vmem:[%s6508_s1 + $0x234] sm:$0xf0]  ;;  %v1907_v49 = vadd.f32 %v1906_v41, %v1888_v25  ;;  %v1925_v52 = vpop.f32.mrf.mxu3  ;;  %v1871_v55 = vpop.f32.mrf.mxu0  ;;  %v3732_v25 = vld [vmem:[%s6508_s1 + $0x6e8] sm:$0xf] }
  0xb3   :  { %2278 = vmatpush.bf16.msrb.mxu2 %v3429_v60  ;;  %v4179_v60 = vld [vmem:[%s6508_s1 + $0x534] sm:$0xf0]  ;;  %v3972_v41 = vld [vmem:[%s6508_s1 + $0x8c8] sm:$0xf] }
  0xb4   :  { %2259 = vmatpush.bf16.msrb.mxu1 %v3301_v3  ;;  %v5641_v2 = vadd.f32 %v1925_v52, %v1907_v49  ;;  %v3509_v15 = vor.u32 %v4179_v60, %v3508_v59  ;;  %v4231_v49 = vld [vmem:[%s6508_s1 + $0x6d4] sm:$0xf0]  ;;  %v3844_v52 = vld [vmem:[%s6508_s1 + $0x7c8] sm:$0xf]  ;;  %v4037_v60 = vld [vmem:[%s6508_s1 + $0xcc] sm:$0xf] }
  0xb5   :  { %2240 = vmatpush.bf16.msrb.mxu0 %v3173_v61  ;;  %v1890_v61 = vpop.f32.mrf.mxu1  ;;  %v4263_v59 = vld [vmem:[%s6508_s1 + $0x7d4] sm:$0xf0]  ;;  %v3717_v63 = vor.u32 %v4231_v49, %v3716_v47  ;;  %v3956_v7 = vld [vmem:[%s6508_s1 + $0x8a8] sm:$0xf] }
  0xb6   :  { %2297 = vmatpush.bf16.msrb.mxu3 %v3557_v4  ;;  %v1891_v3 = vadd.f32 %v1890_v61, %v1871_v55  ;;  %v3125_v4 = vor.u32 %v4083_v46, %v3124_v45  ;;  %v2969_v46 = vor.u32 %v4041_v31, %v2966_v32  ;;  %v2950_v61 = vld [vmem:[%s6508_s1 + $0xd8] sm:$0xf0]  ;;  %v3828_v16 = vld [vmem:[%s6508_s1 + $0x7a8] sm:$0xf]  ;;  %v4287_v32 = vld [vmem:[%s6508_s1 + $0x894] sm:$0xf0] }
  0xb7   :  { %2279 = vmatpush.bf16.msrb.mxu2 %v3413_v23  ;;  %2193 = vmatmul.bf16.gmra.mxu1 %v5213_v21  ;;  %v4299_v23 = vld [vmem:[%s6508_s1 + $0x8f4] sm:$0xf0]  ;;  %v3940_v31 = vld [vmem:[%s6508_s1 + $0x888] sm:$0xf] }
  0xb8   :  { %2260 = vmatpush.bf16.msrb.mxu1 %v3285_v29  ;;  %2174 = vmatmul.bf16.gmra.mxu0 %v5000_v14  ;;  %v3109_v29 = vor.u32 %v4079_v11, %v3108_v10  ;;  %v3989_v39 = vor.u32 %v4299_v23, %v3988_v22  ;;  %v4291_v10 = vld [vmem:[%s6508_s1 + $0x8b4] sm:$0xf0]  ;;  %v4033_v22 = vld [vmem:[%s6508_s1 + $0xac] sm:$0xf]  ;;  %v2934_v23 = vld [vmem:[%s6508_s1 + $0xb8] sm:$0xf0] }
  0xb9   :  { %2241 = vmatpush.bf16.msrb.mxu0 %v3157_v26  ;;  %2212 = vmatmul.bf16.gmra.mxu2 %v4697_v44  ;;  %v4235_v26 = vld [vmem:[%s6508_s1 + $0x6f4] sm:$0xf0]  ;;  %v3668_v49 = vld [vmem:[%s6508_s1 + $0x668] sm:$0xf] }
  0xba   :  { %2298 = vmatpush.bf16.msrb.mxu3 %v3541_v30  ;;  %v4267_v30 = vld [vmem:[%s6508_s1 + $0x7f4] sm:$0xf0]  ;;  %v1909_v33 = vpop.f32.mrf.mxu2  ;;  %v3733_v40 = vor.u32 %v4235_v26, %v3732_v25 }
  0xbb   :  { %2280 = vmatpush.bf16.msrb.mxu2 %v3397_v37  ;;  %2231 = vmatmul.bf16.gmra.mxu3 %v4708_v50  ;;  %v1910_v36 = vadd.f32 %v1909_v33, %v1891_v3  ;;  %v1928_v37 = vpop.f32.mrf.mxu3  ;;  %v3861_v45 = vor.u32 %v4267_v30, %v3860_v27  ;;  %v3845_v3 = vor.u32 %v4263_v59, %v3844_v52  ;;  %v4219_v52 = vld [vmem:[%s6508_s1 + $0x674] sm:$0xf0] }
  0xbc   :  { %2261 = vmatpush.bf16.msrb.mxu1 %v3269_v42  ;;  %v4295_v42 = vld [vmem:[%s6508_s1 + $0x8d4] sm:$0xf0]  ;;  %v3829_v33 = vor.u32 %v4259_v20, %v3828_v16 }
  0xbd   :  { %2242 = vmatpush.bf16.msrb.mxu0 %v3141_v38  ;;  %v1873_v38 = vpop.f32.mrf.mxu0  ;;  %v5707_v55 = vadd.f32 %v1928_v37, %v1910_v36  ;;  %v3812_v36 = vld [vmem:[%s6508_s1 + $0x788] sm:$0xf]  ;;  %v4279_v16 = vld [vmem:[%s6508_s1 + $0x854] sm:$0xf0] }
  0xbe   :  { %2299 = vmatpush.bf16.msrb.mxu3 %v3525_v43  ;;  %v1892_v43 = vpop.f32.mrf.mxu1 }
  0xbf   :  { %2281 = vmatpush.bf16.msrb.mxu2 %v3381_v62  ;;  %v1893_v58 = vadd.f32 %v1892_v43, %v1873_v38  ;;  %v3973_v62 = vor.u32 %v4295_v42, %v3972_v41  ;;  %v4255_v38 = vld [vmem:[%s6508_s1 + $0x794] sm:$0xf0]  ;;  %v3941_v41 = vor.u32 %v4287_v32, %v3940_v31  ;;  %v3924_v43 = vld [vmem:[%s6508_s1 + $0x868] sm:$0xf] }
  0xc0   :  { %2262 = vmatpush.bf16.msrb.mxu1 %v3253_v12  ;;  %v3700_v12 = vld [vmem:[%s6508_s1 + $0x6a8] sm:$0xf] }
  0xc1   :  { %2243 = vmatpush.bf16.msrb.mxu0 %v3125_v4  ;;  %v2953_v4 = vor.u32 %v4037_v60, %v2950_v61  ;;  %v4251_v61 = vld [vmem:[%s6508_s1 + $0x774] sm:$0xf0]  ;;  %v3892_v32 = vld [vmem:[%s6508_s1 + $0x828] sm:$0xf] }
  0xc2   :  { %2300 = vmatpush.bf16.msrb.mxu3 %v3509_v15  ;;  %v1911_v11 = vpop.f32.mrf.mxu2  ;;  %v4227_v15 = vld [vmem:[%s6508_s1 + $0x6b4] sm:$0xf0] }
  0xc3   :  { %2282 = vmatpush.bf16.msrb.mxu2 %v3365_v28  ;;  %v1912_v18 = vadd.f32 %v1911_v11, %v1893_v58  ;;  %v1930_v19 = vpop.f32.mrf.mxu3  ;;  %v3701_v30 = vor.u32 %v4227_v15, %v3700_v12  ;;  %v3796_v58 = vld [vmem:[%s6508_s1 + $0x768] sm:$0xf]  ;;  %v3669_v12 = vor.u32 %v4219_v52, %v3668_v49 }
  0xc4   :  { %2263 = vmatpush.bf16.msrb.mxu1 %v3237_v34  ;;  %v2937_v34 = vor.u32 %v4033_v22, %v2934_v23  ;;  %v3908_v15 = vld [vmem:[%s6508_s1 + $0x848] sm:$0xf]  ;;  %v4215_v22 = vld [vmem:[%s6508_s1 + $0x654] sm:$0xf0] }
  0xc5   :  { %2244 = vmatpush.bf16.msrb.mxu0 %v3109_v29  ;;  %v1942_v25 = vpop.f32.mrf.mxu0  ;;  %v5742_v27 = vadd.f32 %v1930_v19, %v1912_v18  ;;  %v3957_v29 = vor.u32 %v4291_v10, %v3956_v7  ;;  %v3797_v19 = vor.u32 %v4251_v61, %v3796_v58  ;;  %v3780_v23 = vld [vmem:[%s6508_s1 + $0x748] sm:$0xf]  ;;  %v4207_v61 = vld [vmem:[%s6508_s1 + $0x614] sm:$0xf0] }
  0xc6   :  { %2301 = vmatpush.bf16.msrb.mxu3 %v3493_v35  ;;  %v1961_v26 = vpop.f32.mrf.mxu1  ;;  %v1943_v28 = vadd.f32 %v1942_v25, %v5588_v24  ;;  %v3684_v35 = vld [vmem:[%s6508_s1 + $0x688] sm:$0xf]  ;;  %v4223_v24 = vld [vmem:[%s6508_s1 + $0x694] sm:$0xf0] }
  0xc7   :  { %2351 = vmatpush.bf16.msra.mxu2 %v3989_v39  ;;  %2264 = vmatmul.bf16.vlgmr.msrb.gmra.mxu1 %v4586_v57  ;;  %v4029_v39 = vld [vmem:[%s6508_s1 + $0x8c] sm:$0xf]  ;;  %v3685_v42 = vor.u32 %v4223_v24, %v3684_v35  ;;  %v3636_v24 = vld [vmem:[%s6508_s1 + $0x628] sm:$0xf] }
  0xc8   :  { %2332 = vmatpush.bf16.msra.mxu1 %v3861_v45  ;;  %v1962_v37 = vadd.f32 %v1961_v26, %v1943_v28  ;;  %2245 = vmatmul.bf16.vlgmr.msrb.gmra.mxu0 %v4578_v54  ;;  %v4283_v45 = vld [vmem:[%s6508_s1 + $0x874] sm:$0xf0]  ;;  %v4021_v28 = vld [vmem:[%s6508_s1 + $0x4c] sm:$0xf] }
  0xc9   :  { %2313 = vmatpush.bf16.msra.mxu0 %v3733_v40  ;;  %v2918_v40 = vld [vmem:[%s6508_s1 + $0x98] sm:$0xf0]  ;;  %2283 = vmatmul.bf16.vlgmr.msrb.gmra.mxu2 %v4853_v0  ;;  %v3925_v11 = vor.u32 %v4283_v45, %v3924_v43  ;;  %v4247_v26 = vld [vmem:[%s6508_s1 + $0x754] sm:$0xf0] }
  0xca   :  { %2370 = vmatpush.bf16.msra.mxu3 %v2969_v46  ;;  %v3813_v46 = vor.u32 %v4255_v38, %v3812_v36  ;;  %v2921_v47 = vor.u32 %v4029_v39, %v2918_v40  ;;  %v4211_v36 = vld [vmem:[%s6508_s1 + $0x634] sm:$0xf0] }
  0xcb   :  { %2352 = vmatpush.bf16.msra.mxu2 %v3973_v62  ;;  %2302 = vmatmul.bf16.vlgmr.msrb.gmra.mxu3 %v4855_v1  ;;  %v4025_v62 = vld [vmem:[%s6508_s1 + $0x6c] sm:$0xf]  ;;  %v4243_v40 = vld [vmem:[%s6508_s1 + $0x734] sm:$0xf0]  ;;  %v3637_v58 = vor.u32 %v4211_v36, %v3636_v24 }
  0xcc   :  { %2333 = vmatpush.bf16.msra.mxu1 %v3845_v3  ;;  %v1980_v59 = vpop.f32.mrf.mxu2 }
  0xcd   :  { %2314 = vmatpush.bf16.msra.mxu0 %v3717_v63  ;;  %v2902_v63 = vld [vmem:[%s6508_s1 + $0x78] sm:$0xf0]  ;;  %v1981_v3 = vadd.f32 %v1980_v59, %v1962_v37  ;;  %v3764_v37 = vld [vmem:[%s6508_s1 + $0x728] sm:$0xf]  ;;  %v4271_v59 = vld [vmem:[%s6508_s1 + $0x814] sm:$0xf0] }
  0xce   :  { %2371 = vmatpush.bf16.msra.mxu3 %v2953_v4  ;;  %v1999_v60 = vpop.f32.mrf.mxu3  ;;  %v1944_v4 = vpop.f32.mrf.mxu0  ;;  %v2905_v20 = vor.u32 %v4025_v62, %v2902_v63 }
  0xcf   :  { %2353 = vmatpush.bf16.msra.mxu2 %v3957_v29  ;;  %v1963_v7 = vpop.f32.mrf.mxu1  ;;  %v1945_v10 = vadd.f32 %v1944_v4, %v5641_v2  ;;  %v5804_v18 = vadd.f32 %v1999_v60, %v1981_v3  ;;  %v3652_v2 = vld [vmem:[%s6508_s1 + $0x648] sm:$0xf]  ;;  %v2886_v29 = vld [vmem:[%s6508_s1 + $0x58] sm:$0xf0]  ;;  %v4239_v4 = vld [vmem:[%s6508_s1 + $0x714] sm:$0xf0] }
  0xd0   :  { %2334 = vmatpush.bf16.msra.mxu1 %v3829_v33  ;;  %v3653_v31 = vor.u32 %v4215_v22, %v3652_v2  ;;  %v4275_v33 = vld [vmem:[%s6508_s1 + $0x834] sm:$0xf0]  ;;  %v2889_v35 = vor.u32 %v4021_v28, %v2886_v29  ;;  %v3620_v60 = vld [vmem:[%s6508_s1 + $0x608] sm:$0xf] }
  0xd1   :  { %2315 = vmatpush.bf16.msra.mxu0 %v3701_v30  ;;  %v1964_v25 = vadd.f32 %v1963_v7, %v1945_v10  ;;  %v3909_v30 = vor.u32 %v4279_v16, %v3908_v15  ;;  %v3893_v52 = vor.u32 %v4275_v33, %v3892_v32  ;;  %v3748_v3 = vld [vmem:[%s6508_s1 + $0x708] sm:$0xf]  ;;  %v4013_v7 = vld [vmem:[%s6508_s1 + $0xc] sm:$0xf]  ;;  %v3350_v15 = vld [vmem:[%s6508_s1 + $0x3f8] sm:$0xf0]  ;;  %v3621_v22 = vor.u32 %v4207_v61, %v3620_v60 }
  0xd2   :  { %2372 = vmatpush.bf16.msra.mxu3 %v2937_v34  ;;  %v3781_v34 = vor.u32 %v4247_v26, %v3780_v23  ;;  %v4073_v16 = vld [vmem:[%s6508_s1 + $0x1ec] sm:$0xf]  ;;  %v3222_v23 = vld [vmem:[%s6508_s1 + $0x2f8] sm:$0xf0]  ;;  %v3749_v28 = vor.u32 %v4239_v4, %v3748_v3 }
  0xd3   :  { %2354 = vmatpush.bf16.msra.mxu2 %v3941_v41  ;;  %v4017_v41 = vld [vmem:[%s6508_s1 + $0x2c] sm:$0xf]  ;;  %v3478_v26 = vld [vmem:[%s6508_s1 + $0x4f8] sm:$0xf0] }
  0xd4   :  { %2335 = vmatpush.bf16.msra.mxu1 %v3813_v46  ;;  %v1982_v38 = vpop.f32.mrf.mxu2  ;;  %v4129_v61 = vld [vmem:[%s6508_s1 + $0x3ac] sm:$0xf]  ;;  %v3062_v3 = vld [vmem:[%s6508_s1 + $0x1b8] sm:$0xf0] }
  0xd5   :  { %2316 = vmatpush.bf16.msra.mxu0 %v3685_v42  ;;  %v2870_v42 = vld [vmem:[%s6508_s1 + $0x38] sm:$0xf0]  ;;  %v1983_v43 = vadd.f32 %v1982_v38, %v1964_v25  ;;  %v4169_v25 = vld [vmem:[%s6508_s1 + $0x4ec] sm:$0xf] }
  0xd6   :  { %2373 = vmatpush.bf16.msra.mxu3 %v2921_v47  ;;  %v2001_v39 = vpop.f32.mrf.mxu3  ;;  %v1947_v45 = vpop.f32.mrf.mxu0  ;;  %v3876_v47 = vld [vmem:[%s6508_s1 + $0x808] sm:$0xf]  ;;  %v2873_v63 = vor.u32 %v4017_v41, %v2870_v42  ;;  %v3078_v41 = vld [vmem:[%s6508_s1 + $0x1d8] sm:$0xf0]  ;;  %v4101_v42 = vld [vmem:[%s6508_s1 + $0x2cc] sm:$0xf] }
  0xd7   :  { %2355 = vmatpush.bf16.msra.mxu2 %v3925_v11  ;;  %v1966_v46 = vpop.f32.mrf.mxu1  ;;  %v1948_v49 = vadd.f32 %v1947_v45, %v5707_v55  ;;  %v5861_v62 = vadd.f32 %v2001_v39, %v1983_v43  ;;  %v3765_v55 = vor.u32 %v4243_v40, %v3764_v37  ;;  %2269 = vmatmul.bf16.gmra.mxu1 %v4718_v56  ;;  %v2854_v11 = vld [vmem:[%s6508_s1 + $0x18] sm:$0xf0]  ;;  %v4069_v40 = vld [vmem:[%s6508_s1 + $0x1cc] sm:$0xf] }
  0xd8   :  { %2336 = vmatpush.bf16.msra.mxu1 %v3797_v19  ;;  %2250 = vmatmul.bf16.gmra.mxu0 %v4710_v51  ;;  %v3094_v19 = vld [vmem:[%s6508_s1 + $0x1f8] sm:$0xf0]  ;;  %v3877_v2 = vor.u32 %v4271_v59, %v3876_v47  ;;  %v2857_v29 = vor.u32 %v4013_v7, %v2854_v11  ;;  %v3481_v39 = vor.u32 %v4169_v25, %v3478_v26  ;;  %v4097_v4 = vld [vmem:[%s6508_s1 + $0x2ac] sm:$0xf] }
  0xd9   :  { %2317 = vmatpush.bf16.msra.mxu0 %v3669_v12  ;;  %v1967_v10 = vadd.f32 %v1966_v46, %v1948_v49  ;;  %v4137_v12 = vld [vmem:[%s6508_s1 + $0x3ec] sm:$0xf]  ;;  %2288 = vmatmul.bf16.gmra.mxu2 %v4985_v8  ;;  %v3097_v33 = vor.u32 %v4073_v16, %v3094_v19  ;;  %v3206_v45 = vld [vmem:[%s6508_s1 + $0x2d8] sm:$0xf0] }
  0xda   :  { %2374 = vmatpush.bf16.msra.mxu3 %v2905_v20  ;;  %v4105_v20 = vld [vmem:[%s6508_s1 + $0x2ec] sm:$0xf]  ;;  %v3353_v32 = vor.u32 %v4137_v12, %v3350_v15  ;;  %v3462_v47 = vld [vmem:[%s6508_s1 + $0x4d8] sm:$0xf0]  ;;  %v3209_v59 = vor.u32 %v4101_v42, %v3206_v45 }
  0xdb   :  { %2356 = vmatpush.bf16.msra.mxu2 %v3909_v30  ;;  %2307 = vmatmul.bf16.gmra.mxu3 %v4987_v9  ;;  %v3225_v38 = vor.u32 %v4105_v20, %v3222_v23  ;;  %v4165_v46 = vld [vmem:[%s6508_s1 + $0x4cc] sm:$0xf]  ;;  %v3190_v11 = vld [vmem:[%s6508_s1 + $0x2b8] sm:$0xf0] }
  0xdc   :  { %2337 = vmatpush.bf16.msra.mxu1 %v3781_v34  ;;  %v1985_v30 = vpop.f32.mrf.mxu2  ;;  %v4133_v34 = vld [vmem:[%s6508_s1 + $0x3cc] sm:$0xf]  ;;  %v3465_v60 = vor.u32 %v4165_v46, %v3462_v47  ;;  %v3446_v15 = vld [vmem:[%s6508_s1 + $0x4b8] sm:$0xf0] }
  0xdd   :  { %2318 = vmatpush.bf16.msra.mxu0 %v3653_v31  ;;  %v1986_v24 = vadd.f32 %v1985_v30, %v1967_v10  ;;  %v4161_v12 = vld [vmem:[%s6508_s1 + $0x4ac] sm:$0xf]  ;;  %v3302_v26 = vld [vmem:[%s6508_s1 + $0x398] sm:$0xf0] }
  0xde   :  { %2375 = vmatpush.bf16.msra.mxu3 %v2889_v35  ;;  %v2004_v31 = vpop.f32.mrf.mxu3  ;;  %v3334_v35 = vld [vmem:[%s6508_s1 + $0x3d8] sm:$0xf0]  ;;  %v1949_v36 = vpop.f32.mrf.mxu0  ;;  %v4125_v25 = vld [vmem:[%s6508_s1 + $0x38c] sm:$0xf]  ;;  %v3449_v30 = vor.u32 %v4161_v12, %v3446_v15 }
  0xdf   :  { %2357 = vmatpush.bf16.msra.mxu2 %v3893_v52  ;;  %v1968_v37 = vpop.f32.mrf.mxu1  ;;  %v1950_v43 = vadd.f32 %v1949_v36, %v5742_v27  ;;  %v5928_v49 = vadd.f32 %v2004_v31, %v1986_v24  ;;  %v3337_v27 = vor.u32 %v4133_v34, %v3334_v35  ;;  %v4061_v31 = vld [vmem:[%s6508_s1 + $0x18c] sm:$0xf]  ;;  %v3430_v35 = vld [vmem:[%s6508_s1 + $0x498] sm:$0xf0]  ;;  %v3305_v24 = vor.u32 %v4125_v25, %v3302_v26 }
  0xe0   :  { %2338 = vmatpush.bf16.msra.mxu1 %v3765_v55  ;;  %v3318_v55 = vld [vmem:[%s6508_s1 + $0x3b8] sm:$0xf0]  ;;  %v4157_v34 = vld [vmem:[%s6508_s1 + $0x48c] sm:$0xf] }
  0xe1   :  { %2319 = vmatpush.bf16.msra.mxu0 %v3637_v58  ;;  %v1969_v52 = vadd.f32 %v1968_v37, %v1950_v43  ;;  %v3081_v58 = vor.u32 %v4069_v40, %v3078_v41  ;;  %v4121_v37 = vld [vmem:[%s6508_s1 + $0x36c] sm:$0xf]  ;;  %v3433_v40 = vor.u32 %v4157_v34, %v3430_v35  ;;  %v3030_v41 = vld [vmem:[%s6508_s1 + $0x178] sm:$0xf0] }
  0xe2   :  { %2376 = vmatpush.bf16.msra.mxu3 %v2873_v63  ;;  %v4065_v63 = vld [vmem:[%s6508_s1 + $0x1ac] sm:$0xf]  ;;  %v3158_v46 = vld [vmem:[%s6508_s1 + $0x278] sm:$0xf0] }
  0xe3   :  { %2358 = vmatpush.bf16.msra.mxu2 %v3877_v2  ;;  %v3065_v23 = vor.u32 %v4065_v63, %v3062_v3  ;;  %v4089_v42 = vld [vmem:[%s6508_s1 + $0x26c] sm:$0xf]  ;;  %v3270_v3 = vld [vmem:[%s6508_s1 + $0x358] sm:$0xf0] }
  0xe4   :  { %2339 = vmatpush.bf16.msra.mxu1 %v3749_v28  ;;  %v1987_v7 = vpop.f32.mrf.mxu2  ;;  %v4153_v47 = vld [vmem:[%s6508_s1 + $0x46c] sm:$0xf]  ;;  %v3254_v26 = vld [vmem:[%s6508_s1 + $0x338] sm:$0xf0] }
  0xe5   :  { %2320 = vmatpush.bf16.msra.mxu0 %v3621_v22  ;;  %v1988_v16 = vadd.f32 %v1987_v7, %v1969_v52  ;;  %v3321_v22 = vor.u32 %v4129_v61, %v3318_v55  ;;  %v3414_v52 = vld [vmem:[%s6508_s1 + $0x478] sm:$0xf0]  ;;  %v4117_v63 = vld [vmem:[%s6508_s1 + $0x34c] sm:$0xf]  ;;  %v3161_v7 = vor.u32 %v4089_v42, %v3158_v46 }
  0xe6   :  { %2377 = vmatpush.bf16.msra.mxu3 %v2857_v29  ;;  %v2006_v10 = vpop.f32.mrf.mxu3  ;;  %v2018_v19 = vpop.f32.mrf.mxu0  ;;  %v3193_v29 = vor.u32 %v4097_v4, %v3190_v11  ;;  %v3014_v11 = vld [vmem:[%s6508_s1 + $0x158] sm:$0xf0]  ;;  %v4085_v12 = vld [vmem:[%s6508_s1 + $0x24c] sm:$0xf] }
  0xe7   :  { %2427 = vmatpush.bf16.msrb.mxu2 %v3353_v32  ;;  %v2037_v20 = vpop.f32.mrf.mxu1  ;;  %v5955_v2 = vadd.f32 %v2018_v19, %v5804_v18  ;;  %v5963_v28 = vadd.f32 %v2006_v10, %v1988_v16  ;;  %v3046_v18 = vld [vmem:[%s6508_s1 + $0x198] sm:$0xf0]  ;;  %v4093_v32 = vld [vmem:[%s6508_s1 + $0x28c] sm:$0xf]  ;;  %2340 = vmatmul.bf16.vlgmr.msra.gmra.mxu1 %v4868_v6  ;;  %v3417_v10 = vor.u32 %v4153_v47, %v3414_v52 }
  0xe8   :  { %2408 = vmatpush.bf16.msrb.mxu1 %v3225_v38  ;;  %2321 = vmatmul.bf16.vlgmr.msra.gmra.mxu0 %v4866_v5  ;;  %v3049_v36 = vor.u32 %v4061_v31, %v3046_v18  ;;  %v3286_v38 = vld [vmem:[%s6508_s1 + $0x378] sm:$0xf0]  ;;  %v4149_v19 = vld [vmem:[%s6508_s1 + $0x44c] sm:$0xf] }
  0xe9   :  { %2389 = vmatpush.bf16.msrb.mxu0 %v3097_v33  ;;  %v3174_v33 = vld [vmem:[%s6508_s1 + $0x298] sm:$0xf0]  ;;  %2359 = vmatmul.bf16.vlgmr.msra.gmra.mxu2 %v5105_v17  ;;  %v3289_v61 = vor.u32 %v4121_v37, %v3286_v38  ;;  %v4113_v25 = vld [vmem:[%s6508_s1 + $0x32c] sm:$0xf] }
  0xea   :  { %2446 = vmatpush.bf16.msrb.mxu3 %v3481_v39  ;;  %v3177_v39 = vor.u32 %v4093_v32, %v3174_v33  ;;  %v3142_v16 = vld [vmem:[%s6508_s1 + $0x258] sm:$0xf0]  ;;  %v4049_v31 = vld [vmem:[%s6508_s1 + $0x12c] sm:$0xf] }
  0xeb   :  { %2428 = vmatpush.bf16.msrb.mxu2 %v3337_v27  ;;  %2378 = vmatmul.bf16.vlgmr.msra.gmra.mxu3 %v4565_v48  ;;  %v4057_v48 = vld [vmem:[%s6508_s1 + $0x16c] sm:$0xf]  ;;  %v2998_v18 = vld [vmem:[%s6508_s1 + $0x138] sm:$0xf0] }
  0xec   :  { %2409 = vmatpush.bf16.msrb.mxu1 %v3209_v59  ;;  %v2056_v43 = vpop.f32.mrf.mxu2  ;;  %v3033_v55 = vor.u32 %v4057_v48, %v3030_v41  ;;  %v4081_v32 = vld [vmem:[%s6508_s1 + $0x22c] sm:$0xf]  ;;  %v3126_v35 = vld [vmem:[%s6508_s1 + $0x238] sm:$0xf0]  ;;  %v3257_v41 = vor.u32 %v4113_v25, %v3254_v26  ;;  %v3001_v42 = vor.u32 %v4049_v31, %v2998_v18 }
  0xed   :  { %2390 = vmatpush.bf16.msrb.mxu0 %v3081_v58  ;;  %v2057_v27 = vadd.f32 %v2056_v43, %v2037_v20  ;;  %v3398_v20 = vld [vmem:[%s6508_s1 + $0x458] sm:$0xf0] }
  0xee   :  { %2447 = vmatpush.bf16.msrb.mxu3 %v3465_v60  ;;  %v2075_v45 = vpop.f32.mrf.mxu3  ;;  %v2020_v58 = vpop.f32.mrf.mxu0  ;;  %v3238_v43 = vld [vmem:[%s6508_s1 + $0x318] sm:$0xf0] }
  0xef   :  { %2429 = vmatpush.bf16.msrb.mxu2 %v3321_v22  ;;  %v2039_v59 = vpop.f32.mrf.mxu1  ;;  %v6012_v60 = vadd.f32 %v2020_v58, %v5861_v62  ;;  %v6020_v4 = vadd.f32 %v2075_v45, %v2057_v27  ;;  %v4053_v62 = vld [vmem:[%s6508_s1 + $0x14c] sm:$0xf]  ;;  %v3273_v22 = vor.u32 %v4117_v63, %v3270_v3  ;;  %v2982_v46 = vld [vmem:[%s6508_s1 + $0x118] sm:$0xf0] }
  0xf0   :  { %2410 = vmatpush.bf16.msrb.mxu1 %v3193_v29  ;;  %v3145_v29 = vor.u32 %v4085_v12, %v3142_v16  ;;  %v4045_v45 = vld [vmem:[%s6508_s1 + $0x10c] sm:$0xf]  ;;  %v3110_v58 = vld [vmem:[%s6508_s1 + $0x218] sm:$0xf0] }
  0xf1   :  { %2391 = vmatpush.bf16.msrb.mxu0 %v3065_v23  ;;  %v2541_v15 = vadd.f32 %v6012_v60, %v5955_v2  ;;  %v3017_v23 = vor.u32 %v4053_v62, %v3014_v11  ;;  %v4077_v27 = vld [vmem:[%s6508_s1 + $0x20c] sm:$0xf]  ;;  %v3862_v3 = vld [vmem:[%s6508_s1 + $0x7f8] sm:$0xf0]  ;;  %v2985_v12 = vor.u32 %v4045_v45, %v2982_v46 }
  0xf2   :  { %2448 = vmatpush.bf16.msrb.mxu3 %v3449_v30  ;;  %v3401_v30 = vor.u32 %v4149_v19, %v3398_v20  ;;  %v4265_v63 = vld [vmem:[%s6508_s1 + $0x7ec] sm:$0xf]  ;;  %v3990_v16 = vld [vmem:[%s6508_s1 + $0x8f8] sm:$0xf0]  ;;  %v3113_v19 = vor.u32 %v4077_v27, %v3110_v58 }
  0xf3   :  { %2430 = vmatpush.bf16.msrb.mxu2 %v3305_v24  ;;  %v4145_v24 = vld [vmem:[%s6508_s1 + $0x42c] sm:$0xf]  ;;  %v3865_v25 = vor.u32 %v4265_v63, %v3862_v3  ;;  %v3574_v58 = vld [vmem:[%s6508_s1 + $0x5b8] sm:$0xf0] }
  0xf4   :  { %2411 = vmatpush.bf16.msrb.mxu1 %v3177_v39  ;;  %v2058_v33 = vpop.f32.mrf.mxu2  ;;  %v4233_v62 = vld [vmem:[%s6508_s1 + $0x6ec] sm:$0xf]  ;;  %v3702_v63 = vld [vmem:[%s6508_s1 + $0x6b8] sm:$0xf0] }
  0xf5   :  { %2392 = vmatpush.bf16.msrb.mxu0 %v3049_v36  ;;  %v3382_v36 = vld [vmem:[%s6508_s1 + $0x438] sm:$0xf0]  ;;  %v2059_v37 = vadd.f32 %v2058_v33, %v2039_v59  ;;  %v4141_v59 = vld [vmem:[%s6508_s1 + $0x40c] sm:$0xf] }
  0xf6   :  { %2449 = vmatpush.bf16.msrb.mxu3 %v3433_v40  ;;  %v2077_v34 = vpop.f32.mrf.mxu3  ;;  %v2023_v38 = vpop.f32.mrf.mxu0  ;;  %v4109_v40 = vld [vmem:[%s6508_s1 + $0x30c] sm:$0xf]  ;;  %v3385_v52 = vor.u32 %v4145_v24, %v3382_v36  ;;  %v3590_v24 = vld [vmem:[%s6508_s1 + $0x5d8] sm:$0xf0] }
  0xf7   :  { %2431 = vmatpush.bf16.msrb.mxu2 %v3289_v61  ;;  %v2042_v39 = vpop.f32.mrf.mxu1  ;;  %v6070_v48 = vadd.f32 %v2023_v38, %v5928_v49  ;;  %v6081_v47 = vadd.f32 %v2077_v34, %v2059_v37  ;;  %v3129_v49 = vor.u32 %v4081_v32, %v3126_v35  ;;  %2345 = vmatmul.bf16.gmra.mxu1 %v5000_v14  ;;  %v4197_v35 = vld [vmem:[%s6508_s1 + $0x5cc] sm:$0xf]  ;;  %v3718_v38 = vld [vmem:[%s6508_s1 + $0x6d8] sm:$0xf0] }
  0xf8   :  { %2412 = vmatpush.bf16.msrb.mxu1 %v3161_v7  ;;  %2326 = vmatmul.bf16.gmra.mxu0 %v4998_v13  ;;  %v4201_v7 = vld [vmem:[%s6508_s1 + $0x5ec] sm:$0xf]  ;;  %v3241_v11 = vor.u32 %v4109_v40, %v3238_v43  ;;  %v3974_v40 = vld [vmem:[%s6508_s1 + $0x8d8] sm:$0xf0]  ;;  %v3593_v43 = vor.u32 %v4197_v35, %v3590_v24 }
  0xf9   :  { %2393 = vmatpush.bf16.msrb.mxu0 %v3033_v55  ;;  %v2542_v61 = vadd.f32 %v2541_v15, %v6070_v48  ;;  %v3366_v55 = vld [vmem:[%s6508_s1 + $0x418] sm:$0xf0]  ;;  %2364 = vmatmul.bf16.gmra.mxu2 %v5213_v21  ;;  %v4297_v15 = vld [vmem:[%s6508_s1 + $0x8ec] sm:$0xf] }
  0xfa   :  { %2450 = vmatpush.bf16.msrb.mxu3 %v3417_v10  ;;  %v3606_v10 = vld [vmem:[%s6508_s1 + $0x5f8] sm:$0xf0]  ;;  %v3369_v20 = vor.u32 %v4141_v59, %v3366_v55  ;;  %v3993_v34 = vor.u32 %v4297_v15, %v3990_v16  ;;  %v4229_v36 = vld [vmem:[%s6508_s1 + $0x6cc] sm:$0xf] }
  0xfb   :  { %2432 = vmatpush.bf16.msrb.mxu2 %v3273_v22  ;;  %2383 = vmatmul.bf16.gmra.mxu3 %v4697_v44  ;;  %v3734_v44 = vld [vmem:[%s6508_s1 + $0x6f8] sm:$0xf0]  ;;  %v3609_v26 = vor.u32 %v4201_v7, %v3606_v10  ;;  %v3721_v45 = vor.u32 %v4229_v36, %v3718_v38  ;;  %v4193_v27 = vld [vmem:[%s6508_s1 + $0x5ac] sm:$0xf] }
  0xfc   :  { %2413 = vmatpush.bf16.msrb.mxu1 %v3145_v29  ;;  %v2061_v22 = vpop.f32.mrf.mxu2  ;;  %v4261_v29 = vld [vmem:[%s6508_s1 + $0x7cc] sm:$0xf]  ;;  %v3737_v33 = vor.u32 %v4233_v62, %v3734_v44  ;;  %v3958_v7 = vld [vmem:[%s6508_s1 + $0x8b8] sm:$0xf0]  ;;  %v3577_v15 = vor.u32 %v4193_v27, %v3574_v58 }
  0xfd   :  { %2394 = vmatpush.bf16.msrb.mxu0 %v3017_v23  ;;  %v2062_v31 = vadd.f32 %v2061_v22, %v2042_v39  ;;  %v4293_v39 = vld [vmem:[%s6508_s1 + $0x8cc] sm:$0xf] }
  0xfe   :  { %2451 = vmatpush.bf16.msrb.mxu3 %v3401_v30  ;;  %v2080_v23 = vpop.f32.mrf.mxu3  ;;  %v3846_v30 = vld [vmem:[%s6508_s1 + $0x7d8] sm:$0xf0]  ;;  %v2025_v18 = vpop.f32.mrf.mxu0  ;;  %v3977_v46 = vor.u32 %v4293_v39, %v3974_v40  ;;  %v4225_v59 = vld [vmem:[%s6508_s1 + $0x6ac] sm:$0xf] }
  0xff   :  { %2433 = vmatpush.bf16.msrb.mxu2 %v3257_v41  ;;  %v2044_v32 = vpop.f32.mrf.mxu1  ;;  %v6140_v37 = vadd.f32 %v2025_v18, %v5963_v28  ;;  %v6151_v41 = vadd.f32 %v2080_v23, %v2062_v31  ;;  %v4289_v3 = vld [vmem:[%s6508_s1 + $0x8ac] sm:$0xf]  ;;  %v3705_v22 = vor.u32 %v4225_v59, %v3702_v63  ;;  %v3942_v18 = vld [vmem:[%s6508_s1 + $0x898] sm:$0xf0] }
 0x100   :  { %2414 = vmatpush.bf16.msrb.mxu1 %v3129_v49  ;;  %v4257_v49 = vld [vmem:[%s6508_s1 + $0x7ac] sm:$0xf]  ;;  %v3961_v23 = vor.u32 %v4289_v3, %v3958_v7  ;;  %v3670_v39 = vld [vmem:[%s6508_s1 + $0x678] sm:$0xf0] }
 0x101   :  { %2395 = vmatpush.bf16.msrb.mxu0 %v3001_v42  ;;  %v6154_v28 = vadd.f32 %v2542_v61, %v6140_v37  ;;  %v3849_v42 = vor.u32 %v4261_v29, %v3846_v30  ;;  %v4253_v16 = vld [vmem:[%s6508_s1 + $0x78c] sm:$0xf]  ;;  %v3686_v30 = vld [vmem:[%s6508_s1 + $0x698] sm:$0xf0] }
 0x102   :  { %2452 = vmatpush.bf16.msrb.mxu3 %v3385_v52  ;;  %v3830_v52 = vld [vmem:[%s6508_s1 + $0x7b8] sm:$0xf0]  ;;  %v4285_v31 = vld [vmem:[%s6508_s1 + $0x88c] sm:$0xf] }
 0x103   :  { %2434 = vmatpush.bf16.msrb.mxu2 %v3241_v11  ;;  %v3833_v44 = vor.u32 %v4257_v49, %v3830_v52  ;;  %v3945_v35 = vor.u32 %v4285_v31, %v3942_v18  ;;  %v4217_v24 = vld [vmem:[%s6508_s1 + $0x66c] sm:$0xf]  ;;  %v3782_v59 = vld [vmem:[%s6508_s1 + $0x758] sm:$0xf0] }
 0x104   :  { %2415 = vmatpush.bf16.msrb.mxu1 %v3113_v19  ;;  %v2063_v61 = vpop.f32.mrf.mxu2  ;;  %v3814_v19 = vld [vmem:[%s6508_s1 + $0x798] sm:$0xf0]  ;;  %v4281_v40 = vld [vmem:[%s6508_s1 + $0x86c] sm:$0xf] }
 0x105   :  { %2396 = vmatpush.bf16.msrb.mxu0 %v2985_v12  ;;  %v2064_v10 = vadd.f32 %v2063_v61, %v2044_v32  ;;  %v4249_v32 = vld [vmem:[%s6508_s1 + $0x76c] sm:$0xf]  ;;  %v3526_v3 = vld [vmem:[%s6508_s1 + $0x558] sm:$0xf0] }
 0x106   :  { %2453 = vmatpush.bf16.msrb.mxu3 %v3369_v20  ;;  %v2082_v55 = vpop.f32.mrf.mxu3  ;;  %v2094_v62 = vpop.f32.mrf.mxu0  ;;  %v4245_v58 = vld [vmem:[%s6508_s1 + $0x74c] sm:$0xf]  ;;  %v3638_v31 = vld [vmem:[%s6508_s1 + $0x638] sm:$0xf0] }
 0x107   :  { %2503 = vmatpush.bf16.msra.mxu2 %v3865_v25  ;;  %v2113_v11 = vpop.f32.mrf.mxu1  ;;  %v2095_v12 = vadd.f32 %v2094_v62, %v6020_v4  ;;  %v6187_v20 = vadd.f32 %v2082_v55, %v2064_v10  ;;  %v4189_v25 = vld [vmem:[%s6508_s1 + $0x58c] sm:$0xf]  ;;  %v3558_v4 = vld [vmem:[%s6508_s1 + $0x598] sm:$0xf0]  ;;  %2416 = vmatmul.bf16.vlgmr.msrb.gmra.mxu1 %v4578_v54  ;;  %v3673_v55 = vor.u32 %v4217_v24, %v3670_v39 }
 0x108   :  { %2484 = vmatpush.bf16.msra.mxu1 %v3737_v33  ;;  %2397 = vmatmul.bf16.vlgmr.msrb.gmra.mxu0 %v4576_v53  ;;  %v3817_v53 = vor.u32 %v4253_v16, %v3814_v19  ;;  %v3561_v54 = vor.u32 %v4189_v25, %v3558_v4  ;;  %v3798_v33 = vld [vmem:[%s6508_s1 + $0x778] sm:$0xf0]  ;;  %v4213_v7 = vld [vmem:[%s6508_s1 + $0x64c] sm:$0xf] }
 0x109   :  { %2465 = vmatpush.bf16.msra.mxu0 %v3609_v26  ;;  %v4221_v26 = vld [vmem:[%s6508_s1 + $0x68c] sm:$0xf]  ;;  %v2114_v29 = vadd.f32 %v2113_v11, %v2095_v12  ;;  %2435 = vmatmul.bf16.vlgmr.msrb.gmra.mxu2 %v4586_v57  ;;  %v3801_v52 = vor.u32 %v4249_v32, %v3798_v33  ;;  %v3654_v62 = vld [vmem:[%s6508_s1 + $0x658] sm:$0xf0] }
 0x10a   :  { %2522 = vmatpush.bf16.msra.mxu3 %v3993_v34  ;;  %v3689_v34 = vor.u32 %v4221_v26, %v3686_v30  ;;  %v4185_v57 = vld [vmem:[%s6508_s1 + $0x56c] sm:$0xf]  ;;  %v3910_v12 = vld [vmem:[%s6508_s1 + $0x858] sm:$0xf0] }
 0x10b   :  { %2504 = vmatpush.bf16.msra.mxu2 %v3849_v42  ;;  %2454 = vmatmul.bf16.vlgmr.msrb.gmra.mxu3 %v4853_v0  ;;  %v3542_v0 = vld [vmem:[%s6508_s1 + $0x578] sm:$0xf0]  ;;  %v4277_v11 = vld [vmem:[%s6508_s1 + $0x84c] sm:$0xf] }
 0x10c   :  { %2485 = vmatpush.bf16.msra.mxu1 %v3721_v45  ;;  %v2132_v36 = vpop.f32.mrf.mxu2  ;;  %v3926_v42 = vld [vmem:[%s6508_s1 + $0x878] sm:$0xf0]  ;;  %v3545_v27 = vor.u32 %v4185_v57, %v3542_v0  ;;  %v4241_v16 = vld [vmem:[%s6508_s1 + $0x72c] sm:$0xf] }
 0x10d   :  { %2466 = vmatpush.bf16.msra.mxu0 %v3593_v43  ;;  %v2133_v43 = vadd.f32 %v2132_v36, %v2114_v29  ;;  %v3929_v63 = vor.u32 %v4281_v40, %v3926_v42  ;;  %v3766_v19 = vld [vmem:[%s6508_s1 + $0x738] sm:$0xf0]  ;;  %v4177_v25 = vld [vmem:[%s6508_s1 + $0x52c] sm:$0xf] }
 0x10e   :  { %2523 = vmatpush.bf16.msra.mxu3 %v3977_v46  ;;  %v2151_v38 = vpop.f32.mrf.mxu3  ;;  %v2096_v45 = vpop.f32.mrf.mxu0  ;;  %v3510_v4 = vld [vmem:[%s6508_s1 + $0x538] sm:$0xf0]  ;;  %v4209_v26 = vld [vmem:[%s6508_s1 + $0x62c] sm:$0xf] }
 0x10f   :  { %2505 = vmatpush.bf16.msra.mxu2 %v3833_v44  ;;  %v2115_v46 = vpop.f32.mrf.mxu1  ;;  %v2097_v49 = vadd.f32 %v2096_v45, %v6081_v47  ;;  %v6242_v61 = vadd.f32 %v2151_v38, %v2133_v43  ;;  %v4181_v47 = vld [vmem:[%s6508_s1 + $0x54c] sm:$0xf]  ;;  %v3785_v44 = vor.u32 %v4245_v58, %v3782_v59  ;;  %v3513_v57 = vor.u32 %v4177_v25, %v3510_v4  ;;  %v3750_v24 = vld [vmem:[%s6508_s1 + $0x718] sm:$0xf0] }
 0x110   :  { %2486 = vmatpush.bf16.msra.mxu1 %v3705_v22  ;;  %v3657_v22 = vor.u32 %v4213_v7, %v3654_v62  ;;  %v4273_v18 = vld [vmem:[%s6508_s1 + $0x82c] sm:$0xf]  ;;  %v3641_v38 = vor.u32 %v4209_v26, %v3638_v31  ;;  %v3494_v40 = vld [vmem:[%s6508_s1 + $0x518] sm:$0xf0] }
 0x111   :  { %2467 = vmatpush.bf16.msra.mxu0 %v3577_v15  ;;  %v2116_v10 = vadd.f32 %v2115_v46, %v2097_v49  ;;  %v3529_v15 = vor.u32 %v4181_v47, %v3526_v3  ;;  %v4237_v0 = vld [vmem:[%s6508_s1 + $0x70c] sm:$0xf]  ;;  %v3622_v45 = vld [vmem:[%s6508_s1 + $0x618] sm:$0xf0] }
 0x112   :  { %2524 = vmatpush.bf16.msra.mxu3 %v3961_v23  ;;  %v3913_v23 = vor.u32 %v4277_v11, %v3910_v12  ;;  %v4205_v42 = vld [vmem:[%s6508_s1 + $0x60c] sm:$0xf]  ;;  %v3878_v49 = vld [vmem:[%s6508_s1 + $0x818] sm:$0xf0] }
 0x113   :  { %2506 = vmatpush.bf16.msra.mxu2 %v3817_v53  ;;  %v3894_v53 = vld [vmem:[%s6508_s1 + $0x838] sm:$0xf0]  ;;  %v4269_v46 = vld [vmem:[%s6508_s1 + $0x80c] sm:$0xf] }
 0x114   :  { %2487 = vmatpush.bf16.msra.mxu1 %v3689_v34  ;;  %v2134_v29 = vpop.f32.mrf.mxu2  ;;  %v3897_v39 = vor.u32 %v4273_v18, %v3894_v53 }
 0x115   :  { %2468 = vmatpush.bf16.msra.mxu0 %v3561_v54  ;;  %v2135_v54 = vadd.f32 %v2134_v29, %v2116_v10 }
 0x116   :  { %2525 = vmatpush.bf16.msra.mxu3 %v3945_v35  ;;  %v2153_v30 = vpop.f32.mrf.mxu3  ;;  %v2099_v32 = vpop.f32.mrf.mxu0  ;;  %v3769_v35 = vor.u32 %v4241_v16, %v3766_v19 }
 0x117   :  { %2507 = vmatpush.bf16.msra.mxu2 %v3801_v52  ;;  %v2118_v33 = vpop.f32.mrf.mxu1  ;;  %v2100_v34 = vadd.f32 %v2099_v32, %v6151_v41  ;;  %v2154_v36 = vadd.f32 %v2153_v30, %v2135_v54  ;;  %v4173_v41 = vld [vmem:[%s6508_s1 + $0x50c] sm:$0xf]  ;;  %2421 = vmatmul.bf16.gmra.mxu1 %v4710_v51  ;;  %v3625_v52 = vor.u32 %v4205_v42, %v3622_v45 }
 0x118   :  { %2488 = vmatpush.bf16.msra.mxu1 %v3673_v55  ;;  %2402 = vmatmul.bf16.gmra.mxu0 %v4708_v50  ;;  %v3753_v50 = vor.u32 %v4237_v0, %v3750_v24  ;;  %v3497_v51 = vor.u32 %v4173_v41, %v3494_v40 }
 0x119   :  { %2469 = vmatpush.bf16.msra.mxu0 %v3545_v27  ;;  %v2119_v43 = vadd.f32 %v2118_v33, %v2100_v34  ;;  %2440 = vmatmul.bf16.gmra.mxu2 %v4718_v56  ;;  %v3881_v27 = vor.u32 %v4269_v46, %v3878_v49 }
 0x11a   :  { %2526 = vmatpush.bf16.msra.mxu3 %v3929_v63 }
 0x11b   :  { %2508 = vmatpush.bf16.msra.mxu2 %v3785_v44  ;;  %2459 = vmatmul.bf16.gmra.mxu3 %v4985_v8 }
 0x11c   :  { %2489 = vmatpush.bf16.msra.mxu1 %v3657_v22  ;;  %v2137_v58 = vpop.f32.mrf.mxu2 }
 0x11d   :  { %2470 = vmatpush.bf16.msra.mxu0 %v3529_v15  ;;  %v2138_v55 = vadd.f32 %v2137_v58, %v2119_v43 }
 0x11e   :  { %2527 = vmatpush.bf16.msra.mxu3 %v3913_v23  ;;  %v2156_v59 = vpop.f32.mrf.mxu3  ;;  %v2101_v63 = vpop.f32.mrf.mxu0 }
 0x11f   :  { %2509 = vmatpush.bf16.msra.mxu2 %v3769_v35  ;;  %v2120_v47 = vpop.f32.mrf.mxu1  ;;  %v2102_v3 = vadd.f32 %v2101_v63, %v6187_v20  ;;  %v2157_v56 = vadd.f32 %v2156_v59, %v2138_v55 }
 0x120   :  { %2490 = vmatpush.bf16.msra.mxu1 %v3641_v38 }
 0x121   :  { %2471 = vmatpush.bf16.msra.mxu0 %v3513_v57  ;;  %v2121_v8 = vadd.f32 %v2120_v47, %v2102_v3 }
 0x122   :  { %2528 = vmatpush.bf16.msra.mxu3 %v3897_v39 }
 0x123   :  { %2510 = vmatpush.bf16.msra.mxu2 %v3753_v50 }
 0x124   :  { %2491 = vmatpush.bf16.msra.mxu1 %v3625_v52  ;;  %v2139_v7 = vpop.f32.mrf.mxu2 }
 0x125   :  { %2472 = vmatpush.bf16.msra.mxu0 %v3497_v51  ;;  %v2140_v62 = vadd.f32 %v2139_v7, %v2121_v8 }
 0x126   :  { %2529 = vmatpush.bf16.msra.mxu3 %v3881_v27  ;;  %v2158_v10 = vpop.f32.mrf.mxu3  ;;  %v2170_v11 = vpop.f32.mrf.mxu0 }
 0x127   :  { %v2189_v12 = vpop.f32.mrf.mxu1  ;;  %v2171_v44 = vadd.f32 %v2170_v11, %v6242_v61  ;;  %v2159_v15 = vadd.f32 %v2158_v10, %v2140_v62  ;;  %2492 = vmatmul.bf16.vlgmr.msra.gmra.mxu1 %v4866_v5 }
 0x128   :  { %2473 = vmatmul.bf16.vlgmr.msra.gmra.mxu0 %v4855_v1 }
 0x129   :  { %v6317_v16 = vadd.f32 %v2189_v12, %v2171_v44  ;;  %2511 = vmatmul.bf16.vlgmr.msra.gmra.mxu2 %v4868_v6 }
 0x12b   :  { %2530 = vmatmul.bf16.vlgmr.msra.gmra.mxu3 %v5105_v17  ;;  %v2544_v17 = vrot.slane %v6154_v28, 4 }
 0x12c   :  { %v2208_v20 = vpop.f32.mrf.mxu2 }
 0x12d   :  { %v2545_v57 = vadd.f32 %v2544_v17, %v6154_v28 }
 0x12e   :  { %v2227_v19 = vpop.f32.mrf.mxu3  ;;  %v2172_v23 = vpop.f32.mrf.mxu0 }
 0x12f   :  { %v2228_v22 = vadd.f32 %v2227_v19, %v2208_v20  ;;  %v2191_v25 = vpop.f32.mrf.mxu1  ;;  %v2173_v4 = vadd.f32 %v2172_v23, %v2154_v36 }
 0x131   :  { %v6323_v26 = vadd.f32 %v2191_v25, %v2173_v4 }
 0x133   :  { %v2550_v61 = vadd.f32 %v6323_v26, %v6317_v16 }
 0x134   :  { %v2210_v29 = vpop.f32.mrf.mxu2 }
 0x136   :  { %v2229_v30 = vpop.f32.mrf.mxu3  ;;  %v2175_v31 = vpop.f32.mrf.mxu0 }
 0x137   :  { %v2230_v1 = vadd.f32 %v2229_v30, %v2210_v29  ;;  %v2194_v5 = vpop.f32.mrf.mxu1  ;;  %v2176_v18 = vadd.f32 %v2175_v31, %v2157_v56  ;;  %2497 = vmatmul.bf16.gmra.mxu1 %v4998_v13 }
 0x138   :  { %2478 = vmatmul.bf16.gmra.mxu0 %v4987_v9  ;;  %v2546_v9 = vrot.slane %v2545_v57, 2 }
 0x139   :  { %v6327_v6 = vadd.f32 %v2194_v5, %v2176_v18  ;;  %2516 = vmatmul.bf16.gmra.mxu2 %v5000_v14 }
 0x13a   :  { %v2547_v40 = vadd.f32 %v2546_v9, %v2545_v57 }
 0x13b   :  { %2535 = vmatmul.bf16.gmra.mxu3 %v5213_v21  ;;  %v2551_v53 = vadd.f32 %v2550_v61, %v6327_v6 }
 0x13c   :  { %v2213_v54 = vpop.f32.mrf.mxu2  ;;  %v2548_v49 = vrot.slane %v2547_v40, 1 }
 0x13e   :  { %v2232_v32 = vpop.f32.mrf.mxu3  ;;  %v2177_v34 = vpop.f32.mrf.mxu0  ;;  %v2549_v55 = vadd.f32 %v2548_v49, %v2547_v40 }
 0x13f   :  { %v2233_v33 = vadd.f32 %v2232_v32, %v2213_v54  ;;  %v2196_v35 = vpop.f32.mrf.mxu1  ;;  %v2178_v0 = vadd.f32 %v2177_v34, %v2159_v15 }
 0x141   :  { %v6336_v24 = vadd.f32 %v2196_v35, %v2178_v0 }
 0x143   :  { %v2552_v13 = vadd.f32 %v2551_v53, %v6336_v24 }
 0x144   :  { %v2215_v36 = vpop.f32.mrf.mxu2 }
 0x145   :  { %v2553_v14 = vrot.slane %v2552_v13, 4 }
 0x146   :  { %v2234_v21 = vpop.f32.mrf.mxu3  ;;  %v2246_v39 = vpop.f32.mrf.mxu0 }
 0x147   :  { %v2235_v38 = vadd.f32 %v2234_v21, %v2215_v36  ;;  %v2265_v41 = vpop.f32.mrf.mxu1  ;;  %v2554_v42 = vadd.f32 %v2553_v14, %v2552_v13  ;;  %v2247_v43 = vadd.f32 %v2246_v39, %v2228_v22 }
 0x149   :  { %v2555_v45 = vrot.slane %v2554_v42, 2  ;;  %v2266_v46 = vadd.f32 %v2265_v41, %v2247_v43 }
 0x14b   :  { %v2556_v50 = vadd.f32 %v2555_v45, %v2554_v42 }
 0x14c   :  { %v2284_v51 = vpop.f32.mrf.mxu2 }
 0x14d   :  { %v2557_v28 = vrot.slane %v2556_v50, 1  ;;  %v2285_v27 = vadd.f32 %v2284_v51, %v2266_v46 }
 0x14e   :  { %v2303_v52 = vpop.f32.mrf.mxu3  ;;  %v2248_v58 = vpop.f32.mrf.mxu0 }
 0x14f   :  { %v2267_v59 = vpop.f32.mrf.mxu1  ;;  %v2558_v63 = vadd.f32 %v2557_v28, %v2556_v50  ;;  %v2249_v47 = vadd.f32 %v2248_v58, %v2230_v1  ;;  %v2304_v3 = vadd.f32 %v2303_v52, %v2285_v27 }
 0x151   :  { %v6339_v56 = vadd.f32 %v2558_v63, %v2549_v55  ;;  %v2268_v8 = vadd.f32 %v2267_v59, %v2249_v47 }
 0x154   :  { %v2286_v7 = vpop.f32.mrf.mxu2 }
 0x155   :  { %v2287_v62 = vadd.f32 %v2286_v7, %v2268_v8 }
 0x156   :  { %v2305_v10 = vpop.f32.mrf.mxu3  ;;  %v2251_v11 = vpop.f32.mrf.mxu0 }
 0x157   :  { %v2270_v12 = vpop.f32.mrf.mxu1  ;;  %v2252_v44 = vadd.f32 %v2251_v11, %v2233_v33  ;;  %v2306_v15 = vadd.f32 %v2305_v10, %v2287_v62 }
 0x159   :  { %v2271_v20 = vadd.f32 %v2270_v12, %v2252_v44 }
 0x15c   :  { %v2289_v19 = vpop.f32.mrf.mxu2 }
 0x15d   :  { %v2290_v23 = vadd.f32 %v2289_v19, %v2271_v20 }
 0x15e   :  { %v2308_v22 = vpop.f32.mrf.mxu3  ;;  %v2253_v25 = vpop.f32.mrf.mxu0 }
 0x15f   :  { %v2272_v4 = vpop.f32.mrf.mxu1  ;;  %v2254_v61 = vadd.f32 %v2253_v25, %v2235_v38  ;;  %v2309_v29 = vadd.f32 %v2308_v22, %v2290_v23 }
 0x161   :  { %v2273_v30 = vadd.f32 %v2272_v4, %v2254_v61 }
 0x164   :  { %v2291_v1 = vpop.f32.mrf.mxu2 }
 0x165   :  { %v2292_v5 = vadd.f32 %v2291_v1, %v2273_v30 }
 0x166   :  { %v2310_v31 = vpop.f32.mrf.mxu3  ;;  %v2322_v18 = vpop.f32.mrf.mxu0 }
 0x167   :  { %v2341_v17 = vpop.f32.mrf.mxu1  ;;  %v2323_v53 = vadd.f32 %v2322_v18, %v2304_v3  ;;  %v2311_v54 = vadd.f32 %v2310_v31, %v2292_v5 }
 0x169   :  { %v2342_v32 = vadd.f32 %v2341_v17, %v2323_v53 }
 0x16c   :  { %v2360_v34 = vpop.f32.mrf.mxu2 }
 0x16d   :  { %v6341_v35 = vadd.f32 %v2360_v34, %v2342_v32 }
 0x16e   :  { %v2379_v33 = vpop.f32.mrf.mxu3  ;;  %v2324_v57 = vpop.f32.mrf.mxu0 }
 0x16f   :  { %v2343_v0 = vpop.f32.mrf.mxu1  ;;  %v2325_v9 = vadd.f32 %v2324_v57, %v2306_v15 }
 0x171   :  { %v2344_v13 = vadd.f32 %v2343_v0, %v2325_v9 }
 0x174   :  { %v2362_v14 = vpop.f32.mrf.mxu2 }
 0x175   :  { %v6343_v21 = vadd.f32 %v2362_v14, %v2344_v13 }
 0x176   :  { %v2381_v36 = vpop.f32.mrf.mxu3  ;;  %v2327_v38 = vpop.f32.mrf.mxu0 }
 0x177   :  { %v2346_v39 = vpop.f32.mrf.mxu1  ;;  %v2328_v41 = vadd.f32 %v2327_v38, %v2309_v29  ;;  %v2559_v40 = vadd.f32 %v6343_v21, %v6341_v35 }
 0x179   :  { %v2347_v42 = vadd.f32 %v2346_v39, %v2328_v41 }
 0x17c   :  { %v2365_v43 = vpop.f32.mrf.mxu2 }
 0x17d   :  { %v6347_v46 = vadd.f32 %v2365_v43, %v2347_v42 }
 0x17e   :  { %v2384_v45 = vpop.f32.mrf.mxu3  ;;  %v2329_v49 = vpop.f32.mrf.mxu0 }
 0x17f   :  { %v2348_v50 = vpop.f32.mrf.mxu1  ;;  %v2330_v28 = vadd.f32 %v2329_v49, %v2311_v54  ;;  %v2560_v51 = vadd.f32 %v2559_v40, %v6347_v46 }
 0x181   :  { %v2349_v52 = vadd.f32 %v2348_v50, %v2330_v28 }
 0x184   :  { %v2367_v27 = vpop.f32.mrf.mxu2 }
 0x185   :  { %v6350_v59 = vadd.f32 %v2367_v27, %v2349_v52 }
 0x186   :  { %v2386_v58 = vpop.f32.mrf.mxu3  ;;  %v2398_v55 = vpop.f32.mrf.mxu0 }
 0x187   :  { %v2417_v63 = vpop.f32.mrf.mxu1  ;;  %v2561_v47 = vadd.f32 %v2560_v51, %v6350_v59  ;;  %v2399_v34 = vadd.f32 %v2398_v55, %v2379_v33 }
 0x189   :  { %v2562_v3 = vrot.slane %v2561_v47, 4 }
 0x18b   :  { %v2563_v8 = vadd.f32 %v2562_v3, %v2561_v47 }
 0x18c   :  { %v2436_v7 = vpop.f32.mrf.mxu2 }
 0x18d   :  { %v2564_v62 = vrot.slane %v2563_v8, 2 }
 0x18e   :  { %v2455_v10 = vpop.f32.mrf.mxu3  ;;  %v2400_v11 = vpop.f32.mrf.mxu0 }
 0x18f   :  { %v2419_v12 = vpop.f32.mrf.mxu1  ;;  %v2565_v44 = vadd.f32 %v2564_v62, %v2563_v8  ;;  %v2401_v53 = vadd.f32 %v2400_v11, %v2381_v36 }
 0x191   :  { %v2566_v15 = vrot.slane %v2565_v44, 1  ;;  %v2420_v13 = vadd.f32 %v2419_v12, %v2401_v53 }
 0x193   :  { %v2567_v20 = vadd.f32 %v2566_v15, %v2565_v44 }
 0x194   :  { %v2438_v19 = vpop.f32.mrf.mxu2 }
 0x195   :  { %v6354_v23 = vadd.f32 %v6339_v56, %v2567_v20  ;;  %v2418_v56 = vadd.f32 %v2417_v63, %v2399_v34  ;;  %v2439_v14 = vadd.f32 %v2438_v19, %v2420_v13 }
 0x196   :  { %v2457_v22 = vpop.f32.mrf.mxu3  ;;  %v2403_v25 = vpop.f32.mrf.mxu0 }
 0x197   :  { %v2422_v4 = vpop.f32.mrf.mxu1  ;;  %v2404_v57 = vadd.f32 %v2403_v25, %v2384_v45  ;;  %v2437_v39 = vadd.f32 %v2436_v7, %v2418_v56  ;;  %v2458_v49 = vadd.f32 %v2457_v22, %v2439_v14 }
 0x199   :  { %v2423_v38 = vadd.f32 %v2422_v4, %v2404_v57  ;;  %v2456_v28 = vadd.f32 %v2455_v10, %v2437_v39 }
 0x19c   :  { %v2441_v61 = vpop.f32.mrf.mxu2 }
 0x19d   :  { %v2442_v41 = vadd.f32 %v2441_v61, %v2423_v38 }
 0x19e   :  { %v2460_v29 = vpop.f32.mrf.mxu3  ;;  %v2405_v30 = vpop.f32.mrf.mxu0 }
 0x19f   :  { %v2424_v1 = vpop.f32.mrf.mxu1  ;;  %v2406_v40 = vadd.f32 %v2405_v30, %v2386_v58  ;;  %v2461_v51 = vadd.f32 %v2460_v29, %v2442_v41 }
 0x1a1   :  { %v2425_v36 = vadd.f32 %v2424_v1, %v2406_v40 }
 0x1a4   :  { %v2443_v31 = vpop.f32.mrf.mxu2 }
 0x1a5   :  { %v2444_v33 = vadd.f32 %v2443_v31, %v2425_v36 }
 0x1a6   :  { %v2462_v5 = vpop.f32.mrf.mxu3  ;;  %v2474_v18 = vpop.f32.mrf.mxu0 }
 0x1a7   :  { %v2493_v17 = vpop.f32.mrf.mxu1  ;;  %v2475_v45 = vadd.f32 %v2474_v18, %v2456_v28  ;;  %v2463_v8 = vadd.f32 %v2462_v5, %v2444_v33 }
 0x1a9   :  { %v2494_v62 = vadd.f32 %v2493_v17, %v2475_v45 }
 0x1ac   :  { %v2512_v54 = vpop.f32.mrf.mxu2 }
 0x1ad   :  { %v2513_v12 = vadd.f32 %v2512_v54, %v2494_v62 }
 0x1ae   :  { %v2531_v32 = vpop.f32.mrf.mxu3  ;;  %v2476_v0 = vpop.f32.mrf.mxu0 }
 0x1af   :  { %v2495_v9 = vpop.f32.mrf.mxu1  ;;  %v2477_v52 = vadd.f32 %v2476_v0, %v2458_v49  ;;  %v2532_v19 = vadd.f32 %v2531_v32, %v2513_v12 }
 0x1b1   :  { %v2496_v47 = vadd.f32 %v2495_v9, %v2477_v52 }
 0x1b4   :  { %v2514_v42 = vpop.f32.mrf.mxu2 }
 0x1b5   :  { %v2515_v7 = vadd.f32 %v2514_v42, %v2496_v47 }
 0x1b6   :  { %v2533_v43 = vpop.f32.mrf.mxu3  ;;  %v2479_v50 = vpop.f32.mrf.mxu0 }
 0x1b7   :  { %v2498_v27 = vpop.f32.mrf.mxu1  ;;  %v2480_v55 = vadd.f32 %v2479_v50, %v2461_v51  ;;  %v2534_v20 = vadd.f32 %v2533_v43, %v2515_v7 }
 0x1b9   :  { %v2499_v11 = vadd.f32 %v2498_v27, %v2480_v55  ;;  %v2568_v61 = vadd.f32 %v2534_v20, %v2532_v19 }
 0x1bc   :  { %v2517_v3 = vpop.f32.mrf.mxu2 }
 0x1bd   :  { %v2518_v44 = vadd.f32 %v2517_v3, %v2499_v11 }
 0x1be   :  { %v2536_v63 = vpop.f32.mrf.mxu3  ;;  %v2481_v58 = vpop.f32.mrf.mxu0 }
 0x1bf   :  { %v2482_v15 = vadd.f32 %v2481_v58, %v2463_v8  ;;  %v2500_v10 = vpop.f32.mrf.mxu1  ;;  %v2537_v22 = vadd.f32 %v2536_v63, %v2518_v44 }
 0x1c1   :  { %v2501_v25 = vadd.f32 %v2500_v10, %v2482_v15  ;;  %v2569_v1 = vadd.f32 %v2568_v61, %v2537_v22 }
 0x1c4   :  { %v2519_v4 = vpop.f32.mrf.mxu2 }
 0x1c5   :  { %v2520_v29 = vadd.f32 %v2519_v4, %v2501_v25 }
 0x1c6   :  { %v2538_v30 = vpop.f32.mrf.mxu3 }
 0x1c7   :  { %v2539_v31 = vadd.f32 %v2538_v30, %v2520_v29 }
 0x1c9   :  { %v2570_v18 = vadd.f32 %v2569_v1, %v2539_v31 }
 0x1cb   :  { %v2571_v5 = vrot.slane %v2570_v18, 4 }
 0x1cd   :  { %v2572_v17 = vadd.f32 %v2571_v5, %v2570_v18 }
 0x1cf   :  { %v2573_v53 = vrot.slane %v2572_v17, 2 }
 0x1d1   :  { %v2574_v34 = vadd.f32 %v2573_v53, %v2572_v17 }
 0x1d3   :  { %v2575_v57 = vrot.slane %v2574_v34, 1 }
 0x1d5   :  { %v2576_v54 = vadd.f32 %v2575_v57, %v2574_v34 }
 0x1d7   :  { %v2579_v0 = vadd.f32 %v6354_v23, %v2576_v54 }
 0x1d9   :  { %v2580_v9 = vmul.f32 0.0078125, %v2579_v0 }
 0x1db   :  { %v2581_v13 = vperm.slane %v2580_v9, 0 }
 0x1dd   :  { %v6358_v32 = vsub.f32 %v5955_v2, %v2581_v13  ;;  %v6361_v56 = vsub.f32 %v6317_v16, %v2581_v13  ;;  %v6364_v14 = vsub.f32 %v6341_v35, %v2581_v13  ;;  %v6366_v38 = vsub.f32 %v2532_v19, %v2581_v13 }
 0x1de   :  { %v6369_v39 = vsub.f32 %v6012_v60, %v2581_v13  ;;  %v6372_v41 = vsub.f32 %v6323_v26, %v2581_v13  ;;  %v6375_v23 = vsub.f32 %v6343_v21, %v2581_v13  ;;  %v6377_v40 = vsub.f32 %v2534_v20, %v2581_v13 }
 0x1df   :  { %v6380_v2 = vsub.f32 %v6070_v48, %v2581_v13  ;;  %v6383_v16 = vsub.f32 %v6327_v6, %v2581_v13  ;;  %v6386_v35 = vsub.f32 %v6347_v46, %v2581_v13  ;;  %v6388_v42 = vsub.f32 %v2537_v22, %v2581_v13 }
 0x1e0   :  { %v6391_v60 = vsub.f32 %v6140_v37, %v2581_v13  ;;  %v6394_v26 = vsub.f32 %v6336_v24, %v2581_v13  ;;  %v6397_v21 = vsub.f32 %v6350_v59, %v2581_v13  ;;  %v6399_v43 = vsub.f32 %v2539_v31, %v2581_v13 }
 0x1e1   :  { %v2598_v48 = vmul.f32 %v6358_v32, %v6358_v32  ;;  %v2599_v6 = vmul.f32 %v6361_v56, %v6361_v56  ;;  %v2600_v46 = vmul.f32 %v6364_v14, %v6364_v14  ;;  %v2601_v37 = vmul.f32 %v6366_v38, %v6366_v38 }
 0x1e2   :  { %v2602_v24 = vmul.f32 %v6369_v39, %v6369_v39  ;;  %v2603_v59 = vmul.f32 %v6372_v41, %v6372_v41  ;;  %v2604_v49 = vmul.f32 %v6375_v23, %v6375_v23  ;;  %v2605_v50 = vmul.f32 %v6377_v40, %v6377_v40 }
 0x1e3   :  { %v2606_v28 = vmul.f32 %v6380_v2, %v6380_v2  ;;  %v2607_v51 = vmul.f32 %v6383_v16, %v6383_v16  ;;  %v2608_v36 = vmul.f32 %v6386_v35, %v6386_v35  ;;  %v2609_v52 = vmul.f32 %v6388_v42, %v6388_v42 }
 0x1e4   :  { %v2614_v27 = vadd.f32 %v2602_v24, %v2598_v48  ;;  %v2623_v33 = vadd.f32 %v2603_v59, %v2599_v6  ;;  %v2632_v45 = vadd.f32 %v2604_v49, %v2600_v46  ;;  %v2641_v55 = vadd.f32 %v2605_v50, %v2601_v37 }
 0x1e5   :  { %v2610_v47 = vmul.f32 %v6391_v60, %v6391_v60  ;;  %v2611_v3 = vmul.f32 %v6394_v26, %v6394_v26  ;;  %v2612_v63 = vmul.f32 %v6397_v21, %v6397_v21  ;;  %v2613_v8 = vmul.f32 %v6399_v43, %v6399_v43 }
 0x1e6   :  { %v2615_v62 = vadd.f32 %v2614_v27, %v2606_v28  ;;  %v2624_v7 = vadd.f32 %v2623_v33, %v2607_v51  ;;  %v2633_v11 = vadd.f32 %v2632_v45, %v2608_v36  ;;  %v2642_v58 = vadd.f32 %v2641_v55, %v2609_v52  ;;  %v2665_v55 = vld [vmem:[%s6511_s2] sm:$0x1] }
 0x1e8   :  { %v2616_v12 = vadd.f32 %v2615_v62, %v2610_v47  ;;  %v2625_v44 = vadd.f32 %v2624_v7, %v2611_v3  ;;  %v2634_v15 = vadd.f32 %v2633_v11, %v2612_v63  ;;  %v2643_v20 = vadd.f32 %v2642_v58, %v2613_v8 }
 0x1ea   :  { %v2617_v10 = vrot.slane %v2616_v12, 4  ;;  %v2626_v19 = vrot.slane %v2625_v44, 4  ;;  %v2635_v22 = vrot.slane %v2634_v15, 4  ;;  %v2644_v25 = vrot.slane %v2643_v20, 4 }
 0x1ec   :  { %v2618_v4 = vadd.f32 %v2617_v10, %v2616_v12  ;;  %v2627_v61 = vadd.f32 %v2626_v19, %v2625_v44  ;;  %v2636_v29 = vadd.f32 %v2635_v22, %v2634_v15  ;;  %v2645_v30 = vadd.f32 %v2644_v25, %v2643_v20 }
 0x1ee   :  { %v2619_v1 = vrot.slane %v2618_v4, 2  ;;  %v2628_v31 = vrot.slane %v2627_v61, 2  ;;  %v2637_v18 = vrot.slane %v2636_v29, 2  ;;  %v2646_v5 = vrot.slane %v2645_v30, 2 }
 0x1f0   :  { %v2620_v17 = vadd.f32 %v2619_v1, %v2618_v4  ;;  %v2629_v53 = vadd.f32 %v2628_v31, %v2627_v61  ;;  %v2638_v34 = vadd.f32 %v2637_v18, %v2636_v29  ;;  %v2647_v57 = vadd.f32 %v2646_v5, %v2645_v30 }
 0x1f2   :  { %v2621_v54 = vrot.slane %v2620_v17, 1  ;;  %v2630_v0 = vrot.slane %v2629_v53, 1  ;;  %v2639_v9 = vrot.slane %v2638_v34, 1  ;;  %v2648_v6 = vrot.slane %v2647_v57, 1 }
 0x1f4   :  { %v2622_v13 = vadd.f32 %v2621_v54, %v2620_v17  ;;  %v2631_v48 = vadd.f32 %v2630_v0, %v2629_v53  ;;  %v2640_v46 = vadd.f32 %v2639_v9, %v2638_v34  ;;  %v2649_v24 = vadd.f32 %v2648_v6, %v2647_v57 }
 0x1f6   :  { %v2650_v37 = vadd.f32 %v2631_v48, %v2622_v13 }
 0x1f8   :  { %v2651_v59 = vadd.f32 %v2650_v37, %v2640_v46 }
 0x1fa   :  { %v2652_v49 = vadd.f32 %v2651_v59, %v2649_v24 }
 0x1fc   :  { %v2653_v50 = vmul.f32 0.0078125, %v2652_v49 }
 0x1fe   :  { %v2654_v28 = vadd.f32 1e-05, %v2653_v50 }
 0x200   :  { %4301 = vrsqrt.f32 %v2654_v28  ;;  %vm2661_vm1 = vweird.f32 %v2654_v28 }
 0x206   :  { %v4302_v51 = vpop.eup %4301 }
 0x207   :  { %v2656_v36 = vmul.f32 %v4302_v51, %v2654_v28  ;;  %vm2662_vm0 = vweird.f32 %v4302_v51 }
 0x208   :  { %vm2663_vm2 = vmor %vm2661_vm1, %vm2662_vm0 }
 0x209   :  { %v2657_v52 = vmul.f32 %v4302_v51, %v2656_v36 }
 0x20b   :  { %v2658_v27 = vmul.f32 0.5, %v2657_v52 }
 0x20d   :  { %v2659_v33 = vsub.f32 1.5, %v2658_v27 }
 0x20f   :  { %v2660_v45 = vmul.f32 %v4302_v51, %v2659_v33 }
 0x211   :  { %v2664_v47 = vsel %vm2663_vm2, %v4302_v51, %v2660_v45 }
 0x212   :  { %v2666_v3 = vmul.f32 %v2665_v55, %v2664_v47 }
 0x214   :  { %v2668_v63 = vperm.slane %v2666_v3, 0 }
 0x216   :  { %v2669_v8 = vmul.f32 %v2668_v63, %v6358_v32  ;;  %v2670_v62 = vmul.f32 %v2668_v63, %v6361_v56  ;;  %v2671_v7 = vmul.f32 %v2668_v63, %v6364_v14  ;;  %v2672_v11 = vmul.f32 %v2668_v63, %v6366_v38 }
 0x217   :  { %v2673_v58 = vmul.f32 %v2668_v63, %v6369_v39  ;;  %v2674_v12 = vmul.f32 %v2668_v63, %v6372_v41  ;;  %v2675_v44 = vmul.f32 %v2668_v63, %v6375_v23  ;;  %v2676_v15 = vmul.f32 %v2668_v63, %v6377_v40  ;;  %v4300_v23 = vld [vmem:[%s6510_s3] ss:$0 sm:$0xff] }
 0x218   :  { %v2677_v20 = vmul.f32 %v2668_v63, %v6380_v2  ;;  %v2678_v10 = vmul.f32 %v2668_v63, %v6383_v16  ;;  %v2679_v32 = vmul.f32 %v2668_v63, %v6386_v35  ;;  %v2680_v56 = vmul.f32 %v2668_v63, %v6388_v42 }
 0x219   :  { %v2681_v14 = vmul.f32 %v2668_v63, %v6391_v60  ;;  %v2682_v38 = vmul.f32 %v2668_v63, %v6394_v26  ;;  %v2683_v39 = vmul.f32 %v2668_v63, %v6397_v21  ;;  %v2684_v41 = vmul.f32 %v2668_v63, %v6399_v43 }
 0x21a   :  { %v2686_v40 = vadd.f32 %v4300_v23, %v2669_v8  ;;  %v2687_v2 = vadd.f32 %v4300_v23, %v2670_v62  ;;  %v2688_v19 = vadd.f32 %v4300_v23, %v2671_v7  ;;  %v2689_v16 = vadd.f32 %v4300_v23, %v2672_v11 }
 0x21b   :  { %v2690_v22 = vadd.f32 %v4300_v23, %v2673_v58  ;;  %v2691_v35 = vadd.f32 %v4300_v23, %v2674_v12  ;;  %v2692_v25 = vadd.f32 %v4300_v23, %v2675_v44  ;;  %v2693_v42 = vadd.f32 %v4300_v23, %v2676_v15 }
 0x21c   :  { %v2694_v4 = vadd.f32 %v4300_v23, %v2677_v20  ;;  %vm2702_vm3 = vcmp.ge.f32.partialorder %v2686_v40, 0.0  ;;  %vm2703_vm4 = vcmp.ge.f32.partialorder %v2687_v2, 0.0  ;;  %v2695_v60 = vadd.f32 %v4300_v23, %v2678_v10 }
 0x21d   :  { %v2718_v26 = vmul.f32 0.05, %v2686_v40  ;;  %v2719_v21 = vmul.f32 0.05, %v2687_v2  ;;  %v2720_v61 = vmul.f32 0.05, %v2688_v19  ;;  %v2696_v43 = vadd.f32 %v4300_v23, %v2679_v32 }
 0x21e   :  { %vm2704_vm5 = vcmp.ge.f32.partialorder %v2688_v19, 0.0  ;;  %v2721_v29 = vmul.f32 0.05, %v2689_v16  ;;  %v2722_v30 = vmul.f32 0.05, %v2690_v22  ;;  %vm2705_vm6 = vcmp.ge.f32.partialorder %v2689_v16, 0.0 }
 0x21f   :  { %vm2706_vm7 = vcmp.ge.f32.partialorder %v2690_v22, 0.0  ;;  %v2723_v1 = vmul.f32 0.05, %v2691_v35  ;;  %v2734_v31 = vsel %vm2702_vm3, %v2686_v40, %v2718_v26  ;;  %v2697_v18 = vadd.f32 %v4300_v23, %v2680_v56 }
 0x220   :  { %vm2707_vm8 = vcmp.ge.f32.partialorder %v2691_v35, 0.0  ;;  %v2724_v5 = vmul.f32 0.05, %v2692_v25  ;;  %v2735_v17 = vsel %vm2703_vm4, %v2687_v2, %v2719_v21  ;;  %2750 = vst [vmem:[%s6512_s4] sm:$0xff] %v2734_v31  ;;  %v2698_v53 = vadd.f32 %v4300_v23, %v2681_v14 }
 0x221   :  { %vm2708_vm9 = vcmp.ge.f32.partialorder %v2692_v25, 0.0  ;;  %v2725_v34 = vmul.f32 0.05, %v2693_v42  ;;  %v2736_v57 = vsel %vm2704_vm5, %v2688_v19, %v2720_v61  ;;  %vm2709_vm10 = vcmp.ge.f32.partialorder %v2693_v42, 0.0  ;;  %2751 = vst [vmem:[%s6512_s4 + $0x8] sm:$0xff] %v2735_v17 }
 0x222   :  { %v2726_v54 = vmul.f32 0.05, %v2694_v4  ;;  %v2737_v0 = vsel %vm2705_vm6, %v2689_v16, %v2721_v29  ;;  %v2738_v9 = vsel %vm2706_vm7, %v2690_v22, %v2722_v30  ;;  %v2699_v13 = vadd.f32 %v4300_v23, %v2682_v38  ;;  %2752 = vst [vmem:[%s6512_s4 + $0x10] sm:$0xff] %v2736_v57 }
 0x223   :  { %vm2710_vm11 = vcmp.ge.f32.partialorder %v2694_v4, 0.0  ;;  %v2727_v48 = vmul.f32 0.05, %v2695_v60  ;;  %v2739_v6 = vsel %vm2707_vm8, %v2691_v35, %v2723_v1  ;;  %v2700_v46 = vadd.f32 %v4300_v23, %v2683_v39  ;;  %2753 = vst [vmem:[%s6512_s4 + $0x18] sm:$0xff] %v2737_v0 }
 0x224   :  { %vm2711_vm12 = vcmp.ge.f32.partialorder %v2695_v60, 0.0  ;;  %v2728_v37 = vmul.f32 0.05, %v2696_v43  ;;  %v2740_v24 = vsel %vm2708_vm9, %v2692_v25, %v2724_v5  ;;  %v2701_v59 = vadd.f32 %v4300_v23, %v2684_v41  ;;  %2754 = vst [vmem:[%s6512_s4 + $0x20] sm:$0xff] %v2738_v9 }
 0x225   :  { %vm2712_vm13 = vcmp.ge.f32.partialorder %v2696_v43, 0.0  ;;  %v2729_v49 = vmul.f32 0.05, %v2697_v18  ;;  %v2741_v50 = vsel %vm2709_vm10, %v2693_v42, %v2725_v34  ;;  %vm2713_vm14 = vcmp.ge.f32.partialorder %v2697_v18, 0.0  ;;  %2755 = vst [vmem:[%s6512_s4 + $0x28] sm:$0xff] %v2739_v6 }
 0x226   :  { %v2730_v28 = vmul.f32 0.05, %v2698_v53  ;;  %v2742_v51 = vsel %vm2710_vm11, %v2694_v4, %v2726_v54  ;;  %vm2714_vm15 = vcmp.ge.f32.partialorder %v2698_v53, 0.0  ;;  %v2731_v36 = vmul.f32 0.05, %v2699_v13  ;;  %2756 = vst [vmem:[%s6512_s4 + $0x30] sm:$0xff] %v2740_v24 }
 0x227   :  { %v2743_v52 = vsel %vm2711_vm12, %v2695_v60, %v2727_v48  ;;  %vm2715_vm0 = vcmp.ge.f32.partialorder %v2699_v13, 0.0  ;;  %v2732_v27 = vmul.f32 0.05, %v2700_v46  ;;  %v2744_v33 = vsel %vm2712_vm13, %v2696_v43, %v2728_v37  ;;  %2757 = vst [vmem:[%s6512_s4 + $0x38] sm:$0xff] %v2741_v50 }
 0x228   :  { %vm2716_vm1 = vcmp.ge.f32.partialorder %v2700_v46, 0.0  ;;  %v2733_v45 = vmul.f32 0.05, %v2701_v59  ;;  %v2745_v55 = vsel %vm2713_vm14, %v2697_v18, %v2729_v49  ;;  %2758 = vst [vmem:[%s6512_s4 + $0x40] sm:$0xff] %v2742_v51  ;;  %vm2717_vm2 = vcmp.ge.f32.partialorder %v2701_v59, 0.0 }
 0x229   :  { %v2746_v47 = vsel %vm2714_vm15, %v2698_v53, %v2730_v28  ;;  %2759 = vst [vmem:[%s6512_s4 + $0x48] sm:$0xff] %v2743_v52  ;;  %v2747_v3 = vsel %vm2715_vm0, %v2699_v13, %v2731_v36  ;;  %v2748_v63 = vsel %vm2716_vm1, %v2700_v46, %v2732_v27 }
 0x22a   :  { %2760 = vst [vmem:[%s6512_s4 + $0x50] sm:$0xff] %v2744_v33  ;;  %v2749_v8 = vsel %vm2717_vm2, %v2701_v59, %v2733_v45 }
 0x22b   :  { %2761 = vst [vmem:[%s6512_s4 + $0x58] sm:$0xff] %v2745_v55 }
 0x22c   :  { %2762 = vst [vmem:[%s6512_s4 + $0x60] sm:$0xff] %v2746_v47 }
 0x22d   :  { %2763 = vst [vmem:[%s6512_s4 + $0x68] sm:$0xff] %v2747_v3 }
 0x22e   :  { %2764 = vst [vmem:[%s6512_s4 + $0x70] sm:$0xff] %v2748_v63 }
 0x22f   :  { %2765 = vst [vmem:[%s6512_s4 + $0x78] sm:$0xff] %v2749_v8 }

// kernel: gxy_forward.11
= control target key start
LH: loop header
LB: loop body
LE: loop exit
PB: predicated region body
PF: predicated region fallthrough
CT: control target
= control target key end

     0   :  { %vm555_vm0 = vcmask 523264   ;;  %s1787_s1 = inlined_call_operand.vmem [shape: bf16[576,128], index: 1, kind: input, shape index: {}]   ;;  %s1788_s2 = inlined_call_operand.vmem [shape: f32[1,128], index: 2, kind: input, shape index: {}]   ;;  %s1789_s0 = inlined_call_operand.vmem [shape: bf16[128,576], index: 0, kind: input, shape index: {}]   ;;  %s1790_s3 = inlined_call_operand.vmem [shape: f32[128,128], index: 3, kind: output, shape index: {}]  }
   0x1   :  { %v1220_v0 = vld [vmem:[%s1787_s1 + $0x38] sm:$0xff]  ;;  %v1219_v1 = vld [vmem:[%s1787_s1 + $0x30] sm:$0xff]  ;;  %v1218_v2 = vld [vmem:[%s1787_s1 + $0x28] sm:$0xff] }
   0x2   :  { %1249 = vmatpush.bf16.msra.mxu1 %v1220_v0  ;;  %1250 = vmatpush.bf16.msra.mxu2 %v1220_v0  ;;  %v1217_v3 = vld [vmem:[%s1787_s1 + $0x20] sm:$0xff]  ;;  %v1216_v4 = vld [vmem:[%s1787_s1 + $0x18] sm:$0xff]  ;;  %v1215_v5 = vld [vmem:[%s1787_s1 + $0x10] sm:$0xff] }
   0x3   :  { %1251 = vmatpush.bf16.msra.mxu3 %v1220_v0  ;;  %580 = vmatpush.bf16.msra.mxu0 %v1220_v0  ;;  %v1214_v6 = vld [vmem:[%s1787_s1 + $0x8] sm:$0xff]  ;;  %v1213_v7 = vld [vmem:[%s1787_s1] sm:$0xff]  ;;  %v903_v8 = vld [vmem:[%s1789_s0 + $0x50] sm:$0xf] }
   0x4   :  { %v1185_v9 = vld [vmem:[%s1789_s0 + $0x60] sm:$0xf0]  ;;  %v943_v10 = vld [vmem:[%s1789_s0 + $0xa0] sm:$0xf]  ;;  %v1195_v11 = vld [vmem:[%s1789_s0 + $0xb0] sm:$0xf0] }
   0x5   :  { %v983_v12 = vld [vmem:[%s1789_s0 + $0xf0] sm:$0xf]  ;;  %v1205_v13 = vld [vmem:[%s1789_s0 + $0x100] sm:$0xf0]  ;;  %v863_v14 = vld [vmem:[%s1789_s0] sm:$0xf]  ;;  %v904_v18 = vor.u32 %v1185_v9, %v903_v8  ;;  %v944_v19 = vor.u32 %v1195_v11, %v943_v10 }
   0x6   :  { %1252 = vmatpush.bf16.msra.mxu1 %v1219_v1  ;;  %1253 = vmatpush.bf16.msra.mxu2 %v1219_v1  ;;  %v1175_v15 = vld [vmem:[%s1789_s0 + $0x10] sm:$0xf0]  ;;  %v1236_v16 = vld [vmem:[%s1787_s1 + $0xb8] sm:$0xff]  ;;  %v984_v20 = vor.u32 %v1205_v13, %v983_v12  ;;  %v1234_v28 = vld [vmem:[%s1787_s1 + $0xa8] sm:$0xff] }
   0x7   :  { %1254 = vmatpush.bf16.msra.mxu3 %v1219_v1  ;;  %581 = vmatpush.bf16.msra.mxu0 %v1219_v1  ;;  %v1228_v17 = vld [vmem:[%s1787_s1 + $0x78] sm:$0xff]  ;;  %v864_v21 = vor.u32 %v1175_v15, %v863_v14  ;;  %v1235_v24 = vld [vmem:[%s1787_s1 + $0xb0] sm:$0xff]  ;;  %v1226_v29 = vld [vmem:[%s1787_s1 + $0x68] sm:$0xff] }
   0x8   :  { %v1244_v22 = vld [vmem:[%s1787_s1 + $0xf8] sm:$0xff]  ;;  %v1227_v25 = vld [vmem:[%s1787_s1 + $0x70] sm:$0xff]  ;;  %v1242_v30 = vld [vmem:[%s1787_s1 + $0xe8] sm:$0xff] }
   0x9   :  { %v1248_v23 = vld [vmem:[%s1787_s1 + $0x118] sm:$0xff]  ;;  %v1243_v26 = vld [vmem:[%s1787_s1 + $0xf0] sm:$0xff]  ;;  %v1246_v31 = vld [vmem:[%s1787_s1 + $0x108] sm:$0xff] }
   0xa   :  { %1255 = vmatpush.bf16.msra.mxu1 %v1218_v2  ;;  %1256 = vmatpush.bf16.msra.mxu2 %v1218_v2  ;;  %v1247_v27 = vld [vmem:[%s1787_s1 + $0x110] sm:$0xff]  ;;  %v1233_v32 = vld [vmem:[%s1787_s1 + $0xa0] sm:$0xff]  ;;  %v923_v35 = vld [vmem:[%s1789_s0 + $0x78] sm:$0xf] }
   0xb   :  { %1257 = vmatpush.bf16.msra.mxu3 %v1218_v2  ;;  %582 = vmatpush.bf16.msra.mxu0 %v1218_v2  ;;  %v1225_v33 = vld [vmem:[%s1787_s1 + $0x60] sm:$0xff]  ;;  %v1190_v36 = vld [vmem:[%s1789_s0 + $0x88] sm:$0xf0]  ;;  %v963_v37 = vld [vmem:[%s1789_s0 + $0xc8] sm:$0xf] }
   0xc   :  { %v1241_v34 = vld [vmem:[%s1787_s1 + $0xe0] sm:$0xff]  ;;  %v1200_v38 = vld [vmem:[%s1789_s0 + $0xd8] sm:$0xf0]  ;;  %v1003_v39 = vld [vmem:[%s1789_s0 + $0x118] sm:$0xf]  ;;  %v924_v46 = vor.u32 %v1190_v36, %v923_v35 }
   0xd   :  { %v1210_v40 = vld [vmem:[%s1789_s0 + $0x128] sm:$0xf0]  ;;  %v883_v41 = vld [vmem:[%s1789_s0 + $0x28] sm:$0xf]  ;;  %v1180_v42 = vld [vmem:[%s1789_s0 + $0x38] sm:$0xf0]  ;;  %v964_v47 = vor.u32 %v1200_v38, %v963_v37 }
   0xe   :  { %1258 = vmatpush.bf16.msra.mxu1 %v1217_v3  ;;  %1259 = vmatpush.bf16.msra.mxu2 %v1217_v3  ;;  %v1245_v43 = vld [vmem:[%s1787_s1 + $0x100] sm:$0xff]  ;;  %v1232_v44 = vld [vmem:[%s1787_s1 + $0x98] sm:$0xff]  ;;  %v1004_v48 = vor.u32 %v1210_v40, %v1003_v39  ;;  %v884_v49 = vor.u32 %v1180_v42, %v883_v41  ;;  %v1231_v51 = vld [vmem:[%s1787_s1 + $0x90] sm:$0xff] }
   0xf   :  { %1260 = vmatpush.bf16.msra.mxu3 %v1217_v3  ;;  %583 = vmatpush.bf16.msra.mxu0 %v1217_v3  ;;  %v1224_v45 = vld [vmem:[%s1787_s1 + $0x58] sm:$0xff]  ;;  %v1223_v52 = vld [vmem:[%s1787_s1 + $0x50] sm:$0xff]  ;;  %v1230_v54 = vld [vmem:[%s1787_s1 + $0x88] sm:$0xff] }
  0x10   :  { %v1240_v50 = vld [vmem:[%s1787_s1 + $0xd8] sm:$0xff]  ;;  %v1239_v53 = vld [vmem:[%s1787_s1 + $0xd0] sm:$0xff]  ;;  %v1222_v55 = vld [vmem:[%s1787_s1 + $0x48] sm:$0xff] }
  0x11   :  { %v1238_v56 = vld [vmem:[%s1787_s1 + $0xc8] sm:$0xff]  ;;  %v1229_v57 = vld [vmem:[%s1787_s1 + $0x80] sm:$0xff]  ;;  %v865_v61 = vld [vmem:[%s1789_s0 + $0x14] sm:$0xf0] }
  0x12   :  { %1261 = vmatpush.bf16.msra.mxu1 %v1216_v4  ;;  %1262 = vmatpush.bf16.msra.mxu2 %v1216_v4  ;;  %v1221_v58 = vld [vmem:[%s1787_s1 + $0x40] sm:$0xff]  ;;  %v871_v62 = vld [vmem:[%s1789_s0 + $0x8] sm:$0xf]  ;;  %v1176_v63 = vld [vmem:[%s1789_s0 + $0x18] sm:$0xf0] }
  0x13   :  { %1263 = vmatpush.bf16.msra.mxu3 %v1216_v4  ;;  %584 = vmatpush.bf16.msra.mxu0 %v1216_v4  ;;  %v1237_v59 = vld [vmem:[%s1787_s1 + $0xc0] sm:$0xff]  ;;  %v1174_v0 = vld [vmem:[%s1789_s0 + $0xc] sm:$0xf]  ;;  %v879_v2 = vld [vmem:[%s1789_s0 + $0x10] sm:$0xf] }
  0x14   :  { %v1173_v60 = vld [vmem:[%s1789_s0 + $0x4] sm:$0xf]  ;;  %v873_v1 = vld [vmem:[%s1789_s0 + $0x1c] sm:$0xf0]  ;;  %v1178_v8 = vld [vmem:[%s1789_s0 + $0x2c] sm:$0xf] }
  0x15   :  { %v1177_v3 = vld [vmem:[%s1789_s0 + $0x20] sm:$0xf0]  ;;  %v868_v4 = vor.u32 %v1173_v60, %v865_v61  ;;  %v885_v9 = vld [vmem:[%s1789_s0 + $0x3c] sm:$0xf0]  ;;  %v891_v10 = vld [vmem:[%s1789_s0 + $0x30] sm:$0xf] }
  0x16   :  { %1264 = vmatpush.bf16.msra.mxu1 %v1215_v5  ;;  %1265 = vmatpush.bf16.msra.mxu2 %v1215_v5  ;;  %v1181_v11 = vld [vmem:[%s1789_s0 + $0x40] sm:$0xf0]  ;;  %v1179_v12 = vld [vmem:[%s1789_s0 + $0x34] sm:$0xf]  ;;  %v893_v13 = vld [vmem:[%s1789_s0 + $0x44] sm:$0xf0] }
  0x17   :  { %1266 = vmatpush.bf16.msra.mxu3 %v1215_v5  ;;  %585 = vmatpush.bf16.msra.mxu0 %v1215_v5  ;;  %v872_v5 = vor.u32 %v1176_v63, %v871_v62  ;;  %v899_v14 = vld [vmem:[%s1789_s0 + $0x38] sm:$0xf]  ;;  %v1182_v15 = vld [vmem:[%s1789_s0 + $0x48] sm:$0xf0]  ;;  %v1191_v35 = vld [vmem:[%s1789_s0 + $0x90] sm:$0xf0] }
  0x18   :  { %v1189_v36 = vld [vmem:[%s1789_s0 + $0x84] sm:$0xf]  ;;  %v933_v37 = vld [vmem:[%s1789_s0 + $0x94] sm:$0xf0]  ;;  %v939_v38 = vld [vmem:[%s1789_s0 + $0x88] sm:$0xf] }
  0x19   :  { %v1192_v39 = vld [vmem:[%s1789_s0 + $0x98] sm:$0xf0]  ;;  %v936_v42 = vor.u32 %v1189_v36, %v933_v37  ;;  %v1199_v60 = vld [vmem:[%s1789_s0 + $0xd4] sm:$0xf]  ;;  %v973_v61 = vld [vmem:[%s1789_s0 + $0xe4] sm:$0xf0] }
  0x1a   :  { %1267 = vmatpush.bf16.msra.mxu1 %v1214_v6  ;;  %1268 = vmatpush.bf16.msra.mxu2 %v1214_v6  ;;  %v979_v62 = vld [vmem:[%s1789_s0 + $0xd8] sm:$0xf]  ;;  %v1202_v63 = vld [vmem:[%s1789_s0 + $0xe8] sm:$0xf0] }
  0x1b   :  { %1269 = vmatpush.bf16.msra.mxu3 %v1214_v6  ;;  %586 = vmatpush.bf16.msra.mxu0 %v1214_v6  ;;  %v876_v6 = vor.u32 %v1174_v0, %v873_v1 }
  0x1e   :  { %1270 = vmatpush.bf16.msra.mxu1 %v1213_v7  ;;  %1271 = vmatpush.bf16.msra.mxu2 %v1213_v7 }
  0x1f   :  { %1272 = vmatpush.bf16.msra.mxu3 %v1213_v7  ;;  %587 = vmatpush.bf16.msra.mxu0 %v1213_v7  ;;  %v880_v7 = vor.u32 %v1177_v3, %v879_v2  ;;  %v976_v2 = vor.u32 %v1199_v60, %v973_v61  ;;  %v980_v3 = vor.u32 %v1202_v63, %v979_v62 }
  0x21   :  { %598 = vmatmul.bf16.vlgmr.msra.gmra.mxu1 %v904_v18  ;;  %608 = vmatmul.bf16.vlgmr.msra.gmra.mxu2 %v944_v19  ;;  %v896_v18 = vor.u32 %v1179_v12, %v893_v13  ;;  %v900_v19 = vor.u32 %v1182_v15, %v899_v14 }
  0x22   :  { %678 = vmatpush.bf16.msrb.mxu2 %v1236_v16  ;;  %629 = vmatpush.bf16.msrb.mxu1 %v1228_v17  ;;  %v888_v16 = vor.u32 %v1178_v8, %v885_v9  ;;  %v892_v17 = vor.u32 %v1181_v11, %v891_v10  ;;  %v1204_v8 = vld [vmem:[%s1789_s0 + $0xfc] sm:$0xf]  ;;  %v993_v9 = vld [vmem:[%s1789_s0 + $0x10c] sm:$0xf0]  ;;  %v999_v10 = vld [vmem:[%s1789_s0 + $0x100] sm:$0xf] }
  0x23   :  { %618 = vmatmul.bf16.vlgmr.msra.gmra.mxu3 %v984_v20  ;;  %588 = vmatmul.bf16.vlgmr.msra.gmra.mxu0 %v864_v21  ;;  %v1183_v20 = vld [vmem:[%s1789_s0 + $0x54] sm:$0xf]  ;;  %v905_v21 = vld [vmem:[%s1789_s0 + $0x64] sm:$0xf0]  ;;  %v996_v15 = vor.u32 %v1204_v8, %v993_v9 }
  0x24   :  { %727 = vmatpush.bf16.msrb.mxu3 %v1244_v22  ;;  %780 = vmatpush.bf16.msrb.mxu0 %v1248_v23  ;;  %v911_v22 = vld [vmem:[%s1789_s0 + $0x58] sm:$0xf]  ;;  %v1186_v23 = vld [vmem:[%s1789_s0 + $0x68] sm:$0xf0]  ;;  %v1207_v11 = vld [vmem:[%s1789_s0 + $0x110] sm:$0xf0] }
  0x26   :  { %679 = vmatpush.bf16.msrb.mxu2 %v1235_v24  ;;  %630 = vmatpush.bf16.msrb.mxu1 %v1227_v25  ;;  %v1184_v24 = vld [vmem:[%s1789_s0 + $0x5c] sm:$0xf]  ;;  %v913_v25 = vld [vmem:[%s1789_s0 + $0x6c] sm:$0xf0] }
  0x28   :  { %728 = vmatpush.bf16.msrb.mxu3 %v1243_v26  ;;  %781 = vmatpush.bf16.msrb.mxu0 %v1247_v27  ;;  %v919_v26 = vld [vmem:[%s1789_s0 + $0x60] sm:$0xf]  ;;  %v1187_v27 = vld [vmem:[%s1789_s0 + $0x70] sm:$0xf0] }
  0x2a   :  { %680 = vmatpush.bf16.msrb.mxu2 %v1234_v28  ;;  %631 = vmatpush.bf16.msrb.mxu1 %v1226_v29  ;;  %v908_v28 = vor.u32 %v1183_v20, %v905_v21  ;;  %v912_v29 = vor.u32 %v1186_v23, %v911_v22 }
  0x2c   :  { %729 = vmatpush.bf16.msrb.mxu3 %v1242_v30  ;;  %782 = vmatpush.bf16.msrb.mxu0 %v1246_v31  ;;  %v916_v30 = vor.u32 %v1184_v24, %v913_v25  ;;  %v920_v31 = vor.u32 %v1187_v27, %v919_v26  ;;  %v1208_v25 = vld [vmem:[%s1789_s0 + $0x11c] sm:$0xf]  ;;  %v1005_v26 = vld [vmem:[%s1789_s0 + $0x12c] sm:$0xf0]  ;;  %v1011_v27 = vld [vmem:[%s1789_s0 + $0x120] sm:$0xf] }
  0x2d   :  { %v1008_v36 = vor.u32 %v1208_v25, %v1005_v26 }
  0x2e   :  { %681 = vmatpush.bf16.msrb.mxu2 %v1233_v32  ;;  %632 = vmatpush.bf16.msrb.mxu1 %v1225_v33  ;;  %v1188_v32 = vld [vmem:[%s1789_s0 + $0x7c] sm:$0xf]  ;;  %v925_v33 = vld [vmem:[%s1789_s0 + $0x8c] sm:$0xf0] }
  0x2f   :  { %v928_v40 = vor.u32 %v1188_v32, %v925_v33  ;;  %v1212_v32 = vld [vmem:[%s1789_s0 + $0x138] sm:$0xf0] }
  0x30   :  { %730 = vmatpush.bf16.msrb.mxu3 %v1241_v34  ;;  %783 = vmatpush.bf16.msrb.mxu0 %v1245_v43  ;;  %v931_v34 = vld [vmem:[%s1789_s0 + $0x80] sm:$0xf]  ;;  %v940_v43 = vor.u32 %v1192_v39, %v939_v38 }
  0x31   :  { %603 = vmatmul.bf16.gmra.mxu1 %v924_v46  ;;  %613 = vmatmul.bf16.gmra.mxu2 %v964_v47  ;;  %v932_v41 = vor.u32 %v1191_v35, %v931_v34  ;;  %v951_v46 = vld [vmem:[%s1789_s0 + $0xa8] sm:$0xf]  ;;  %v1196_v47 = vld [vmem:[%s1789_s0 + $0xb8] sm:$0xf0] }
  0x32   :  { %682 = vmatpush.bf16.msrb.mxu2 %v1232_v44  ;;  %633 = vmatpush.bf16.msrb.mxu1 %v1224_v45  ;;  %v1193_v44 = vld [vmem:[%s1789_s0 + $0xa4] sm:$0xf]  ;;  %v945_v45 = vld [vmem:[%s1789_s0 + $0xb4] sm:$0xf0] }
  0x33   :  { %623 = vmatmul.bf16.gmra.mxu3 %v1004_v48  ;;  %593 = vmatmul.bf16.gmra.mxu0 %v884_v49  ;;  %v1194_v48 = vld [vmem:[%s1789_s0 + $0xac] sm:$0xf]  ;;  %v953_v49 = vld [vmem:[%s1789_s0 + $0xbc] sm:$0xf0] }
  0x34   :  { %731 = vmatpush.bf16.msrb.mxu3 %v1240_v50  ;;  %v959_v50 = vld [vmem:[%s1789_s0 + $0xb0] sm:$0xf] }
  0x36   :  { %683 = vmatpush.bf16.msrb.mxu2 %v1231_v51  ;;  %634 = vmatpush.bf16.msrb.mxu1 %v1223_v52  ;;  %v1197_v51 = vld [vmem:[%s1789_s0 + $0xc0] sm:$0xf0]  ;;  %v948_v52 = vor.u32 %v1193_v44, %v945_v45 }
  0x38   :  { %732 = vmatpush.bf16.msrb.mxu3 %v1239_v53  ;;  %v952_v53 = vor.u32 %v1196_v47, %v951_v46 }
  0x3a   :  { %684 = vmatpush.bf16.msrb.mxu2 %v1230_v54  ;;  %635 = vmatpush.bf16.msrb.mxu1 %v1222_v55  ;;  %v956_v54 = vor.u32 %v1194_v48, %v953_v49  ;;  %v960_v55 = vor.u32 %v1197_v51, %v959_v50 }
  0x3c   :  { %733 = vmatpush.bf16.msrb.mxu3 %v1238_v56  ;;  %v1198_v56 = vld [vmem:[%s1789_s0 + $0xcc] sm:$0xf] }
  0x3e   :  { %685 = vmatpush.bf16.msrb.mxu2 %v1229_v57  ;;  %636 = vmatpush.bf16.msrb.mxu1 %v1221_v58  ;;  %v965_v57 = vld [vmem:[%s1789_s0 + $0xdc] sm:$0xf0]  ;;  %v971_v58 = vld [vmem:[%s1789_s0 + $0xd0] sm:$0xf] }
  0x3f   :  { %v968_v0 = vor.u32 %v1198_v56, %v965_v57 }
  0x40   :  { %734 = vmatpush.bf16.msrb.mxu3 %v1237_v59  ;;  %v1201_v59 = vld [vmem:[%s1789_s0 + $0xe0] sm:$0xf0] }
  0x41   :  { %637 = vmatmul.bf16.vlgmr.msrb.gmra.mxu1 %v868_v4  ;;  %686 = vmatmul.bf16.vlgmr.msrb.gmra.mxu2 %v872_v5  ;;  %v972_v1 = vor.u32 %v1201_v59, %v971_v58  ;;  %v1203_v4 = vld [vmem:[%s1789_s0 + $0xf4] sm:$0xf]  ;;  %v985_v5 = vld [vmem:[%s1789_s0 + $0x104] sm:$0xf0] }
  0x42   :  { %v988_v12 = vor.u32 %v1203_v4, %v985_v5 }
  0x43   :  { %735 = vmatmul.bf16.vlgmr.msrb.gmra.mxu3 %v876_v6  ;;  %1165 = vmatmul.msk.bf16.vlgmr.msrb.gmra.mxu0 %vm555_vm0, %v880_v7  ;;  %v991_v6 = vld [vmem:[%s1789_s0 + $0xf8] sm:$0xf]  ;;  %v1206_v7 = vld [vmem:[%s1789_s0 + $0x108] sm:$0xf0] }
  0x44   :  { %v992_v13 = vor.u32 %v1206_v7, %v991_v6 }
  0x51   :  { %642 = vmatmul.bf16.gmra.mxu1 %v888_v16  ;;  %691 = vmatmul.bf16.gmra.mxu2 %v892_v17  ;;  %v1000_v16 = vor.u32 %v1207_v11, %v999_v10 }
  0x53   :  { %740 = vmatmul.bf16.gmra.mxu3 %v896_v18  ;;  %1166 = vmatmul.msk.bf16.gmra.mxu0 %vm555_vm0, %v900_v19  ;;  %v1662_v18 = vld [vmem:[%s1788_s2] ss:$0 sm:$0xff] }
  0x61   :  { %647 = vmatmul.bf16.gmra.mxu1 %v908_v28  ;;  %696 = vmatmul.bf16.gmra.mxu2 %v912_v29  ;;  %v1211_v28 = vld [vmem:[%s1789_s0 + $0x130] sm:$0xf0]  ;;  %v1209_v29 = vld [vmem:[%s1789_s0 + $0x124] sm:$0xf] }
  0x62   :  { %v1012_v37 = vor.u32 %v1211_v28, %v1011_v27 }
  0x63   :  { %745 = vmatmul.bf16.gmra.mxu3 %v916_v30  ;;  %1167 = vmatmul.msk.bf16.gmra.mxu0 %vm555_vm0, %v920_v31  ;;  %v1013_v30 = vld [vmem:[%s1789_s0 + $0x134] sm:$0xf0]  ;;  %v1019_v31 = vld [vmem:[%s1789_s0 + $0x128] sm:$0xf] }
  0x71   :  { %652 = vmatmul.bf16.gmra.mxu1 %v928_v40  ;;  %701 = vmatmul.bf16.gmra.mxu2 %v932_v41  ;;  %v1016_v40 = vor.u32 %v1209_v29, %v1013_v30  ;;  %v1020_v41 = vor.u32 %v1212_v32, %v1019_v31 }
  0x73   :  { %750 = vmatmul.bf16.gmra.mxu3 %v936_v42  ;;  %1168 = vmatmul.msk.bf16.gmra.mxu0 %vm555_vm0, %v940_v43 }
  0x81   :  { %657 = vmatmul.bf16.gmra.mxu1 %v948_v52  ;;  %706 = vmatmul.bf16.gmra.mxu2 %v952_v53 }
  0x83   :  { %755 = vmatmul.bf16.gmra.mxu3 %v956_v54  ;;  %1169 = vmatmul.msk.bf16.gmra.mxu0 %vm555_vm0, %v960_v55 }
  0x91   :  { %662 = vmatmul.bf16.gmra.mxu1 %v968_v0  ;;  %711 = vmatmul.bf16.gmra.mxu2 %v972_v1 }
  0x93   :  { %760 = vmatmul.bf16.gmra.mxu3 %v976_v2  ;;  %1170 = vmatmul.msk.bf16.gmra.mxu0 %vm555_vm0, %v980_v3 }
  0x9e   :  { %v1656_v14 = vpop.f32.mrf.mxu1 }
  0xa0   :  { %v589_v17 = vpop.f32.mrf.mxu0 }
  0xa1   :  { %667 = vmatmul.bf16.gmra.mxu1 %v988_v12  ;;  %716 = vmatmul.bf16.gmra.mxu2 %v992_v13  ;;  %v590_v55 = vadd.f32 %v1662_v18, %v589_v17 }
  0xa3   :  { %765 = vmatmul.bf16.gmra.mxu3 %v996_v15  ;;  %1171 = vmatmul.msk.bf16.gmra.mxu0 %vm555_vm0, %v1000_v16 }
  0xa4   :  { %v609_v19 = vpop.f32.mrf.mxu2 }
  0xa5   :  { %v1665_v20 = vadd.f32 %v1662_v18, %v609_v19 }
  0xa6   :  { %v619_v21 = vpop.f32.mrf.mxu3  ;;  %v1670_v23 = vpop.f32.mrf.mxu1 }
  0xa7   :  { %v1668_v22 = vadd.f32 %v1662_v18, %v619_v21 }
  0xa8   :  { %v591_v24 = vpop.f32.mrf.mxu0 }
  0xa9   :  { %v592_v63 = vadd.f32 %v1662_v18, %v591_v24 }
  0xac   :  { %v611_v33 = vpop.f32.mrf.mxu2 }
  0xad   :  { %v1697_v34 = vadd.f32 %v1662_v18, %v611_v33 }
  0xae   :  { %v621_v35 = vpop.f32.mrf.mxu3  ;;  %v1702_v39 = vpop.f32.mrf.mxu1 }
  0xaf   :  { %v1700_v38 = vadd.f32 %v1662_v18, %v621_v35  ;;  %v600_v35 = vadd.f32 %v1662_v18, %v1656_v14 }
  0xb0   :  { %v594_v42 = vpop.f32.mrf.mxu0 }
  0xb1   :  { %672 = vmatmul.bf16.gmra.mxu1 %v1008_v36  ;;  %721 = vmatmul.bf16.gmra.mxu2 %v1012_v37  ;;  %v595_v9 = vadd.f32 %v1662_v18, %v594_v42 }
  0xb3   :  { %770 = vmatmul.bf16.gmra.mxu3 %v1016_v40  ;;  %1172 = vmatmul.msk.bf16.gmra.mxu0 %vm555_vm0, %v1020_v41 }
  0xb4   :  { %v614_v43 = vpop.f32.mrf.mxu2 }
  0xb5   :  { %v1706_v44 = vadd.f32 %v1662_v18, %v614_v43 }
  0xb6   :  { %v624_v45 = vpop.f32.mrf.mxu3  ;;  %v1711_v47 = vpop.f32.mrf.mxu1 }
  0xb7   :  { %v1709_v46 = vadd.f32 %v1662_v18, %v624_v45 }
  0xb8   :  { %v596_v48 = vpop.f32.mrf.mxu0 }
  0xb9   :  { %v597_v24 = vadd.f32 %v1662_v18, %v596_v48 }
  0xbc   :  { %v616_v49 = vpop.f32.mrf.mxu2 }
  0xbd   :  { %v1714_v50 = vadd.f32 %v1662_v18, %v616_v49 }
  0xbe   :  { %v626_v51 = vpop.f32.mrf.mxu3  ;;  %v638_v53 = vpop.f32.mrf.mxu1 }
  0xbf   :  { %v1717_v52 = vadd.f32 %v1662_v18, %v626_v51  ;;  %v639_v56 = vadd.f32 %v638_v53, %v590_v55  ;;  %v602_v51 = vadd.f32 %v1662_v18, %v1670_v23 }
  0xc0   :  { %v785_v54 = vpop.f32.mrf.mxu0 }
  0xc4   :  { %v687_v57 = vpop.f32.mrf.mxu2 }
  0xc5   :  { %v688_v58 = vadd.f32 %v687_v57, %v639_v56 }
  0xc6   :  { %v736_v59 = vpop.f32.mrf.mxu3  ;;  %v640_v60 = vpop.f32.mrf.mxu1 }
  0xc7   :  { %v737_v61 = vadd.f32 %v736_v59, %v688_v58  ;;  %v641_v1 = vadd.f32 %v640_v60, %v592_v63 }
  0xc8   :  { %v787_v62 = vpop.f32.mrf.mxu0 }
  0xc9   :  { %v786_v0 = vadd.f32 %v785_v54, %v737_v61  ;;  %v605_v61 = vadd.f32 %v1662_v18, %v1702_v39 }
  0xcb   :  { %1274 = vtanh.f32 %v786_v0 }
  0xcc   :  { %v689_v2 = vpop.f32.mrf.mxu2 }
  0xcd   :  { %v690_v3 = vadd.f32 %v689_v2, %v641_v1 }
  0xce   :  { %v738_v4 = vpop.f32.mrf.mxu3  ;;  %v643_v5 = vpop.f32.mrf.mxu1 }
  0xcf   :  { %v739_v6 = vadd.f32 %v738_v4, %v690_v3  ;;  %v644_v11 = vadd.f32 %v643_v5, %v595_v9 }
  0xd0   :  { %v790_v7 = vpop.f32.mrf.mxu0 }
  0xd1   :  { %v1275_v8 = vpop.eup %1274  ;;  %v788_v10 = vadd.f32 %v787_v62, %v739_v6  ;;  %v607_v6 = vadd.f32 %v1662_v18, %v1711_v47 }
  0xd2   :  { %841 = vst [vmem:[%s1790_s3] sm:$0xff] %v1275_v8 }
  0xd3   :  { %1276 = vtanh.f32 %v788_v10 }
  0xd4   :  { %v692_v12 = vpop.f32.mrf.mxu2 }
  0xd5   :  { %v693_v13 = vadd.f32 %v692_v12, %v644_v11 }
  0xd6   :  { %v741_v15 = vpop.f32.mrf.mxu3  ;;  %v645_v16 = vpop.f32.mrf.mxu1 }
  0xd7   :  { %v742_v17 = vadd.f32 %v741_v15, %v693_v13  ;;  %v646_v26 = vadd.f32 %v645_v16, %v597_v24 }
  0xd8   :  { %v792_v19 = vpop.f32.mrf.mxu0 }
  0xd9   :  { %v1277_v21 = vpop.eup %1276  ;;  %v791_v25 = vadd.f32 %v790_v7, %v742_v17 }
  0xda   :  { %842 = vst [vmem:[%s1790_s3 + $0x8] sm:$0xff] %v1277_v21 }
  0xdb   :  { %1278 = vtanh.f32 %v791_v25 }
  0xdc   :  { %v694_v27 = vpop.f32.mrf.mxu2 }
  0xdd   :  { %v695_v28 = vadd.f32 %v694_v27, %v646_v26 }
  0xde   :  { %v743_v29 = vpop.f32.mrf.mxu3  ;;  %v648_v30 = vpop.f32.mrf.mxu1 }
  0xdf   :  { %v744_v31 = vadd.f32 %v743_v29, %v695_v28  ;;  %v649_v37 = vadd.f32 %v648_v30, %v600_v35 }
  0xe0   :  { %v795_v32 = vpop.f32.mrf.mxu0 }
  0xe1   :  { %v1279_v33 = vpop.eup %1278  ;;  %v793_v36 = vadd.f32 %v792_v19, %v744_v31 }
  0xe2   :  { %843 = vst [vmem:[%s1790_s3 + $0x10] sm:$0xff] %v1279_v33 }
  0xe3   :  { %1280 = vtanh.f32 %v793_v36 }
  0xe4   :  { %v697_v40 = vpop.f32.mrf.mxu2 }
  0xe5   :  { %v698_v41 = vadd.f32 %v697_v40, %v649_v37 }
  0xe6   :  { %v746_v42 = vpop.f32.mrf.mxu3  ;;  %v650_v43 = vpop.f32.mrf.mxu1 }
  0xe7   :  { %v747_v45 = vadd.f32 %v746_v42, %v698_v41  ;;  %v651_v14 = vadd.f32 %v650_v43, %v602_v51 }
  0xe8   :  { %v797_v48 = vpop.f32.mrf.mxu0 }
  0xe9   :  { %v1281_v49 = vpop.eup %1280  ;;  %v796_v53 = vadd.f32 %v795_v32, %v747_v45 }
  0xea   :  { %844 = vst [vmem:[%s1790_s3 + $0x18] sm:$0xff] %v1281_v49 }
  0xeb   :  { %1282 = vtanh.f32 %v796_v53 }
  0xec   :  { %v699_v54 = vpop.f32.mrf.mxu2 }
  0xed   :  { %v700_v55 = vadd.f32 %v699_v54, %v651_v14 }
  0xee   :  { %v748_v56 = vpop.f32.mrf.mxu3  ;;  %v653_v57 = vpop.f32.mrf.mxu1 }
  0xef   :  { %v749_v58 = vadd.f32 %v748_v56, %v700_v55  ;;  %v654_v23 = vadd.f32 %v653_v57, %v605_v61 }
  0xf0   :  { %v800_v59 = vpop.f32.mrf.mxu0 }
  0xf1   :  { %v1283_v60 = vpop.eup %1282  ;;  %v798_v62 = vadd.f32 %v797_v48, %v749_v58 }
  0xf2   :  { %845 = vst [vmem:[%s1790_s3 + $0x20] sm:$0xff] %v1283_v60 }
  0xf3   :  { %1284 = vtanh.f32 %v798_v62 }
  0xf4   :  { %v702_v63 = vpop.f32.mrf.mxu2 }
  0xf5   :  { %v703_v0 = vadd.f32 %v702_v63, %v654_v23 }
  0xf6   :  { %v751_v1 = vpop.f32.mrf.mxu3  ;;  %v655_v2 = vpop.f32.mrf.mxu1 }
  0xf7   :  { %v752_v3 = vadd.f32 %v751_v1, %v703_v0  ;;  %v656_v39 = vadd.f32 %v655_v2, %v607_v6 }
  0xf8   :  { %v802_v4 = vpop.f32.mrf.mxu0 }
  0xf9   :  { %v1285_v5 = vpop.eup %1284  ;;  %v801_v7 = vadd.f32 %v800_v59, %v752_v3 }
  0xfa   :  { %846 = vst [vmem:[%s1790_s3 + $0x28] sm:$0xff] %v1285_v5 }
  0xfb   :  { %1286 = vtanh.f32 %v801_v7 }
  0xfc   :  { %v704_v8 = vpop.f32.mrf.mxu2 }
  0xfd   :  { %v705_v9 = vadd.f32 %v704_v8, %v656_v39 }
  0xfe   :  { %v753_v10 = vpop.f32.mrf.mxu3  ;;  %v658_v11 = vpop.f32.mrf.mxu1 }
  0xff   :  { %v754_v12 = vadd.f32 %v753_v10, %v705_v9  ;;  %v659_v18 = vadd.f32 %v658_v11, %v1665_v20 }
 0x100   :  { %v805_v13 = vpop.f32.mrf.mxu0 }
 0x101   :  { %v1287_v15 = vpop.eup %1286  ;;  %v803_v16 = vadd.f32 %v802_v4, %v754_v12 }
 0x102   :  { %847 = vst [vmem:[%s1790_s3 + $0x30] sm:$0xff] %v1287_v15 }
 0x103   :  { %1288 = vtanh.f32 %v803_v16 }
 0x104   :  { %v707_v47 = vpop.f32.mrf.mxu2 }
 0x105   :  { %v708_v17 = vadd.f32 %v707_v47, %v659_v18 }
 0x106   :  { %v756_v19 = vpop.f32.mrf.mxu3  ;;  %v660_v21 = vpop.f32.mrf.mxu1 }
 0x107   :  { %v757_v24 = vadd.f32 %v756_v19, %v708_v17  ;;  %v661_v28 = vadd.f32 %v660_v21, %v1697_v34 }
 0x108   :  { %v807_v25 = vpop.f32.mrf.mxu0 }
 0x109   :  { %v1289_v26 = vpop.eup %1288  ;;  %v806_v27 = vadd.f32 %v805_v13, %v757_v24 }
 0x10a   :  { %848 = vst [vmem:[%s1790_s3 + $0x38] sm:$0xff] %v1289_v26 }
 0x10b   :  { %1290 = vtanh.f32 %v806_v27 }
 0x10c   :  { %v709_v29 = vpop.f32.mrf.mxu2 }
 0x10d   :  { %v710_v30 = vadd.f32 %v709_v29, %v661_v28 }
 0x10e   :  { %v758_v31 = vpop.f32.mrf.mxu3  ;;  %v663_v32 = vpop.f32.mrf.mxu1 }
 0x10f   :  { %v759_v20 = vadd.f32 %v758_v31, %v710_v30  ;;  %v664_v37 = vadd.f32 %v663_v32, %v1706_v44 }
 0x110   :  { %v810_v33 = vpop.f32.mrf.mxu0 }
 0x111   :  { %v1291_v35 = vpop.eup %1290  ;;  %v808_v36 = vadd.f32 %v807_v25, %v759_v20 }
 0x112   :  { %849 = vst [vmem:[%s1790_s3 + $0x40] sm:$0xff] %v1291_v35 }
 0x113   :  { %1292 = vtanh.f32 %v808_v36 }
 0x114   :  { %v712_v40 = vpop.f32.mrf.mxu2 }
 0x115   :  { %v713_v41 = vadd.f32 %v712_v40, %v664_v37 }
 0x116   :  { %v761_v42 = vpop.f32.mrf.mxu3  ;;  %v665_v43 = vpop.f32.mrf.mxu1 }
 0x117   :  { %v762_v34 = vadd.f32 %v761_v42, %v713_v41  ;;  %v666_v51 = vadd.f32 %v665_v43, %v1714_v50 }
 0x118   :  { %v812_v45 = vpop.f32.mrf.mxu0 }
 0x119   :  { %v1293_v48 = vpop.eup %1292  ;;  %v811_v49 = vadd.f32 %v810_v33, %v762_v34 }
 0x11a   :  { %850 = vst [vmem:[%s1790_s3 + $0x48] sm:$0xff] %v1293_v48 }
 0x11b   :  { %1294 = vtanh.f32 %v811_v49 }
 0x11c   :  { %v714_v53 = vpop.f32.mrf.mxu2 }
 0x11d   :  { %v715_v14 = vadd.f32 %v714_v53, %v666_v51 }
 0x11e   :  { %v763_v54 = vpop.f32.mrf.mxu3  ;;  %v668_v55 = vpop.f32.mrf.mxu1 }
 0x11f   :  { %v764_v44 = vadd.f32 %v763_v54, %v715_v14  ;;  %v669_v59 = vadd.f32 %v668_v55, %v1668_v22 }
 0x120   :  { %v815_v58 = vpop.f32.mrf.mxu0 }
 0x121   :  { %v1295_v56 = vpop.eup %1294  ;;  %v813_v57 = vadd.f32 %v812_v45, %v764_v44 }
 0x122   :  { %851 = vst [vmem:[%s1790_s3 + $0x50] sm:$0xff] %v1295_v56 }
 0x123   :  { %1296 = vtanh.f32 %v813_v57 }
 0x124   :  { %v717_v60 = vpop.f32.mrf.mxu2 }
 0x125   :  { %v718_v61 = vadd.f32 %v717_v60, %v669_v59 }
 0x126   :  { %v766_v62 = vpop.f32.mrf.mxu3  ;;  %v670_v23 = vpop.f32.mrf.mxu1 }
 0x127   :  { %v767_v50 = vadd.f32 %v766_v62, %v718_v61  ;;  %v671_v1 = vadd.f32 %v670_v23, %v1700_v38 }
 0x128   :  { %v817_v2 = vpop.f32.mrf.mxu0 }
 0x129   :  { %v1297_v63 = vpop.eup %1296  ;;  %v816_v0 = vadd.f32 %v815_v58, %v767_v50 }
 0x12a   :  { %852 = vst [vmem:[%s1790_s3 + $0x58] sm:$0xff] %v1297_v63 }
 0x12b   :  { %1298 = vtanh.f32 %v816_v0 }
 0x12c   :  { %v719_v3 = vpop.f32.mrf.mxu2 }
 0x12d   :  { %v720_v4 = vadd.f32 %v719_v3, %v671_v1 }
 0x12e   :  { %v768_v5 = vpop.f32.mrf.mxu3  ;;  %v673_v6 = vpop.f32.mrf.mxu1 }
 0x12f   :  { %v769_v22 = vadd.f32 %v768_v5, %v720_v4  ;;  %v674_v8 = vadd.f32 %v673_v6, %v1709_v46 }
 0x130   :  { %v820_v12 = vpop.f32.mrf.mxu0 }
 0x131   :  { %v1299_v7 = vpop.eup %1298  ;;  %v818_v39 = vadd.f32 %v817_v2, %v769_v22 }
 0x132   :  { %853 = vst [vmem:[%s1790_s3 + $0x60] sm:$0xff] %v1299_v7 }
 0x133   :  { %1300 = vtanh.f32 %v818_v39 }
 0x134   :  { %v722_v9 = vpop.f32.mrf.mxu2 }
 0x135   :  { %v723_v10 = vadd.f32 %v722_v9, %v674_v8 }
 0x136   :  { %v771_v11 = vpop.f32.mrf.mxu3  ;;  %v675_v13 = vpop.f32.mrf.mxu1 }
 0x137   :  { %v772_v38 = vadd.f32 %v771_v11, %v723_v10  ;;  %v676_v18 = vadd.f32 %v675_v13, %v1717_v52 }
 0x138   :  { %v822_v46 = vpop.f32.mrf.mxu0 }
 0x139   :  { %v1301_v15 = vpop.eup %1300  ;;  %v821_v16 = vadd.f32 %v820_v12, %v772_v38 }
 0x13a   :  { %854 = vst [vmem:[%s1790_s3 + $0x68] sm:$0xff] %v1301_v15 }
 0x13b   :  { %1302 = vtanh.f32 %v821_v16 }
 0x13c   :  { %v724_v47 = vpop.f32.mrf.mxu2 }
 0x13d   :  { %v725_v17 = vadd.f32 %v724_v47, %v676_v18 }
 0x13e   :  { %v773_v19 = vpop.f32.mrf.mxu3 }
 0x13f   :  { %v774_v21 = vadd.f32 %v773_v19, %v725_v17 }
 0x141   :  { %v1303_v24 = vpop.eup %1302  ;;  %v823_v25 = vadd.f32 %v822_v46, %v774_v21 }
 0x142   :  { %855 = vst [vmem:[%s1790_s3 + $0x70] sm:$0xff] %v1303_v24 }
 0x143   :  { %1304 = vtanh.f32 %v823_v25 }
 0x149   :  { %v1305_v26 = vpop.eup %1304 }
 0x14a   :  { %856 = vst [vmem:[%s1790_s3 + $0x78] sm:$0xff] %v1305_v26 }

</bundles_post_ra>
